<compile_context>
chip_gen: v6e
topology: v6e:2x2x1
jax: 0.10.0
libtpu: 0.0.40
codegen_flags: <defaults>
</compile_context>

<pallas_src>
import functools

import jax
import jax.numpy as jnp
from jax.experimental import pallas as pl
from jax.experimental.pallas import tpu as pltpu

_EPS = 1e-5  # InstanceNorm2d default eps


def _pick_hw_tile(hw, cap):
    """Largest divisor of hw that is <= cap and (multiple of 8 or == hw)."""
    t = min(hw, cap)
    while t > 1:
        if hw % t == 0 and (t % 8 == 0 or t == hw):
            return t
        t -= 1
    return hw


def _hw_cap_from_bytes(k, elem_bytes, tile_bytes=1 << 20, hard_cap=8192):
    """Row cap so each (t, K) input block is roughly `tile_bytes`."""
    return int(max(256, min(hard_cap, tile_bytes // max(1, k * elem_bytes))))


def _vmem_limit_bytes(block_bytes, scratch_bytes=0):
    """Scoped-VMEM request from real footprints: 2 pipeline buffers per blocked
    operand + scratch, 2x headroom, clamped well under v7x's 64 MiB physical."""
    need = 2 * block_bytes + scratch_bytes
    return int(min(48 * 1024 * 1024, max(8 * 1024 * 1024, 2 * need)))


# ---------------------------------------------------------------------------
# Kernel 1: conv-as-matmul + bias + ReLU (layer 1, no norm), HW-tiled grid.
# ---------------------------------------------------------------------------
def _bias_relu_kernel(p_ref, w_ref, b_ref, o_ref):
    # p_ref: (t, K) bf16   w_ref: (K, Cout) bf16   b_ref: (1, Cout) f32
    y = jnp.dot(p_ref[...], w_ref[...], preferred_element_type=jnp.float32)
    o_ref[...] = jnp.maximum(y + b_ref[...], 0.0).astype(o_ref.dtype)


def conv_bias_relu(patches, w2d, bias, *, tile_bytes=1 << 20):
    """patches: (N, HW, K) bf16; w2d: (K, Cout) bf16; bias: (1, Cout) f32."""
    N, HW, K = patches.shape
    Cout = w2d.shape[1]
    t = _pick_hw_tile(HW, _hw_cap_from_bytes(K, patches.dtype.itemsize, tile_bytes))
    block_bytes = t * K * 2 + K * Cout * 2 + Cout * 4 + t * Cout * 2
    return pl.pallas_call(
        _bias_relu_kernel,
        out_shape=jax.ShapeDtypeStruct((N, HW, Cout), jnp.bfloat16),
        grid=(N, HW // t),
        in_specs=[
            pl.BlockSpec((None, t, K), lambda n, h: (n, h, 0)),
            pl.BlockSpec((K, Cout), lambda n, h: (0, 0)),
            pl.BlockSpec((1, Cout), lambda n, h: (0, 0)),
        ],
        out_specs=pl.BlockSpec((None, t, Cout), lambda n, h: (n, h, 0)),
        compiler_params=pltpu.CompilerParams(
            dimension_semantics=("parallel", "parallel"),
            vmem_limit_bytes=_vmem_limit_bytes(block_bytes)),
    )(patches, w2d, bias)


# ---------------------------------------------------------------------------
# Kernel 2: conv-as-matmul + InstanceNorm(affine=False) + ReLU.
#   grid = (N, pass, hw_tiles).  Pass 0: one matmul per HW tile, f32 result
#   cached in a per-sample VMEM scratch, per-channel sum/sumsq accumulated.
#   Pass 1: normalize + ReLU straight out of the cache (no patch re-read, no
#   second matmul), write the output tiles.
# ---------------------------------------------------------------------------
def _make_instnorm_kernel(hw_total, tile, eps):
    inv_hw = 1.0 / float(hw_total)

    def kernel(p_ref, w_ref, o_ref, y_ref, sum_ref, sq_ref):
        s = pl.program_id(1)
        h = pl.program_id(2)

        @pl.when(jnp.logical_and(s == 0, h == 0))
        def _init():
            sum_ref[...] = jnp.zeros_like(sum_ref)
            sq_ref[...] = jnp.zeros_like(sq_ref)

        @pl.when(s == 0)
        def _conv_and_accumulate():
            # bf16 x bf16 -> f32 accumulation on the MXU; cache the result.
            y = jnp.dot(p_ref[...], w_ref[...], preferred_element_type=jnp.float32)
            start = pl.multiple_of(h * tile, tile)
            y_ref[pl.ds(start, tile), :] = y
            sum_ref[...] += jnp.sum(y, axis=0, keepdims=True)
            sq_ref[...] += jnp.sum(y * y, axis=0, keepdims=True)

        @pl.when(s == 1)
        def _normalize():
            start = pl.multiple_of(h * tile, tile)
            y = y_ref[pl.ds(start, tile), :]
            mean = sum_ref[...] * inv_hw
            var = sq_ref[...] * inv_hw - mean * mean     # biased variance, f32
            rstd = jax.lax.rsqrt(var + eps)
            o_ref[...] = jnp.maximum((y - mean) * rstd, 0.0).astype(o_ref.dtype)

    return kernel


def conv_instnorm_relu(patches, w2d, *, eps=_EPS, tile_bytes=1 << 20):
    """patches: (N, HW, K) bf16; w2d: (K, Cout) bf16 -> (N, HW, Cout) bf16."""
    N, HW, K = patches.shape
    Cout = w2d.shape[1]
    t = _pick_hw_tile(HW, _hw_cap_from_bytes(K, patches.dtype.itemsize, tile_bytes))
    kernel = _make_instnorm_kernel(HW, t, eps)
    block_bytes = t * K * 2 + K * Cout * 2 + t * Cout * 2
    scratch_bytes = HW * Cout * 4 + 2 * Cout * 4
    return pl.pallas_call(
        kernel,
        out_shape=jax.ShapeDtypeStruct((N, HW, Cout), jnp.bfloat16),
        grid=(N, 2, HW // t),
        in_specs=[
            # Pass 0 streams HW tiles; pass 1 pins block 0 so patches are never
            # re-read from HBM while normalizing out of the VMEM cache.
            pl.BlockSpec((None, t, K), lambda n, s, h: (n, h * (1 - s), 0)),
            pl.BlockSpec((K, Cout), lambda n, s, h: (0, 0)),
        ],
        # Output block index is frozen during pass 0 (nothing is written then),
        # so no garbage tiles get flushed before pass 1 overwrites every tile.
        out_specs=pl.BlockSpec((None, t, Cout), lambda n, s, h: (n, h * s, 0)),
        scratch_shapes=[
            pltpu.VMEM((HW, Cout), jnp.float32),   # per-sample conv-output cache
            pltpu.VMEM((1, Cout), jnp.float32),    # per-channel sum
            pltpu.VMEM((1, Cout), jnp.float32),    # per-channel sum of squares
        ],
        compiler_params=pltpu.CompilerParams(
            dimension_semantics=("parallel", "arbitrary", "arbitrary"),
            vmem_limit_bytes=_vmem_limit_bytes(block_bytes, scratch_bytes)),
    )(patches, w2d)


# ---------------------------------------------------------------------------
# Kernel 3: fused, batched tail = layer4(conv+IN+ReLU) + layer5(4x4 valid conv
#           + IN + ReLU) + merged mu/logvar heads.  One grid step for the whole
#           batch; layer-4 matmul has M = N*16 rows, layer-5 is a single matmul
#           with K = 16*C5 (no unrolled M=1 tap pushes).
# ---------------------------------------------------------------------------
def _make_tail_kernel(batch, taps, eps):
    def kernel(p4_ref, w4_ref, w5_ref, wh_ref, bh_ref, o_ref, xf_ref):
        c5 = w4_ref.shape[1]

        # Layer 4: all samples in one bf16 MXU push, f32 accumulation.
        y4 = jnp.dot(p4_ref[...], w4_ref[...],
                     preferred_element_type=jnp.float32)        # (N*16, C5)

        # Per-sample InstanceNorm(affine=False) + ReLU over the 16-pixel map,
        # laid out flat (tap-major) into VMEM scratch so layer 5 is one matmul.
        for n in range(batch):                                   # static unroll
            seg = y4[n * taps:(n + 1) * taps, :]                 # (16, C5)
            m = jnp.mean(seg, axis=0, keepdims=True)
            v = jnp.mean(seg * seg, axis=0, keepdims=True) - m * m
            xn = jnp.maximum((seg - m) * jax.lax.rsqrt(v + eps), 0.0)
            for p in range(taps):                                # static slices
                xf_ref[n:n + 1, p * c5:(p + 1) * c5] = xn[p:p + 1, :]

        # Layer 5: the 4x4 valid conv over the 4x4 map is a full contraction
        # over (tap, cin) -> a single bf16 matmul with K = 16*C5.
        y5 = jnp.dot(xf_ref[...].astype(jnp.bfloat16), w5_ref[...],
                     preferred_element_type=jnp.float32)         # (N, C5)

        # InstanceNorm over layer 5's 1x1 spatial map is degenerate: the spatial
        # mean equals the value and the variance is zero, so the normalized
        # activation is exactly 0 (matches nn.InstanceNorm2d(affine=False)).
        m5 = y5
        v5 = jnp.zeros_like(y5)
        x5 = jnp.maximum((y5 - m5) * jax.lax.rsqrt(v5 + eps), 0.0)

        # Merged mu/logvar 1x1-conv heads, lane-padded -> dense store.
        o_ref[...] = (jnp.dot(x5.astype(jnp.bfloat16), wh_ref[...],
                              preferred_element_type=jnp.float32)
                      + bh_ref[...]).astype(o_ref.dtype)

    return kernel


def tail_fused(p4_2d, w4_2d, w5_2d, wh_pad, bh_pad, *, batch, taps, eps=_EPS):
    NP, K4 = p4_2d.shape
    assert NP == batch * taps
    C5 = w4_2d.shape[1]
    Hp = wh_pad.shape[1]
    kernel = _make_tail_kernel(batch, taps, eps)
    block_bytes = (NP * K4 * 2 + K4 * C5 * 2 + taps * C5 * C5 * 2
                   + C5 * Hp * 2 + Hp * 4 + batch * Hp * 4)
    scratch_bytes = batch * taps * C5 * 4
    return pl.pallas_call(
        kernel,
        out_shape=jax.ShapeDtypeStruct((batch, Hp), jnp.float32),
        grid=(1,),
        in_specs=[
            pl.BlockSpec((NP, K4), lambda i: (0, 0)),
            pl.BlockSpec((K4, C5), lambda i: (0, 0)),
            pl.BlockSpec((taps * C5, C5), lambda i: (0, 0)),
            pl.BlockSpec((C5, Hp), lambda i: (0, 0)),
            pl.BlockSpec((1, Hp), lambda i: (0, 0)),
        ],
        out_specs=pl.BlockSpec((batch, Hp), lambda i: (0, 0)),
        scratch_shapes=[pltpu.VMEM((batch, taps * C5), jnp.float32)],
        compiler_params=pltpu.CompilerParams(
            dimension_semantics=("arbitrary",),
            vmem_limit_bytes=_vmem_limit_bytes(block_bytes, scratch_bytes)),
    )(p4_2d, w4_2d, w5_2d, wh_pad, bh_pad)


# ---------------------------------------------------------------------------
# Glue: im2col patch extraction (NHWC, bf16), parameter init, forward pass.
# ---------------------------------------------------------------------------
def im2col(x, kh, kw, stride, pad):
    """x: (N, H, W, C) -> patches (N, Ho*Wo, kh*kw*C), Ho, Wo (keeps x's dtype)."""
    N, H, W, C = x.shape
    xp = jnp.pad(x, ((0, 0), (pad, pad), (pad, pad), (0, 0)))
    Ho = (H + 2 * pad - kh) // stride + 1
    Wo = (W + 2 * pad - kw) // stride + 1
    cols = []
    for i in range(kh):
        for j in range(kw):
            cols.append(xp[:, i:i + stride * Ho:stride, j:j + stride * Wo:stride, :])
    patches = jnp.concatenate(cols, axis=-1)
    return patches.reshape(N, Ho * Wo, kh * kw * C), Ho, Wo


def init_params(key, nlatent, input_nc, nef):
    def conv_w(k, kh, kw, cin, cout):
        return jax.random.normal(k, (kh, kw, cin, cout), jnp.float32) * 0.02

    ks = jax.random.split(key, 10)
    p = {}
    p["w1"] = conv_w(ks[0], 3, 3, input_nc, nef)          # bias=True
    p["b1"] = jax.random.normal(ks[1], (nef,), jnp.float32) * 0.02
    p["w2"] = conv_w(ks[2], 3, 3, nef, 2 * nef)            # bias=False
    p["w3"] = conv_w(ks[3], 3, 3, 2 * nef, 4 * nef)        # bias=False
    p["w4"] = conv_w(ks[4], 3, 3, 4 * nef, 8 * nef)        # bias=False
    p["w5"] = conv_w(ks[5], 4, 4, 8 * nef, 8 * nef)        # bias=False
    p["w_mu"] = conv_w(ks[6], 1, 1, 8 * nef, nlatent)      # heads, bias=True
    p["b_mu"] = jax.random.normal(ks[7], (nlatent,), jnp.float32) * 0.02
    p["w_lv"] = conv_w(ks[8], 1, 1, 8 * nef, nlatent)
    p["b_lv"] = jax.random.normal(ks[9], (nlatent,), jnp.float32) * 0.02
    return p


def latent_encoder_forward(params, x_nchw, nef, nlatent):
    N = x_nchw.shape[0]
    bf16 = jnp.bfloat16
    x = jnp.transpose(x_nchw, (0, 2, 3, 1)).astype(bf16)   # NCHW -> NHWC, bf16

    # Layer 1: Conv(input_nc -> nef, k3 s2 p1, bias) + ReLU (no norm).
    p1, H1, W1 = im2col(x, 3, 3, 2, 1)
    w1 = params["w1"].reshape(-1, nef).astype(bf16)
    b1 = params["b1"].reshape(1, nef).astype(jnp.float32)
    x1 = conv_bias_relu(p1, w1, b1).reshape(N, H1, W1, nef)

    # Layer 2: Conv(nef -> 2nef, k3 s2 p1) + InstanceNorm + ReLU.
    p2, H2, W2 = im2col(x1, 3, 3, 2, 1)
    w2 = params["w2"].reshape(-1, 2 * nef).astype(bf16)
    x2 = conv_instnorm_relu(p2, w2).reshape(N, H2, W2, 2 * nef)

    # Layer 3: Conv(2nef -> 4nef, k3 s2 p1) + InstanceNorm + ReLU.
    p3, H3, W3 = im2col(x2, 3, 3, 2, 1)
    w3 = params["w3"].reshape(-1, 4 * nef).astype(bf16)
    x3 = conv_instnorm_relu(p3, w3).reshape(N, H3, W3, 4 * nef)

    # Fused, batched tail: layer 4 + layer 5 + merged mu/logvar heads.
    p4, H4, W4 = im2col(x3, 3, 3, 2, 1)                    # (N, 16, 9*4nef) bf16
    if (H4, W4) != (4, 4):
        raise NotImplementedError(
            "fused tail assumes the 4x4 valid conv collapses spatial to 1x1 "
            "(i.e. 64x64 inputs, the reference edges2shoes configuration)")
    P = H4 * W4
    K4 = p4.shape[-1]
    C5 = 8 * nef
    p4_2d = p4.reshape(N * P, K4)                          # wrapper-side flatten
    w4 = params["w4"].reshape(-1, C5).astype(bf16)
    w5 = params["w5"].reshape(P * C5, C5).astype(bf16)     # (tap, cin) flattened

    head_pad = max(128, ((2 * nlatent + 127) // 128) * 128)  # lane-dense store
    wh = jnp.concatenate([params["w_mu"].reshape(C5, nlatent),
                          params["w_lv"].reshape(C5, nlatent)], axis=1)
    wh = jnp.pad(wh, ((0, 0), (0, head_pad - 2 * nlatent))).astype(bf16)
    bh = jnp.concatenate([params["b_mu"], params["b_lv"]])
    bh = jnp.pad(bh, (0, head_pad - 2 * nlatent)).reshape(1, head_pad)
    bh = bh.astype(jnp.float32)

    heads = tail_fused(p4_2d, w4, w5, wh, bh, batch=N, taps=P)   # (N, head_pad) f32
    heads = heads[:, :2 * nlatent]
    return heads[:, :nlatent], heads[:, nlatent:]                 # mu, logvar


if __name__ == "__main__":
    key = jax.random.PRNGKey(0)
    k_param, k_x = jax.random.split(key)

    # 4 stride-2 convs then a valid 4x4 conv require 64x64 spatial input
    # (64 -> 32 -> 16 -> 8 -> 4 -> 1).
    batch, input_nc, H, W = 2, 3, 64, 64
    nef, nlatent = 8, 4

    params = init_params(k_param, nlatent, input_nc, nef)
    x = jax.random.normal(k_x, (batch, input_nc, H, W), jnp.float32)

    fwd = jax.jit(functools.partial(latent_encoder_forward, nef=nef, nlatent=nlatent))
    mu, logvar = fwd(params, x)
    jax.block_until_ready((mu, logvar))

    assert mu.shape == (batch, nlatent) and logvar.shape == (batch, nlatent)
    assert bool(jnp.all(jnp.isfinite(mu))) and bool(jnp.all(jnp.isfinite(logvar)))
    print("KERNEL_OK")
</pallas_src>

<mosaic_0001>
module attributes {stable_mosaic.version = 11 : i64} {
  func.func @_bias_relu_kernel(%arg0: i32, %arg1: i32, %arg2: memref<1x1024x27xbf16, #tpu.memory_space<vmem>>, %arg3: memref<27x8xbf16, #tpu.memory_space<vmem>>, %arg4: memref<1x8xf32, #tpu.memory_space<vmem>>, %arg5: memref<1x1024x8xbf16, #tpu.memory_space<vmem>>) attributes {dimension_semantics = [#tpu.dimension_semantics<parallel>, #tpu.dimension_semantics<parallel>], iteration_bounds = array<i64: 2, 1>, scalar_prefetch = 0 : i64, scratch_operands = 0 : i64, tpu.core_type = #tpu.core_type<tc>, window_params = [{transform_indices = @transform_0, window_bounds = array<i64: 1, 1024, 27>}, {pipeline_mode = #tpu.pipeline_mode<synchronous>, transform_indices = @transform_1, window_bounds = array<i64: 27, 8>}, {pipeline_mode = #tpu.pipeline_mode<synchronous>, transform_indices = @transform_2, window_bounds = array<i64: 1, 8>}, {transform_indices = @transform_3, window_bounds = array<i64: 1, 1024, 8>}]} {
    %c0 = arith.constant 0 : index
    %c0_0 = arith.constant 0 : index
    %c0_1 = arith.constant 0 : index
    %0 = vector.load %arg2[%c0, %c0_0, %c0_1] : memref<1x1024x27xbf16, #tpu.memory_space<vmem>>, vector<1x1024x27xbf16>
    %1 = vector.shape_cast %0 : vector<1x1024x27xbf16> to vector<1024x27xbf16>
    %c0_2 = arith.constant 0 : index
    %c0_3 = arith.constant 0 : index
    %2 = vector.load %arg3[%c0_2, %c0_3] : memref<27x8xbf16, #tpu.memory_space<vmem>>, vector<27x8xbf16>
    %cst = arith.constant dense<0.000000e+00> : vector<1024x8xf32>
    %3 = tpu.matmul %1, %2, %cst {dimension_numbers = #tpu.dot_dimension_numbers<[1], [0], [0], [1], [0, 0, 1, 1], [], []>} : vector<1024x27xbf16>, vector<27x8xbf16>, vector<1024x8xf32> -> vector<1024x8xf32>
    %c0_4 = arith.constant 0 : index
    %c0_5 = arith.constant 0 : index
    %4 = vector.load %arg4[%c0_4, %c0_5] : memref<1x8xf32, #tpu.memory_space<vmem>>, vector<1x8xf32>
    %5 = vector.broadcast %4 : vector<1x8xf32> to vector<1024x8xf32>
    %6 = arith.addf %3, %5 : vector<1024x8xf32>
    %cst_6 = arith.constant 0.000000e+00 : f32
    %7 = vector.broadcast %cst_6 : f32 to vector<1024x8xf32>
    %8 = arith.maximumf %6, %7 : vector<1024x8xf32>
    %9 = arith.truncf %8 : vector<1024x8xf32> to vector<1024x8xbf16>
    %c0_7 = arith.constant 0 : index
    %c0_8 = arith.constant 0 : index
    %c0_9 = arith.constant 0 : index
    %10 = vector.load %arg5[%c0_7, %c0_8, %c0_9] : memref<1x1024x8xbf16, #tpu.memory_space<vmem>>, vector<1x1024x8xbf16>
    %11 = vector.shape_cast %10 : vector<1x1024x8xbf16> to vector<1024x8xbf16>
    %12 = vector.shape_cast %9 : vector<1024x8xbf16> to vector<1x1024x8xbf16>
    tpu.vector_store %arg5[%c0_7, %c0_8, %c0_9], %12 {strides = array<i32>} : memref<1x1024x8xbf16, #tpu.memory_space<vmem>>, vector<1x1024x8xbf16>,
    return
  }
  func.func @transform_0(%arg0: i32, %arg1: i32) -> (i32, i32, i32) {
    %c0_i32 = arith.constant 0 : i32
    %c0_i32_0 = arith.constant 0 : i32
    return %arg0, %arg1, %c0_i32 : i32, i32, i32
  }
  func.func @transform_1(%arg0: i32, %arg1: i32) -> (i32, i32) {
    %c0_i32 = arith.constant 0 : i32
    %c0_i32_0 = arith.constant 0 : i32
    %c0_i32_1 = arith.constant 0 : i32
    return %c0_i32, %c0_i32_0 : i32, i32
  }
  func.func @transform_2(%arg0: i32, %arg1: i32) -> (i32, i32) {
    %c0_i32 = arith.constant 0 : i32
    %c0_i32_0 = arith.constant 0 : i32
    %c0_i32_1 = arith.constant 0 : i32
    return %c0_i32, %c0_i32_0 : i32, i32
  }
  func.func @transform_3(%arg0: i32, %arg1: i32) -> (i32, i32, i32) {
    %c0_i32 = arith.constant 0 : i32
    %c0_i32_0 = arith.constant 0 : i32
    return %arg0, %arg1, %c0_i32 : i32, i32, i32
  }
}

module attributes {stable_mosaic.version = 11 : i64} {
  func.func @kernel(%arg0: i32, %arg1: i32, %arg2: i32, %arg3: memref<1x256x72xbf16, #tpu.memory_space<vmem>>, %arg4: memref<72x16xbf16, #tpu.memory_space<vmem>>, %arg5: memref<1x256x16xbf16, #tpu.memory_space<vmem>>, %arg6: memref<256x16xf32, #tpu.memory_space<vmem>>, %arg7: memref<1x16xf32, #tpu.memory_space<vmem>>, %arg8: memref<1x16xf32, #tpu.memory_space<vmem>>) attributes {dimension_semantics = [#tpu.dimension_semantics<parallel>, #tpu.dimension_semantics<arbitrary>, #tpu.dimension_semantics<arbitrary>], iteration_bounds = array<i64: 2, 2, 1>, scalar_prefetch = 0 : i64, scratch_operands = 3 : i64, tpu.core_type = #tpu.core_type<tc>, window_params = [{transform_indices = @transform_0, window_bounds = array<i64: 1, 256, 72>}, {pipeline_mode = #tpu.pipeline_mode<synchronous>, transform_indices = @transform_1, window_bounds = array<i64: 72, 16>}, {transform_indices = @transform_2, window_bounds = array<i64: 1, 256, 16>}]} {
    %c0_i32 = arith.constant 0 : i32
    %0 = arith.cmpi eq, %arg1, %c0_i32 : i32
    %c0_i32_0 = arith.constant 0 : i32
    %1 = arith.cmpi eq, %arg2, %c0_i32_0 : i32
    %2 = arith.andi %0, %1 : i1
    %3 = arith.extui %2 : i1 to i32
    %c0_i32_1 = arith.constant 0 : i32
    %4 = arith.cmpi ne, %3, %c0_i32_1 : i32
    scf.if %4 {
      %cst = arith.constant 0.000000e+00 : f32
      %11 = vector.broadcast %cst : f32 to vector<1x16xf32>
      %c0 = arith.constant 0 : index
      %c0_5 = arith.constant 0 : index
      %12 = vector.load %arg7[%c0, %c0_5] : memref<1x16xf32, #tpu.memory_space<vmem>>, vector<1x16xf32>
      tpu.vector_store %arg7[%c0, %c0_5], %11 {strides = array<i32>} : memref<1x16xf32, #tpu.memory_space<vmem>>, vector<1x16xf32>,
      %cst_6 = arith.constant 0.000000e+00 : f32
      %13 = vector.broadcast %cst_6 : f32 to vector<1x16xf32>
      %c0_7 = arith.constant 0 : index
      %c0_8 = arith.constant 0 : index
      %14 = vector.load %arg8[%c0_7, %c0_8] : memref<1x16xf32, #tpu.memory_space<vmem>>, vector<1x16xf32>
      tpu.vector_store %arg8[%c0_7, %c0_8], %13 {strides = array<i32>} : memref<1x16xf32, #tpu.memory_space<vmem>>, vector<1x16xf32>,
    } else {
    }
    %c0_i32_2 = arith.constant 0 : i32
    %5 = arith.cmpi eq, %arg1, %c0_i32_2 : i32
    %6 = arith.extui %5 : i1 to i32
    %c0_i32_3 = arith.constant 0 : i32
    %7 = arith.cmpi ne, %6, %c0_i32_3 : i32
    scf.if %7 {
      %c0 = arith.constant 0 : index
      %c0_5 = arith.constant 0 : index
      %c0_6 = arith.constant 0 : index
      %11 = vector.load %arg3[%c0, %c0_5, %c0_6] : memref<1x256x72xbf16, #tpu.memory_space<vmem>>, vector<1x256x72xbf16>
      %12 = vector.shape_cast %11 : vector<1x256x72xbf16> to vector<256x72xbf16>
      %c0_7 = arith.constant 0 : index
      %c0_8 = arith.constant 0 : index
      %13 = vector.load %arg4[%c0_7, %c0_8] : memref<72x16xbf16, #tpu.memory_space<vmem>>, vector<72x16xbf16>
      %cst = arith.constant dense<0.000000e+00> : vector<256x16xf32>
      %14 = tpu.matmul %12, %13, %cst {dimension_numbers = #tpu.dot_dimension_numbers<[1], [0], [0], [1], [0, 0, 1, 1], [], []>} : vector<256x72xbf16>, vector<72x16xbf16>, vector<256x16xf32> -> vector<256x16xf32>
      %c256_i32 = arith.constant 256 : i32
      %15 = arith.muli %arg2, %c256_i32 : i32
      %16 = tpu.assume_multiple %15, 256 : i32
      %17 = arith.index_cast %16 : i32 to index
      %c0_9 = arith.constant 0 : index
      %18 = vector.load %arg6[%17, %c0_9] : memref<256x16xf32, #tpu.memory_space<vmem>>, vector<256x16xf32>
      tpu.vector_store %arg6[%17, %c0_9], %14 {strides = array<i32>} : memref<256x16xf32, #tpu.memory_space<vmem>>, vector<256x16xf32>,
      %c0_10 = arith.constant 0 : index
      %c0_11 = arith.constant 0 : index
      %19 = vector.load %arg7[%c0_10, %c0_11] : memref<1x16xf32, #tpu.memory_space<vmem>>, vector<1x16xf32>
      %cst_12 = arith.constant dense<0.000000e+00> : vector<16xf32>
      %20 = vector.multi_reduction <add>, %14, %cst_12 [0] : vector<256x16xf32> to vector<16xf32>
      %21 = vector.shape_cast %20 : vector<16xf32> to vector<1x16xf32>
      %22 = arith.addf %19, %21 : vector<1x16xf32>
      %c0_13 = arith.constant 0 : index
      %c0_14 = arith.constant 0 : index
      %23 = vector.load %arg7[%c0_13, %c0_14] : memref<1x16xf32, #tpu.memory_space<vmem>>, vector<1x16xf32>
      tpu.vector_store %arg7[%c0_13, %c0_14], %22 {strides = array<i32>} : memref<1x16xf32, #tpu.memory_space<vmem>>, vector<1x16xf32>,
      %c0_15 = arith.constant 0 : index
      %c0_16 = arith.constant 0 : index
      %24 = vector.load %arg8[%c0_15, %c0_16] : memref<1x16xf32, #tpu.memory_space<vmem>>, vector<1x16xf32>
      %25 = arith.mulf %14, %14 : vector<256x16xf32>
      %cst_17 = arith.constant dense<0.000000e+00> : vector<16xf32>
      %26 = vector.multi_reduction <add>, %25, %cst_17 [0] : vector<256x16xf32> to vector<16xf32>
      %27 = vector.shape_cast %26 : vector<16xf32> to vector<1x16xf32>
      %28 = arith.addf %24, %27 : vector<1x16xf32>
      %c0_18 = arith.constant 0 : index
      %c0_19 = arith.constant 0 : index
      %29 = vector.load %arg8[%c0_18, %c0_19] : memref<1x16xf32, #tpu.memory_space<vmem>>, vector<1x16xf32>
      tpu.vector_store %arg8[%c0_18, %c0_19], %28 {strides = array<i32>} : memref<1x16xf32, #tpu.memory_space<vmem>>, vector<1x16xf32>,
    } else {
    }
    %c1_i32 = arith.constant 1 : i32
    %8 = arith.cmpi eq, %arg1, %c1_i32 : i32
    %9 = arith.extui %8 : i1 to i32
    %c0_i32_4 = arith.constant 0 : i32
    %10 = arith.cmpi ne, %9, %c0_i32_4 : i32
    scf.if %10 {
      %c256_i32 = arith.constant 256 : i32
      %11 = arith.muli %arg2, %c256_i32 : i32
      %12 = tpu.assume_multiple %11, 256 : i32
      %13 = arith.index_cast %12 : i32 to index
      %c0 = arith.constant 0 : index
      %14 = vector.load %arg6[%13, %c0] : memref<256x16xf32, #tpu.memory_space<vmem>>, vector<256x16xf32>
      %c0_5 = arith.constant 0 : index
      %c0_6 = arith.constant 0 : index
      %15 = vector.load %arg7[%c0_5, %c0_6] : memref<1x16xf32, #tpu.memory_space<vmem>>, vector<1x16xf32>
      %cst = arith.constant 3.906250e-03 : f32
      %16 = vector.broadcast %cst : f32 to vector<1x16xf32>
      %17 = arith.mulf %15, %16 : vector<1x16xf32>
      %c0_7 = arith.constant 0 : index
      %c0_8 = arith.constant 0 : index
      %18 = vector.load %arg8[%c0_7, %c0_8] : memref<1x16xf32, #tpu.memory_space<vmem>>, vector<1x16xf32>
      %cst_9 = arith.constant 3.906250e-03 : f32
      %19 = vector.broadcast %cst_9 : f32 to vector<1x16xf32>
      %20 = arith.mulf %18, %19 : vector<1x16xf32>
      %21 = arith.mulf %17, %17 : vector<1x16xf32>
      %22 = arith.subf %20, %21 : vector<1x16xf32>
      %cst_10 = arith.constant 9.99999974E-6 : f32
      %23 = vector.broadcast %cst_10 : f32 to vector<1x16xf32>
      %24 = arith.addf %22, %23 : vector<1x16xf32>
      %25 = math.rsqrt %24 : vector<1x16xf32>
      %26 = vector.broadcast %17 : vector<1x16xf32> to vector<256x16xf32>
      %27 = arith.subf %14, %26 : vector<256x16xf32>
      %28 = vector.broadcast %25 : vector<1x16xf32> to vector<256x16xf32>
      %29 = arith.mulf %27, %28 : vector<256x16xf32>
      %cst_11 = arith.constant 0.000000e+00 : f32
      %30 = vector.broadcast %cst_11 : f32 to vector<256x16xf32>
      %31 = arith.maximumf %29, %30 : vector<256x16xf32>
      %32 = arith.truncf %31 : vector<256x16xf32> to vector<256x16xbf16>
      %c0_12 = arith.constant 0 : index
      %c0_13 = arith.constant 0 : index
      %c0_14 = arith.constant 0 : index
      %33 = vector.load %arg5[%c0_12, %c0_13, %c0_14] : memref<1x256x16xbf16, #tpu.memory_space<vmem>>, vector<1x256x16xbf16>
      %34 = vector.shape_cast %33 : vector<1x256x16xbf16> to vector<256x16xbf16>
      %35 = vector.shape_cast %32 : vector<256x16xbf16> to vector<1x256x16xbf16>
      tpu.vector_store %arg5[%c0_12, %c0_13, %c0_14], %35 {strides = array<i32>} : memref<1x256x16xbf16, #tpu.memory_space<vmem>>, vector<1x256x16xbf16>,
    } else {
    }
    return
  }
  func.func @transform_0(%arg0: i32, %arg1: i32, %arg2: i32) -> (i32, i32, i32) {
    %c1_i32 = arith.constant 1 : i32
    %0 = arith.subi %c1_i32, %arg1 : i32
    %1 = arith.muli %arg2, %0 : i32
    %c0_i32 = arith.constant 0 : i32
    %c0_i32_0 = arith.constant 0 : i32
    return %arg0, %1, %c0_i32 : i32, i32, i32
  }
  func.func @transform_1(%arg0: i32, %arg1: i32, %arg2: i32) -> (i32, i32) {
    %c0_i32 = arith.constant 0 : i32
    %c0_i32_0 = arith.constant 0 : i32
    %c0_i32_1 = arith.constant 0 : i32
    return %c0_i32, %c0_i32_0 : i32, i32
  }
  func.func @transform_2(%arg0: i32, %arg1: i32, %arg2: i32) -> (i32, i32, i32) {
    %0 = arith.muli %arg2, %arg1 : i32
    %c0_i32 = arith.constant 0 : i32
    %c0_i32_0 = arith.constant 0 : i32
    return %arg0, %0, %c0_i32 : i32, i32, i32
  }
}

module attributes {stable_mosaic.version = 11 : i64} {
  func.func @kernel(%arg0: i32, %arg1: i32, %arg2: i32, %arg3: memref<1x64x144xbf16, #tpu.memory_space<vmem>>, %arg4: memref<144x32xbf16, #tpu.memory_space<vmem>>, %arg5: memref<1x64x32xbf16, #tpu.memory_space<vmem>>, %arg6: memref<64x32xf32, #tpu.memory_space<vmem>>, %arg7: memref<1x32xf32, #tpu.memory_space<vmem>>, %arg8: memref<1x32xf32, #tpu.memory_space<vmem>>) attributes {dimension_semantics = [#tpu.dimension_semantics<parallel>, #tpu.dimension_semantics<arbitrary>, #tpu.dimension_semantics<arbitrary>], iteration_bounds = array<i64: 2, 2, 1>, scalar_prefetch = 0 : i64, scratch_operands = 3 : i64, tpu.core_type = #tpu.core_type<tc>, window_params = [{transform_indices = @transform_0, window_bounds = array<i64: 1, 64, 144>}, {pipeline_mode = #tpu.pipeline_mode<synchronous>, transform_indices = @transform_1, window_bounds = array<i64: 144, 32>}, {transform_indices = @transform_2, window_bounds = array<i64: 1, 64, 32>}]} {
    %c0_i32 = arith.constant 0 : i32
    %0 = arith.cmpi eq, %arg1, %c0_i32 : i32
    %c0_i32_0 = arith.constant 0 : i32
    %1 = arith.cmpi eq, %arg2, %c0_i32_0 : i32
    %2 = arith.andi %0, %1 : i1
    %3 = arith.extui %2 : i1 to i32
    %c0_i32_1 = arith.constant 0 : i32
    %4 = arith.cmpi ne, %3, %c0_i32_1 : i32
    scf.if %4 {
      %cst = arith.constant 0.000000e+00 : f32
      %11 = vector.broadcast %cst : f32 to vector<1x32xf32>
      %c0 = arith.constant 0 : index
      %c0_5 = arith.constant 0 : index
      %12 = vector.load %arg7[%c0, %c0_5] : memref<1x32xf32, #tpu.memory_space<vmem>>, vector<1x32xf32>
      tpu.vector_store %arg7[%c0, %c0_5], %11 {strides = array<i32>} : memref<1x32xf32, #tpu.memory_space<vmem>>, vector<1x32xf32>,
      %cst_6 = arith.constant 0.000000e+00 : f32
      %13 = vector.broadcast %cst_6 : f32 to vector<1x32xf32>
      %c0_7 = arith.constant 0 : index
      %c0_8 = arith.constant 0 : index
      %14 = vector.load %arg8[%c0_7, %c0_8] : memref<1x32xf32, #tpu.memory_space<vmem>>, vector<1x32xf32>
      tpu.vector_store %arg8[%c0_7, %c0_8], %13 {strides = array<i32>} : memref<1x32xf32, #tpu.memory_space<vmem>>, vector<1x32xf32>,
    } else {
    }
    %c0_i32_2 = arith.constant 0 : i32
    %5 = arith.cmpi eq, %arg1, %c0_i32_2 : i32
    %6 = arith.extui %5 : i1 to i32
    %c0_i32_3 = arith.constant 0 : i32
    %7 = arith.cmpi ne, %6, %c0_i32_3 : i32
    scf.if %7 {
      %c0 = arith.constant 0 : index
      %c0_5 = arith.constant 0 : index
      %c0_6 = arith.constant 0 : index
      %11 = vector.load %arg3[%c0, %c0_5, %c0_6] : memref<1x64x144xbf16, #tpu.memory_space<vmem>>, vector<1x64x144xbf16>
      %12 = vector.shape_cast %11 : vector<1x64x144xbf16> to vector<64x144xbf16>
      %c0_7 = arith.constant 0 : index
      %c0_8 = arith.constant 0 : index
      %13 = vector.load %arg4[%c0_7, %c0_8] : memref<144x32xbf16, #tpu.memory_space<vmem>>, vector<144x32xbf16>
      %cst = arith.constant dense<0.000000e+00> : vector<64x32xf32>
      %14 = tpu.matmul %12, %13, %cst {dimension_numbers = #tpu.dot_dimension_numbers<[1], [0], [0], [1], [0, 0, 1, 1], [], []>} : vector<64x144xbf16>, vector<144x32xbf16>, vector<64x32xf32> -> vector<64x32xf32>
      %c64_i32 = arith.constant 64 : i32
      %15 = arith.muli %arg2, %c64_i32 : i32
      %16 = tpu.assume_multiple %15, 64 : i32
      %17 = arith.index_cast %16 : i32 to index
      %c0_9 = arith.constant 0 : index
      %18 = vector.load %arg6[%17, %c0_9] : memref<64x32xf32, #tpu.memory_space<vmem>>, vector<64x32xf32>
      tpu.vector_store %arg6[%17, %c0_9], %14 {strides = array<i32>} : memref<64x32xf32, #tpu.memory_space<vmem>>, vector<64x32xf32>,
      %c0_10 = arith.constant 0 : index
      %c0_11 = arith.constant 0 : index
      %19 = vector.load %arg7[%c0_10, %c0_11] : memref<1x32xf32, #tpu.memory_space<vmem>>, vector<1x32xf32>
      %cst_12 = arith.constant dense<0.000000e+00> : vector<32xf32>
      %20 = vector.multi_reduction <add>, %14, %cst_12 [0] : vector<64x32xf32> to vector<32xf32>
      %21 = vector.shape_cast %20 : vector<32xf32> to vector<1x32xf32>
      %22 = arith.addf %19, %21 : vector<1x32xf32>
      %c0_13 = arith.constant 0 : index
      %c0_14 = arith.constant 0 : index
      %23 = vector.load %arg7[%c0_13, %c0_14] : memref<1x32xf32, #tpu.memory_space<vmem>>, vector<1x32xf32>
      tpu.vector_store %arg7[%c0_13, %c0_14], %22 {strides = array<i32>} : memref<1x32xf32, #tpu.memory_space<vmem>>, vector<1x32xf32>,
      %c0_15 = arith.constant 0 : index
      %c0_16 = arith.constant 0 : index
      %24 = vector.load %arg8[%c0_15, %c0_16] : memref<1x32xf32, #tpu.memory_space<vmem>>, vector<1x32xf32>
      %25 = arith.mulf %14, %14 : vector<64x32xf32>
      %cst_17 = arith.constant dense<0.000000e+00> : vector<32xf32>
      %26 = vector.multi_reduction <add>, %25, %cst_17 [0] : vector<64x32xf32> to vector<32xf32>
      %27 = vector.shape_cast %26 : vector<32xf32> to vector<1x32xf32>
      %28 = arith.addf %24, %27 : vector<1x32xf32>
      %c0_18 = arith.constant 0 : index
      %c0_19 = arith.constant 0 : index
      %29 = vector.load %arg8[%c0_18, %c0_19] : memref<1x32xf32, #tpu.memory_space<vmem>>, vector<1x32xf32>
      tpu.vector_store %arg8[%c0_18, %c0_19], %28 {strides = array<i32>} : memref<1x32xf32, #tpu.memory_space<vmem>>, vector<1x32xf32>,
    } else {
    }
    %c1_i32 = arith.constant 1 : i32
    %8 = arith.cmpi eq, %arg1, %c1_i32 : i32
    %9 = arith.extui %8 : i1 to i32
    %c0_i32_4 = arith.constant 0 : i32
    %10 = arith.cmpi ne, %9, %c0_i32_4 : i32
    scf.if %10 {
      %c64_i32 = arith.constant 64 : i32
      %11 = arith.muli %arg2, %c64_i32 : i32
      %12 = tpu.assume_multiple %11, 64 : i32
      %13 = arith.index_cast %12 : i32 to index
      %c0 = arith.constant 0 : index
      %14 = vector.load %arg6[%13, %c0] : memref<64x32xf32, #tpu.memory_space<vmem>>, vector<64x32xf32>
      %c0_5 = arith.constant 0 : index
      %c0_6 = arith.constant 0 : index
      %15 = vector.load %arg7[%c0_5, %c0_6] : memref<1x32xf32, #tpu.memory_space<vmem>>, vector<1x32xf32>
      %cst = arith.constant 1.562500e-02 : f32
      %16 = vector.broadcast %cst : f32 to vector<1x32xf32>
      %17 = arith.mulf %15, %16 : vector<1x32xf32>
      %c0_7 = arith.constant 0 : index
      %c0_8 = arith.constant 0 : index
      %18 = vector.load %arg8[%c0_7, %c0_8] : memref<1x32xf32, #tpu.memory_space<vmem>>, vector<1x32xf32>
      %cst_9 = arith.constant 1.562500e-02 : f32
      %19 = vector.broadcast %cst_9 : f32 to vector<1x32xf32>
      %20 = arith.mulf %18, %19 : vector<1x32xf32>
      %21 = arith.mulf %17, %17 : vector<1x32xf32>
      %22 = arith.subf %20, %21 : vector<1x32xf32>
      %cst_10 = arith.constant 9.99999974E-6 : f32
      %23 = vector.broadcast %cst_10 : f32 to vector<1x32xf32>
      %24 = arith.addf %22, %23 : vector<1x32xf32>
      %25 = math.rsqrt %24 : vector<1x32xf32>
      %26 = vector.broadcast %17 : vector<1x32xf32> to vector<64x32xf32>
      %27 = arith.subf %14, %26 : vector<64x32xf32>
      %28 = vector.broadcast %25 : vector<1x32xf32> to vector<64x32xf32>
      %29 = arith.mulf %27, %28 : vector<64x32xf32>
      %cst_11 = arith.constant 0.000000e+00 : f32
      %30 = vector.broadcast %cst_11 : f32 to vector<64x32xf32>
      %31 = arith.maximumf %29, %30 : vector<64x32xf32>
      %32 = arith.truncf %31 : vector<64x32xf32> to vector<64x32xbf16>
      %c0_12 = arith.constant 0 : index
      %c0_13 = arith.constant 0 : index
      %c0_14 = arith.constant 0 : index
      %33 = vector.load %arg5[%c0_12, %c0_13, %c0_14] : memref<1x64x32xbf16, #tpu.memory_space<vmem>>, vector<1x64x32xbf16>
      %34 = vector.shape_cast %33 : vector<1x64x32xbf16> to vector<64x32xbf16>
      %35 = vector.shape_cast %32 : vector<64x32xbf16> to vector<1x64x32xbf16>
      tpu.vector_store %arg5[%c0_12, %c0_13, %c0_14], %35 {strides = array<i32>} : memref<1x64x32xbf16, #tpu.memory_space<vmem>>, vector<1x64x32xbf16>,
    } else {
    }
    return
  }
  func.func @transform_0(%arg0: i32, %arg1: i32, %arg2: i32) -> (i32, i32, i32) {
    %c1_i32 = arith.constant 1 : i32
    %0 = arith.subi %c1_i32, %arg1 : i32
    %1 = arith.muli %arg2, %0 : i32
    %c0_i32 = arith.constant 0 : i32
    %c0_i32_0 = arith.constant 0 : i32
    return %arg0, %1, %c0_i32 : i32, i32, i32
  }
  func.func @transform_1(%arg0: i32, %arg1: i32, %arg2: i32) -> (i32, i32) {
    %c0_i32 = arith.constant 0 : i32
    %c0_i32_0 = arith.constant 0 : i32
    %c0_i32_1 = arith.constant 0 : i32
    return %c0_i32, %c0_i32_0 : i32, i32
  }
  func.func @transform_2(%arg0: i32, %arg1: i32, %arg2: i32) -> (i32, i32, i32) {
    %0 = arith.muli %arg2, %arg1 : i32
    %c0_i32 = arith.constant 0 : i32
    %c0_i32_0 = arith.constant 0 : i32
    return %arg0, %0, %c0_i32 : i32, i32, i32
  }
}

module attributes {stable_mosaic.version = 11 : i64} {
  func.func @kernel(%arg0: i32, %arg1: memref<32x288xbf16, #tpu.memory_space<vmem>>, %arg2: memref<288x64xbf16, #tpu.memory_space<vmem>>, %arg3: memref<1024x64xbf16, #tpu.memory_space<vmem>>, %arg4: memref<64x128xbf16, #tpu.memory_space<vmem>>, %arg5: memref<1x128xf32, #tpu.memory_space<vmem>>, %arg6: memref<2x128xf32, #tpu.memory_space<vmem>>, %arg7: memref<2x1024xf32, #tpu.memory_space<vmem>>) attributes {dimension_semantics = [#tpu.dimension_semantics<arbitrary>], iteration_bounds = array<i64: 1>, scalar_prefetch = 0 : i64, scratch_operands = 1 : i64, tpu.core_type = #tpu.core_type<tc>, window_params = [{pipeline_mode = #tpu.pipeline_mode<synchronous>, transform_indices = @transform_0, window_bounds = array<i64: 32, 288>}, {pipeline_mode = #tpu.pipeline_mode<synchronous>, transform_indices = @transform_1, window_bounds = array<i64: 288, 64>}, {pipeline_mode = #tpu.pipeline_mode<synchronous>, transform_indices = @transform_2, window_bounds = array<i64: 1024, 64>}, {pipeline_mode = #tpu.pipeline_mode<synchronous>, transform_indices = @transform_3, window_bounds = array<i64: 64, 128>}, {pipeline_mode = #tpu.pipeline_mode<synchronous>, transform_indices = @transform_4, window_bounds = array<i64: 1, 128>}, {pipeline_mode = #tpu.pipeline_mode<synchronous>, transform_indices = @transform_5, window_bounds = array<i64: 2, 128>}]} {
    %c0 = arith.constant 0 : index
    %c0_0 = arith.constant 0 : index
    %0 = vector.load %arg1[%c0, %c0_0] : memref<32x288xbf16, #tpu.memory_space<vmem>>, vector<32x288xbf16>
    %c0_1 = arith.constant 0 : index
    %c0_2 = arith.constant 0 : index
    %1 = vector.load %arg2[%c0_1, %c0_2] : memref<288x64xbf16, #tpu.memory_space<vmem>>, vector<288x64xbf16>
    %cst = arith.constant dense<0.000000e+00> : vector<32x64xf32>
    %2 = tpu.matmul %0, %1, %cst {dimension_numbers = #tpu.dot_dimension_numbers<[1], [0], [0], [1], [0, 0, 1, 1], [], []>} : vector<32x288xbf16>, vector<288x64xbf16>, vector<32x64xf32> -> vector<32x64xf32>
    %3 = vector.extract_strided_slice %2 {offsets = [0, 0], sizes = [16, 64], strides = [1, 1]} : vector<32x64xf32> to vector<16x64xf32>
    %cst_3 = arith.constant dense<0.000000e+00> : vector<64xf32>
    %4 = vector.multi_reduction <add>, %3, %cst_3 [0] : vector<16x64xf32> to vector<64xf32>
    %5 = vector.shape_cast %4 : vector<64xf32> to vector<1x64xf32>
    %cst_4 = arith.constant 1.600000e+01 : f32
    %6 = vector.broadcast %cst_4 : f32 to vector<1x64xf32>
    %7 = arith.divf %5, %6 : vector<1x64xf32>
    %8 = arith.mulf %3, %3 : vector<16x64xf32>
    %cst_5 = arith.constant dense<0.000000e+00> : vector<64xf32>
    %9 = vector.multi_reduction <add>, %8, %cst_5 [0] : vector<16x64xf32> to vector<64xf32>
    %10 = vector.shape_cast %9 : vector<64xf32> to vector<1x64xf32>
    %cst_6 = arith.constant 1.600000e+01 : f32
    %11 = vector.broadcast %cst_6 : f32 to vector<1x64xf32>
    %12 = arith.divf %10, %11 : vector<1x64xf32>
    %13 = arith.mulf %7, %7 : vector<1x64xf32>
    %14 = arith.subf %12, %13 : vector<1x64xf32>
    %15 = vector.broadcast %7 : vector<1x64xf32> to vector<16x64xf32>
    %16 = arith.subf %3, %15 : vector<16x64xf32>
    %cst_7 = arith.constant 9.99999974E-6 : f32
    %17 = vector.broadcast %cst_7 : f32 to vector<1x64xf32>
    %18 = arith.addf %14, %17 : vector<1x64xf32>
    %19 = math.rsqrt %18 : vector<1x64xf32>
    %20 = vector.broadcast %19 : vector<1x64xf32> to vector<16x64xf32>
    %21 = arith.mulf %16, %20 : vector<16x64xf32>
    %cst_8 = arith.constant 0.000000e+00 : f32
    %22 = vector.broadcast %cst_8 : f32 to vector<16x64xf32>
    %23 = arith.maximumf %21, %22 : vector<16x64xf32>
    %24 = vector.extract_strided_slice %23 {offsets = [0, 0], sizes = [1, 64], strides = [1, 1]} : vector<16x64xf32> to vector<1x64xf32>
    %c0_9 = arith.constant 0 : index
    %c0_10 = arith.constant 0 : index
    %25 = vector.load %arg7[%c0_9, %c0_10] : memref<2x1024xf32, #tpu.memory_space<vmem>>, vector<1x64xf32>
    tpu.vector_store %arg7[%c0_9, %c0_10], %24 {strides = array<i32>} : memref<2x1024xf32, #tpu.memory_space<vmem>>, vector<1x64xf32>,
    %26 = vector.extract_strided_slice %23 {offsets = [1, 0], sizes = [1, 64], strides = [1, 1]} : vector<16x64xf32> to vector<1x64xf32>
    %c0_11 = arith.constant 0 : index
    %c64 = arith.constant 64 : index
    %27 = vector.load %arg7[%c0_11, %c64] : memref<2x1024xf32, #tpu.memory_space<vmem>>, vector<1x64xf32>
    tpu.vector_store %arg7[%c0_11, %c64], %26 {strides = array<i32>} : memref<2x1024xf32, #tpu.memory_space<vmem>>, vector<1x64xf32>,
    %28 = vector.extract_strided_slice %23 {offsets = [2, 0], sizes = [1, 64], strides = [1, 1]} : vector<16x64xf32> to vector<1x64xf32>
    %c0_12 = arith.constant 0 : index
    %c128 = arith.constant 128 : index
    %29 = vector.load %arg7[%c0_12, %c128] : memref<2x1024xf32, #tpu.memory_space<vmem>>, vector<1x64xf32>
    tpu.vector_store %arg7[%c0_12, %c128], %28 {strides = array<i32>} : memref<2x1024xf32, #tpu.memory_space<vmem>>, vector<1x64xf32>,
    %30 = vector.extract_strided_slice %23 {offsets = [3, 0], sizes = [1, 64], strides = [1, 1]} : vector<16x64xf32> to vector<1x64xf32>
    %c0_13 = arith.constant 0 : index
    %c192 = arith.constant 192 : index
    %31 = vector.load %arg7[%c0_13, %c192] : memref<2x1024xf32, #tpu.memory_space<vmem>>, vector<1x64xf32>
    tpu.vector_store %arg7[%c0_13, %c192], %30 {strides = array<i32>} : memref<2x1024xf32, #tpu.memory_space<vmem>>, vector<1x64xf32>,
    %32 = vector.extract_strided_slice %23 {offsets = [4, 0], sizes = [1, 64], strides = [1, 1]} : vector<16x64xf32> to vector<1x64xf32>
    %c0_14 = arith.constant 0 : index
    %c256 = arith.constant 256 : index
    %33 = vector.load %arg7[%c0_14, %c256] : memref<2x1024xf32, #tpu.memory_space<vmem>>, vector<1x64xf32>
    tpu.vector_store %arg7[%c0_14, %c256], %32 {strides = array<i32>} : memref<2x1024xf32, #tpu.memory_space<vmem>>, vector<1x64xf32>,
    %34 = vector.extract_strided_slice %23 {offsets = [5, 0], sizes = [1, 64], strides = [1, 1]} : vector<16x64xf32> to vector<1x64xf32>
    %c0_15 = arith.constant 0 : index
    %c320 = arith.constant 320 : index
    %35 = vector.load %arg7[%c0_15, %c320] : memref<2x1024xf32, #tpu.memory_space<vmem>>, vector<1x64xf32>
    tpu.vector_store %arg7[%c0_15, %c320], %34 {strides = array<i32>} : memref<2x1024xf32, #tpu.memory_space<vmem>>, vector<1x64xf32>,
    %36 = vector.extract_strided_slice %23 {offsets = [6, 0], sizes = [1, 64], strides = [1, 1]} : vector<16x64xf32> to vector<1x64xf32>
    %c0_16 = arith.constant 0 : index
    %c384 = arith.constant 384 : index
    %37 = vector.load %arg7[%c0_16, %c384] : memref<2x1024xf32, #tpu.memory_space<vmem>>, vector<1x64xf32>
    tpu.vector_store %arg7[%c0_16, %c384], %36 {strides = array<i32>} : memref<2x1024xf32, #tpu.memory_space<vmem>>, vector<1x64xf32>,
    %38 = vector.extract_strided_slice %23 {offsets = [7, 0], sizes = [1, 64], strides = [1, 1]} : vector<16x64xf32> to vector<1x64xf32>
    %c0_17 = arith.constant 0 : index
    %c448 = arith.constant 448 : index
    %39 = vector.load %arg7[%c0_17, %c448] : memref<2x1024xf32, #tpu.memory_space<vmem>>, vector<1x64xf32>
    tpu.vector_store %arg7[%c0_17, %c448], %38 {strides = array<i32>} : memref<2x1024xf32, #tpu.memory_space<vmem>>, vector<1x64xf32>,
    %40 = vector.extract_strided_slice %23 {offsets = [8, 0], sizes = [1, 64], strides = [1, 1]} : vector<16x64xf32> to vector<1x64xf32>
    %c0_18 = arith.constant 0 : index
    %c512 = arith.constant 512 : index
    %41 = vector.load %arg7[%c0_18, %c512] : memref<2x1024xf32, #tpu.memory_space<vmem>>, vector<1x64xf32>
    tpu.vector_store %arg7[%c0_18, %c512], %40 {strides = array<i32>} : memref<2x1024xf32, #tpu.memory_space<vmem>>, vector<1x64xf32>,
    %42 = vector.extract_strided_slice %23 {offsets = [9, 0], sizes = [1, 64], strides = [1, 1]} : vector<16x64xf32> to vector<1x64xf32>
    %c0_19 = arith.constant 0 : index
    %c576 = arith.constant 576 : index
    %43 = vector.load %arg7[%c0_19, %c576] : memref<2x1024xf32, #tpu.memory_space<vmem>>, vector<1x64xf32>
    tpu.vector_store %arg7[%c0_19, %c576], %42 {strides = array<i32>} : memref<2x1024xf32, #tpu.memory_space<vmem>>, vector<1x64xf32>,
    %44 = vector.extract_strided_slice %23 {offsets = [10, 0], sizes = [1, 64], strides = [1, 1]} : vector<16x64xf32> to vector<1x64xf32>
    %c0_20 = arith.constant 0 : index
    %c640 = arith.constant 640 : index
    %45 = vector.load %arg7[%c0_20, %c640] : memref<2x1024xf32, #tpu.memory_space<vmem>>, vector<1x64xf32>
    tpu.vector_store %arg7[%c0_20, %c640], %44 {strides = array<i32>} : memref<2x1024xf32, #tpu.memory_space<vmem>>, vector<1x64xf32>,
    %46 = vector.extract_strided_slice %23 {offsets = [11, 0], sizes = [1, 64], strides = [1, 1]} : vector<16x64xf32> to vector<1x64xf32>
    %c0_21 = arith.constant 0 : index
    %c704 = arith.constant 704 : index
    %47 = vector.load %arg7[%c0_21, %c704] : memref<2x1024xf32, #tpu.memory_space<vmem>>, vector<1x64xf32>
    tpu.vector_store %arg7[%c0_21, %c704], %46 {strides = array<i32>} : memref<2x1024xf32, #tpu.memory_space<vmem>>, vector<1x64xf32>,
    %48 = vector.extract_strided_slice %23 {offsets = [12, 0], sizes = [1, 64], strides = [1, 1]} : vector<16x64xf32> to vector<1x64xf32>
    %c0_22 = arith.constant 0 : index
    %c768 = arith.constant 768 : index
    %49 = vector.load %arg7[%c0_22, %c768] : memref<2x1024xf32, #tpu.memory_space<vmem>>, vector<1x64xf32>
    tpu.vector_store %arg7[%c0_22, %c768], %48 {strides = array<i32>} : memref<2x1024xf32, #tpu.memory_space<vmem>>, vector<1x64xf32>,
    %50 = vector.extract_strided_slice %23 {offsets = [13, 0], sizes = [1, 64], strides = [1, 1]} : vector<16x64xf32> to vector<1x64xf32>
    %c0_23 = arith.constant 0 : index
    %c832 = arith.constant 832 : index
    %51 = vector.load %arg7[%c0_23, %c832] : memref<2x1024xf32, #tpu.memory_space<vmem>>, vector<1x64xf32>
    tpu.vector_store %arg7[%c0_23, %c832], %50 {strides = array<i32>} : memref<2x1024xf32, #tpu.memory_space<vmem>>, vector<1x64xf32>,
    %52 = vector.extract_strided_slice %23 {offsets = [14, 0], sizes = [1, 64], strides = [1, 1]} : vector<16x64xf32> to vector<1x64xf32>
    %c0_24 = arith.constant 0 : index
    %c896 = arith.constant 896 : index
    %53 = vector.load %arg7[%c0_24, %c896] : memref<2x1024xf32, #tpu.memory_space<vmem>>, vector<1x64xf32>
    tpu.vector_store %arg7[%c0_24, %c896], %52 {strides = array<i32>} : memref<2x1024xf32, #tpu.memory_space<vmem>>, vector<1x64xf32>,
    %54 = vector.extract_strided_slice %23 {offsets = [15, 0], sizes = [1, 64], strides = [1, 1]} : vector<16x64xf32> to vector<1x64xf32>
    %c0_25 = arith.constant 0 : index
    %c960 = arith.constant 960 : index
    %55 = vector.load %arg7[%c0_25, %c960] : memref<2x1024xf32, #tpu.memory_space<vmem>>, vector<1x64xf32>
    tpu.vector_store %arg7[%c0_25, %c960], %54 {strides = array<i32>} : memref<2x1024xf32, #tpu.memory_space<vmem>>, vector<1x64xf32>,
    %56 = vector.extract_strided_slice %2 {offsets = [16, 0], sizes = [16, 64], strides = [1, 1]} : vector<32x64xf32> to vector<16x64xf32>
    %cst_26 = arith.constant dense<0.000000e+00> : vector<64xf32>
    %57 = vector.multi_reduction <add>, %56, %cst_26 [0] : vector<16x64xf32> to vector<64xf32>
    %58 = vector.shape_cast %57 : vector<64xf32> to vector<1x64xf32>
    %cst_27 = arith.constant 1.600000e+01 : f32
    %59 = vector.broadcast %cst_27 : f32 to vector<1x64xf32>
    %60 = arith.divf %58, %59 : vector<1x64xf32>
    %61 = arith.mulf %56, %56 : vector<16x64xf32>
    %cst_28 = arith.constant dense<0.000000e+00> : vector<64xf32>
    %62 = vector.multi_reduction <add>, %61, %cst_28 [0] : vector<16x64xf32> to vector<64xf32>
    %63 = vector.shape_cast %62 : vector<64xf32> to vector<1x64xf32>
    %cst_29 = arith.constant 1.600000e+01 : f32
    %64 = vector.broadcast %cst_29 : f32 to vector<1x64xf32>
    %65 = arith.divf %63, %64 : vector<1x64xf32>
    %66 = arith.mulf %60, %60 : vector<1x64xf32>
    %67 = arith.subf %65, %66 : vector<1x64xf32>
    %68 = vector.broadcast %60 : vector<1x64xf32> to vector<16x64xf32>
    %69 = arith.subf %56, %68 : vector<16x64xf32>
    %cst_30 = arith.constant 9.99999974E-6 : f32
    %70 = vector.broadcast %cst_30 : f32 to vector<1x64xf32>
    %71 = arith.addf %67, %70 : vector<1x64xf32>
    %72 = math.rsqrt %71 : vector<1x64xf32>
    %73 = vector.broadcast %72 : vector<1x64xf32> to vector<16x64xf32>
    %74 = arith.mulf %69, %73 : vector<16x64xf32>
    %cst_31 = arith.constant 0.000000e+00 : f32
    %75 = vector.broadcast %cst_31 : f32 to vector<16x64xf32>
    %76 = arith.maximumf %74, %75 : vector<16x64xf32>
    %77 = vector.extract_strided_slice %76 {offsets = [0, 0], sizes = [1, 64], strides = [1, 1]} : vector<16x64xf32> to vector<1x64xf32>
    %c1 = arith.constant 1 : index
    %c0_32 = arith.constant 0 : index
    %78 = vector.load %arg7[%c1, %c0_32] : memref<2x1024xf32, #tpu.memory_space<vmem>>, vector<1x64xf32>
    tpu.vector_store %arg7[%c1, %c0_32], %77 {strides = array<i32>} : memref<2x1024xf32, #tpu.memory_space<vmem>>, vector<1x64xf32>,
    %79 = vector.extract_strided_slice %76 {offsets = [1, 0], sizes = [1, 64], strides = [1, 1]} : vector<16x64xf32> to vector<1x64xf32>
    %c1_33 = arith.constant 1 : index
    %c64_34 = arith.constant 64 : index
    %80 = vector.load %arg7[%c1_33, %c64_34] : memref<2x1024xf32, #tpu.memory_space<vmem>>, vector<1x64xf32>
    tpu.vector_store %arg7[%c1_33, %c64_34], %79 {strides = array<i32>} : memref<2x1024xf32, #tpu.memory_space<vmem>>, vector<1x64xf32>,
    %81 = vector.extract_strided_slice %76 {offsets = [2, 0], sizes = [1, 64], strides = [1, 1]} : vector<16x64xf32> to vector<1x64xf32>
    %c1_35 = arith.constant 1 : index
    %c128_36 = arith.constant 128 : index
    %82 = vector.load %arg7[%c1_35, %c128_36] : memref<2x1024xf32, #tpu.memory_space<vmem>>, vector<1x64xf32>
    tpu.vector_store %arg7[%c1_35, %c128_36], %81 {strides = array<i32>} : memref<2x1024xf32, #tpu.memory_space<vmem>>, vector<1x64xf32>,
    %83 = vector.extract_strided_slice %76 {offsets = [3, 0], sizes = [1, 64], strides = [1, 1]} : vector<16x64xf32> to vector<1x64xf32>
    %c1_37 = arith.constant 1 : index
    %c192_38 = arith.constant 192 : index
    %84 = vector.load %arg7[%c1_37, %c192_38] : memref<2x1024xf32, #tpu.memory_space<vmem>>, vector<1x64xf32>
    tpu.vector_store %arg7[%c1_37, %c192_38], %83 {strides = array<i32>} : memref<2x1024xf32, #tpu.memory_space<vmem>>, vector<1x64xf32>,
    %85 = vector.extract_strided_slice %76 {offsets = [4, 0], sizes = [1, 64], strides = [1, 1]} : vector<16x64xf32> to vector<1x64xf32>
    %c1_39 = arith.constant 1 : index
    %c256_40 = arith.constant 256 : index
    %86 = vector.load %arg7[%c1_39, %c256_40] : memref<2x1024xf32, #tpu.memory_space<vmem>>, vector<1x64xf32>
    tpu.vector_store %arg7[%c1_39, %c256_40], %85 {strides = array<i32>} : memref<2x1024xf32, #tpu.memory_space<vmem>>, vector<1x64xf32>,
    %87 = vector.extract_strided_slice %76 {offsets = [5, 0], sizes = [1, 64], strides = [1, 1]} : vector<16x64xf32> to vector<1x64xf32>
    %c1_41 = arith.constant 1 : index
    %c320_42 = arith.constant 320 : index
    %88 = vector.load %arg7[%c1_41, %c320_42] : memref<2x1024xf32, #tpu.memory_space<vmem>>, vector<1x64xf32>
    tpu.vector_store %arg7[%c1_41, %c320_42], %87 {strides = array<i32>} : memref<2x1024xf32, #tpu.memory_space<vmem>>, vector<1x64xf32>,
    %89 = vector.extract_strided_slice %76 {offsets = [6, 0], sizes = [1, 64], strides = [1, 1]} : vector<16x64xf32> to vector<1x64xf32>
    %c1_43 = arith.constant 1 : index
    %c384_44 = arith.constant 384 : index
    %90 = vector.load %arg7[%c1_43, %c384_44] : memref<2x1024xf32, #tpu.memory_space<vmem>>, vector<1x64xf32>
    tpu.vector_store %arg7[%c1_43, %c384_44], %89 {strides = array<i32>} : memref<2x1024xf32, #tpu.memory_space<vmem>>, vector<1x64xf32>,
    %91 = vector.extract_strided_slice %76 {offsets = [7, 0], sizes = [1, 64], strides = [1, 1]} : vector<16x64xf32> to vector<1x64xf32>
    %c1_45 = arith.constant 1 : index
    %c448_46 = arith.constant 448 : index
    %92 = vector.load %arg7[%c1_45, %c448_46] : memref<2x1024xf32, #tpu.memory_space<vmem>>, vector<1x64xf32>
    tpu.vector_store %arg7[%c1_45, %c448_46], %91 {strides = array<i32>} : memref<2x1024xf32, #tpu.memory_space<vmem>>, vector<1x64xf32>,
    %93 = vector.extract_strided_slice %76 {offsets = [8, 0], sizes = [1, 64], strides = [1, 1]} : vector<16x64xf32> to vector<1x64xf32>
    %c1_47 = arith.constant 1 : index
    %c512_48 = arith.constant 512 : index
    %94 = vector.load %arg7[%c1_47, %c512_48] : memref<2x1024xf32, #tpu.memory_space<vmem>>, vector<1x64xf32>
    tpu.vector_store %arg7[%c1_47, %c512_48], %93 {strides = array<i32>} : memref<2x1024xf32, #tpu.memory_space<vmem>>, vector<1x64xf32>,
    %95 = vector.extract_strided_slice %76 {offsets = [9, 0], sizes = [1, 64], strides = [1, 1]} : vector<16x64xf32> to vector<1x64xf32>
    %c1_49 = arith.constant 1 : index
    %c576_50 = arith.constant 576 : index
    %96 = vector.load %arg7[%c1_49, %c576_50] : memref<2x1024xf32, #tpu.memory_space<vmem>>, vector<1x64xf32>
    tpu.vector_store %arg7[%c1_49, %c576_50], %95 {strides = array<i32>} : memref<2x1024xf32, #tpu.memory_space<vmem>>, vector<1x64xf32>,
    %97 = vector.extract_strided_slice %76 {offsets = [10, 0], sizes = [1, 64], strides = [1, 1]} : vector<16x64xf32> to vector<1x64xf32>
    %c1_51 = arith.constant 1 : index
    %c640_52 = arith.constant 640 : index
    %98 = vector.load %arg7[%c1_51, %c640_52] : memref<2x1024xf32, #tpu.memory_space<vmem>>, vector<1x64xf32>
    tpu.vector_store %arg7[%c1_51, %c640_52], %97 {strides = array<i32>} : memref<2x1024xf32, #tpu.memory_space<vmem>>, vector<1x64xf32>,
    %99 = vector.extract_strided_slice %76 {offsets = [11, 0], sizes = [1, 64], strides = [1, 1]} : vector<16x64xf32> to vector<1x64xf32>
    %c1_53 = arith.constant 1 : index
    %c704_54 = arith.constant 704 : index
    %100 = vector.load %arg7[%c1_53, %c704_54] : memref<2x1024xf32, #tpu.memory_space<vmem>>, vector<1x64xf32>
    tpu.vector_store %arg7[%c1_53, %c704_54], %99 {strides = array<i32>} : memref<2x1024xf32, #tpu.memory_space<vmem>>, vector<1x64xf32>,
    %101 = vector.extract_strided_slice %76 {offsets = [12, 0], sizes = [1, 64], strides = [1, 1]} : vector<16x64xf32> to vector<1x64xf32>
    %c1_55 = arith.constant 1 : index
    %c768_56 = arith.constant 768 : index
    %102 = vector.load %arg7[%c1_55, %c768_56] : memref<2x1024xf32, #tpu.memory_space<vmem>>, vector<1x64xf32>
    tpu.vector_store %arg7[%c1_55, %c768_56], %101 {strides = array<i32>} : memref<2x1024xf32, #tpu.memory_space<vmem>>, vector<1x64xf32>,
    %103 = vector.extract_strided_slice %76 {offsets = [13, 0], sizes = [1, 64], strides = [1, 1]} : vector<16x64xf32> to vector<1x64xf32>
    %c1_57 = arith.constant 1 : index
    %c832_58 = arith.constant 832 : index
    %104 = vector.load %arg7[%c1_57, %c832_58] : memref<2x1024xf32, #tpu.memory_space<vmem>>, vector<1x64xf32>
    tpu.vector_store %arg7[%c1_57, %c832_58], %103 {strides = array<i32>} : memref<2x1024xf32, #tpu.memory_space<vmem>>, vector<1x64xf32>,
    %105 = vector.extract_strided_slice %76 {offsets = [14, 0], sizes = [1, 64], strides = [1, 1]} : vector<16x64xf32> to vector<1x64xf32>
    %c1_59 = arith.constant 1 : index
    %c896_60 = arith.constant 896 : index
    %106 = vector.load %arg7[%c1_59, %c896_60] : memref<2x1024xf32, #tpu.memory_space<vmem>>, vector<1x64xf32>
    tpu.vector_store %arg7[%c1_59, %c896_60], %105 {strides = array<i32>} : memref<2x1024xf32, #tpu.memory_space<vmem>>, vector<1x64xf32>,
    %107 = vector.extract_strided_slice %76 {offsets = [15, 0], sizes = [1, 64], strides = [1, 1]} : vector<16x64xf32> to vector<1x64xf32>
    %c1_61 = arith.constant 1 : index
    %c960_62 = arith.constant 960 : index
    %108 = vector.load %arg7[%c1_61, %c960_62] : memref<2x1024xf32, #tpu.memory_space<vmem>>, vector<1x64xf32>
    tpu.vector_store %arg7[%c1_61, %c960_62], %107 {strides = array<i32>} : memref<2x1024xf32, #tpu.memory_space<vmem>>, vector<1x64xf32>,
    %c0_63 = arith.constant 0 : index
    %c0_64 = arith.constant 0 : index
    %109 = vector.load %arg7[%c0_63, %c0_64] : memref<2x1024xf32, #tpu.memory_space<vmem>>, vector<2x1024xf32>
    %110 = arith.truncf %109 : vector<2x1024xf32> to vector<2x1024xbf16>
    %c0_65 = arith.constant 0 : index
    %c0_66 = arith.constant 0 : index
    %111 = vector.load %arg3[%c0_65, %c0_66] : memref<1024x64xbf16, #tpu.memory_space<vmem>>, vector<1024x64xbf16>
    %cst_67 = arith.constant dense<0.000000e+00> : vector<2x64xf32>
    %112 = tpu.matmul %110, %111, %cst_67 {dimension_numbers = #tpu.dot_dimension_numbers<[1], [0], [0], [1], [0, 0, 1, 1], [], []>} : vector<2x1024xbf16>, vector<1024x64xbf16>, vector<2x64xf32> -> vector<2x64xf32>
    %cst_68 = arith.constant 0.000000e+00 : f32
    %113 = vector.broadcast %cst_68 : f32 to vector<2x64xf32>
    %114 = arith.subf %112, %112 : vector<2x64xf32>
    %cst_69 = arith.constant 9.99999974E-6 : f32
    %115 = vector.broadcast %cst_69 : f32 to vector<2x64xf32>
    %116 = arith.addf %113, %115 : vector<2x64xf32>
    %117 = math.rsqrt %116 : vector<2x64xf32>
    %118 = arith.mulf %114, %117 : vector<2x64xf32>
    %cst_70 = arith.constant 0.000000e+00 : f32
    %119 = vector.broadcast %cst_70 : f32 to vector<2x64xf32>
    %120 = arith.maximumf %118, %119 : vector<2x64xf32>
    %121 = arith.truncf %120 : vector<2x64xf32> to vector<2x64xbf16>
    %c0_71 = arith.constant 0 : index
    %c0_72 = arith.constant 0 : index
    %122 = vector.load %arg4[%c0_71, %c0_72] : memref<64x128xbf16, #tpu.memory_space<vmem>>, vector<64x128xbf16>
    %cst_73 = arith.constant dense<0.000000e+00> : vector<2x128xf32>
    %123 = tpu.matmul %121, %122, %cst_73 {dimension_numbers = #tpu.dot_dimension_numbers<[1], [0], [0], [1], [0, 0, 1, 1], [], []>} : vector<2x64xbf16>, vector<64x128xbf16>, vector<2x128xf32> -> vector<2x128xf32>
    %c0_74 = arith.constant 0 : index
    %c0_75 = arith.constant 0 : index
    %124 = vector.load %arg5[%c0_74, %c0_75] : memref<1x128xf32, #tpu.memory_space<vmem>>, vector<1x128xf32>
    %125 = vector.broadcast %124 : vector<1x128xf32> to vector<2x128xf32>
    %126 = arith.addf %123, %125 : vector<2x128xf32>
    %c0_76 = arith.constant 0 : index
    %c0_77 = arith.constant 0 : index
    %127 = vector.load %arg6[%c0_76, %c0_77] : memref<2x128xf32, #tpu.memory_space<vmem>>, vector<2x128xf32>
    tpu.vector_store %arg6[%c0_76, %c0_77], %126 {strides = array<i32>} : memref<2x128xf32, #tpu.memory_space<vmem>>, vector<2x128xf32>,
    return
  }
  func.func @transform_0(%arg0: i32) -> (i32, i32) {
    %c0_i32 = arith.constant 0 : i32
    %c0_i32_0 = arith.constant 0 : i32
    %c0_i32_1 = arith.constant 0 : i32
    return %c0_i32, %c0_i32_0 : i32, i32
  }
  func.func @transform_1(%arg0: i32) -> (i32, i32) {
    %c0_i32 = arith.constant 0 : i32
    %c0_i32_0 = arith.constant 0 : i32
    %c0_i32_1 = arith.constant 0 : i32
    return %c0_i32, %c0_i32_0 : i32, i32
  }
  func.func @transform_2(%arg0: i32) -> (i32, i32) {
    %c0_i32 = arith.constant 0 : i32
    %c0_i32_0 = arith.constant 0 : i32
    %c0_i32_1 = arith.constant 0 : i32
    return %c0_i32, %c0_i32_0 : i32, i32
  }
  func.func @transform_3(%arg0: i32) -> (i32, i32) {
    %c0_i32 = arith.constant 0 : i32
    %c0_i32_0 = arith.constant 0 : i32
    %c0_i32_1 = arith.constant 0 : i32
    return %c0_i32, %c0_i32_0 : i32, i32
  }
  func.func @transform_4(%arg0: i32) -> (i32, i32) {
    %c0_i32 = arith.constant 0 : i32
    %c0_i32_0 = arith.constant 0 : i32
    %c0_i32_1 = arith.constant 0 : i32
    return %c0_i32, %c0_i32_0 : i32, i32
  }
  func.func @transform_5(%arg0: i32) -> (i32, i32) {
    %c0_i32 = arith.constant 0 : i32
    %c0_i32_0 = arith.constant 0 : i32
    %c0_i32_1 = arith.constant 0 : i32
    return %c0_i32, %c0_i32_0 : i32, i32
  }
}

</mosaic_0001>

<bundles_post_ra>
// kernel: latent_encoder_forward.4
= control target key start
LH: loop header
LB: loop body
LE: loop exit
PB: predicated region body
PF: predicated region fallthrough
CT: control target
= control target key end

     0   :  { %s3021_s12 = smov 0   ;;  %s3023_s13 = smov 0   ;;  %s3593_s0 = inlined_call_operand.vmem [shape: bf16[2,1024,27], index: 0, kind: input, shape index: {}]   ;;  %s3594_s1 = inlined_call_operand.vmem [shape: bf16[27,8], index: 1, kind: input, shape index: {}]   ;;  %s3595_s2 = inlined_call_operand.vmem [shape: f32[1,8], index: 2, kind: input, shape index: {}]   ;;  %s3596_s3 = inlined_call_operand.vmem [shape: bf16[2,1024,8], index: 3, kind: output, shape index: {}]  }
   0x1   :  { %s3025_s14 = smov 0  }
   0x2 LB: > { %s25_s15 = sadd.s32 1, %s2994_s13  ;;  %p2286_p0 = scmp.ge.s32.totalorder %s2998_s14, 1  ;;  %s2998_s14 = sphi %s3025_s14, %s13_s14   ;;  %s2994_s13 = sphi %s3023_s13, %s3598_s13   ;;  %s2990_s12 = sphi %s3021_s12, %s3597_s12  }
   0x3   : > { %p27_p1 = scmp.ge.s32.totalorder %s25_s15, 2  ;;  %p158_p2 = scmp.lt.s32.totalorder %s2998_s14, 3 }
   0x5   : > { %s3600_s15 = smov (%p27_p1, %s25_s15), 0  ;;  %p159_p3 = pnand %p2286_p0, %p158_p2 }
   0x6   : > { %p191_p4 = scmp.lt.s32.totalorder (!%p159_p3), %s2990_s12, 1 }
   0x7   : > { %162 = sbr.rel (%p159_p3) target bundleno = 352 (0x160), region = 32 }
   0xc   : > { %v2909_v0 = vld [vmem:[%s3594_s1 + $0x8] sm:$0x3f]   ;;  %vm874_vm0 = vcmask 1044480   ;;  %vm875_vm1 = vcmask 1045504   ;;  %v3000_v1 = vmov 65535   ;;  %v2910_v5 = vld [vmem:[%s3594_s1] sm:$0xff]  }
   0xd   : > { %v876_v2 = vsel %vm874_vm0, 4294967295, %v3000_v1  ;;  %s3602_s12 = smov (!%p191_p4, %s2990_s12), 1  ;;  %vm681_vm2 = vcmask 220160   ;;  %vm2066_vm3 = vcmask 60416  }
   0xe   : > { %v877_v3 = vsel %vm875_vm1, %v876_v2, 0  ;;  %s2552_s20 = sshll.u32 %s3602_s12, 9 }
   0xf   : > { %v879_v4 = vand.u32 %v2909_v0, %v877_v3  ;;  %s3053_s23 = scalar_lea.vmem %s3593_s0, %s2552_s20  ;;  %s3197_s28 = scalar_lea.vmem %s3596_s3, %s2552_s20 }
  0x10   : > { %v2911_v6 = vld [vmem:[%s3053_s23] sm:$0xff]   ;;  %v2913_v8 = vld [vmem:[%s3053_s23 + $0x8] sm:$0xff]   ;;  %v2915_v10 = vld [vmem:[%s3053_s23 + $0x10] sm:$0xff]  }
  0x11   : > { %2748 = vmatprep.subr.bf16.mxu0 %v879_v4  ;;  %2880 = vmatprep.subr.bf16.mxu1 %v879_v4  ;;  %v2912_v7 = vld [vmem:[%s3053_s23 + $0x100] sm:$0xff]   ;;  %v2914_v9 = vld [vmem:[%s3053_s23 + $0x108] sm:$0xff]   ;;  %v2916_v11 = vld [vmem:[%s3053_s23 + $0x110] sm:$0xff]  }
  0x12   : > { %2749 = vmatpush3.bf16.msra.mxu0 %v879_v4  ;;  %2882 = vmatpush3.bf16.msra.mxu1 %v879_v4  ;;  %v2917_v12 = vld [vmem:[%s3053_s23 + $0x18] sm:$0xff]   ;;  %v2919_v14 = vld [vmem:[%s3053_s23 + $0x20] sm:$0xff]   ;;  %v2921_v16 = vld [vmem:[%s3053_s23 + $0x28] sm:$0xff]  }
  0x13   : > { %2750 = vmatprep.subr.bf16.mxu0 %v2910_v5  ;;  %2881 = vmatprep.subr.bf16.mxu1 %v2910_v5  ;;  %v2918_v13 = vld [vmem:[%s3053_s23 + $0x118] sm:$0xff]   ;;  %v2920_v15 = vld [vmem:[%s3053_s23 + $0x120] sm:$0xff]   ;;  %v2922_v17 = vld [vmem:[%s3053_s23 + $0x128] sm:$0xff]  }
  0x14   : > { %2752 = vmatprep.mubr.msk.bf16.mxu0 %vm681_vm2, %v2911_v6  ;;  %2816 = vmatprep.mubr.msk.bf16.mxu1 %vm681_vm2, %v2912_v7  ;;  %v2923_v18 = vld [vmem:[%s3053_s23 + $0x30] sm:$0xff]   ;;  %v2925_v20 = vld [vmem:[%s3053_s23 + $0x38] sm:$0xff]   ;;  %v2927_v22 = vld [vmem:[%s3053_s23 + $0x40] sm:$0xff]  }
  0x15   : > { %v2924_v19 = vld [vmem:[%s3053_s23 + $0x130] sm:$0xff]   ;;  %v2926_v21 = vld [vmem:[%s3053_s23 + $0x138] sm:$0xff]   ;;  %v2928_v23 = vld [vmem:[%s3053_s23 + $0x140] sm:$0xff]  }
  0x16   : > { %2751 = vmatpush3.bf16.msra.mxu0 %v2910_v5  ;;  %2883 = vmatpush3.bf16.msra.mxu1 %v2910_v5  ;;  %v2929_v24 = vld [vmem:[%s3053_s23 + $0x48] sm:$0xff]   ;;  %v2931_v26 = vld [vmem:[%s3053_s23 + $0x50] sm:$0xff]   ;;  %v2933_v28 = vld [vmem:[%s3053_s23 + $0x58] sm:$0xff]  }
  0x17   : > { %v2930_v25 = vld [vmem:[%s3053_s23 + $0x148] sm:$0xff]   ;;  %v2932_v27 = vld [vmem:[%s3053_s23 + $0x150] sm:$0xff]   ;;  %v2934_v29 = vld [vmem:[%s3053_s23 + $0x158] sm:$0xff]  }
  0x18   : > { %v2935_v30 = vld [vmem:[%s3053_s23 + $0x60] sm:$0xff]   ;;  %v2937_v32 = vld [vmem:[%s3053_s23 + $0x68] sm:$0xff]   ;;  %v2939_v34 = vld [vmem:[%s3053_s23 + $0x70] sm:$0xff]  }
  0x19   : > { %2753 = vmatmul.mubr.msk.bf16.vlgmr.msra.gmra.mxu0 %vm681_vm2, %v2913_v8  ;;  %2817 = vmatmul.mubr.msk.bf16.vlgmr.msra.gmra.mxu1 %vm681_vm2, %v2914_v9  ;;  %v2936_v31 = vld [vmem:[%s3053_s23 + $0x160] sm:$0xff]   ;;  %v2938_v33 = vld [vmem:[%s3053_s23 + $0x168] sm:$0xff]   ;;  %v2940_v35 = vld [vmem:[%s3053_s23 + $0x170] sm:$0xff]  }
  0x1a   : > { %2756 = vmatprep.mubr.msk.bf16.mxu0 %vm681_vm2, %v2915_v10  ;;  %2820 = vmatprep.mubr.msk.bf16.mxu1 %vm681_vm2, %v2916_v11  ;;  %v2941_v36 = vld [vmem:[%s3053_s23 + $0x78] sm:$0xff]   ;;  %v2943_v38 = vld [vmem:[%s3053_s23 + $0x80] sm:$0xff]   ;;  %v2945_v40 = vld [vmem:[%s3053_s23 + $0x88] sm:$0xff]  }
  0x1b   : > { %v2942_v37 = vld [vmem:[%s3053_s23 + $0x178] sm:$0xff]   ;;  %v2944_v39 = vld [vmem:[%s3053_s23 + $0x180] sm:$0xff]   ;;  %v2946_v41 = vld [vmem:[%s3053_s23 + $0x188] sm:$0xff]  }
  0x1c   : > { %v2947_v42 = vld [vmem:[%s3053_s23 + $0x90] sm:$0xff]   ;;  %v2949_v44 = vld [vmem:[%s3053_s23 + $0x98] sm:$0xff]   ;;  %v2951_v46 = vld [vmem:[%s3053_s23 + $0xa0] sm:$0xff]  }
  0x1d   : > { %v2948_v43 = vld [vmem:[%s3053_s23 + $0x190] sm:$0xff]   ;;  %v2950_v45 = vld [vmem:[%s3053_s23 + $0x198] sm:$0xff]   ;;  %v2952_v47 = vld [vmem:[%s3053_s23 + $0x1a0] sm:$0xff]  }
  0x1e   : > { %v2953_v48 = vld [vmem:[%s3053_s23 + $0xa8] sm:$0xff]   ;;  %v2955_v50 = vld [vmem:[%s3053_s23 + $0xb0] sm:$0xff]   ;;  %v2957_v52 = vld [vmem:[%s3053_s23 + $0xb8] sm:$0xff]  }
  0x1f   : > { %v2954_v49 = vld [vmem:[%s3053_s23 + $0x1a8] sm:$0xff]   ;;  %v2956_v51 = vld [vmem:[%s3053_s23 + $0x1b0] sm:$0xff]   ;;  %v2958_v53 = vld [vmem:[%s3053_s23 + $0x1b8] sm:$0xff]  }
  0x20   : > { %v2959_v54 = vld [vmem:[%s3053_s23 + $0xc0] sm:$0xff]   ;;  %v2961_v56 = vld [vmem:[%s3053_s23 + $0xc8] sm:$0xff]   ;;  %v2963_v58 = vld [vmem:[%s3053_s23 + $0xd0] sm:$0xff]  }
  0x21   : > { %2757 = vmatmul.mubr.msk.bf16.gmra.mxu0 %vm681_vm2, %v2917_v12  ;;  %2821 = vmatmul.mubr.msk.bf16.gmra.mxu1 %vm681_vm2, %v2918_v13  ;;  %v2960_v55 = vld [vmem:[%s3053_s23 + $0x1c0] sm:$0xff]   ;;  %v2962_v57 = vld [vmem:[%s3053_s23 + $0x1c8] sm:$0xff]   ;;  %v2964_v59 = vld [vmem:[%s3053_s23 + $0x1d0] sm:$0xff]  }
  0x22   : > { %2760 = vmatprep.mubr.msk.bf16.mxu0 %vm681_vm2, %v2919_v14  ;;  %2824 = vmatprep.mubr.msk.bf16.mxu1 %vm681_vm2, %v2920_v15  ;;  %v2965_v60 = vld [vmem:[%s3053_s23 + $0xd8] sm:$0xff]   ;;  %v2967_v62 = vld [vmem:[%s3053_s23 + $0xe0] sm:$0xff]   ;;  %v2969_v0 = vld [vmem:[%s3053_s23 + $0xe8] sm:$0xff]  }
  0x23   : > { %v2966_v61 = vld [vmem:[%s3053_s23 + $0x1d8] sm:$0xff]   ;;  %v2968_v63 = vld [vmem:[%s3053_s23 + $0x1e0] sm:$0xff]   ;;  %v2970_v1 = vld [vmem:[%s3053_s23 + $0x1e8] sm:$0xff]  }
  0x24   : > { %v2971_v2 = vld [vmem:[%s3053_s23 + $0xf0] sm:$0xff]   ;;  %v2973_v4 = vld [vmem:[%s3053_s23 + $0xf8] sm:$0xff]   ;;  %v3186_v6 = vld [vmem:[%s3595_s2] ss:$0 sm:$0xff] }
  0x25   : > { %v2972_v3 = vld [vmem:[%s3053_s23 + $0x1f0] sm:$0xff]   ;;  %v2974_v5 = vld [vmem:[%s3053_s23 + $0x1f8] sm:$0xff]  }
  0x29   : > { %2761 = vmatmul.mubr.msk.bf16.gmra.mxu0 %vm681_vm2, %v2921_v16  ;;  %2825 = vmatmul.mubr.msk.bf16.gmra.mxu1 %vm681_vm2, %v2922_v17 }
  0x2a   : > { %2764 = vmatprep.mubr.msk.bf16.mxu0 %vm681_vm2, %v2923_v18  ;;  %2828 = vmatprep.mubr.msk.bf16.mxu1 %vm681_vm2, %v2924_v19 }
  0x31   : > { %2765 = vmatmul.mubr.msk.bf16.gmra.mxu0 %vm681_vm2, %v2925_v20  ;;  %2829 = vmatmul.mubr.msk.bf16.gmra.mxu1 %vm681_vm2, %v2926_v21 }
  0x32   : > { %2768 = vmatprep.mubr.msk.bf16.mxu0 %vm681_vm2, %v2927_v22  ;;  %2832 = vmatprep.mubr.msk.bf16.mxu1 %vm681_vm2, %v2928_v23 }
  0x39   : > { %2769 = vmatmul.mubr.msk.bf16.gmra.mxu0 %vm681_vm2, %v2929_v24  ;;  %2833 = vmatmul.mubr.msk.bf16.gmra.mxu1 %vm681_vm2, %v2930_v25 }
  0x3a   : > { %2772 = vmatprep.mubr.msk.bf16.mxu0 %vm681_vm2, %v2931_v26  ;;  %2836 = vmatprep.mubr.msk.bf16.mxu1 %vm681_vm2, %v2932_v27 }
  0x41   : > { %2773 = vmatmul.mubr.msk.bf16.gmra.mxu0 %vm681_vm2, %v2933_v28  ;;  %2837 = vmatmul.mubr.msk.bf16.gmra.mxu1 %vm681_vm2, %v2934_v29 }
  0x42   : > { %2776 = vmatprep.mubr.msk.bf16.mxu0 %vm681_vm2, %v2935_v30  ;;  %2840 = vmatprep.mubr.msk.bf16.mxu1 %vm681_vm2, %v2936_v31 }
  0x49   : > { %2777 = vmatmul.mubr.msk.bf16.gmra.mxu0 %vm681_vm2, %v2937_v32  ;;  %2841 = vmatmul.mubr.msk.bf16.gmra.mxu1 %vm681_vm2, %v2938_v33 }
  0x4a   : > { %2780 = vmatprep.mubr.msk.bf16.mxu0 %vm681_vm2, %v2939_v34  ;;  %2844 = vmatprep.mubr.msk.bf16.mxu1 %vm681_vm2, %v2940_v35 }
  0x51   : > { %2781 = vmatmul.mubr.msk.bf16.gmra.mxu0 %vm681_vm2, %v2941_v36  ;;  %2845 = vmatmul.mubr.msk.bf16.gmra.mxu1 %vm681_vm2, %v2942_v37 }
  0x52   : > { %2784 = vmatprep.mubr.msk.bf16.mxu0 %vm681_vm2, %v2943_v38  ;;  %2848 = vmatprep.mubr.msk.bf16.mxu1 %vm681_vm2, %v2944_v39 }
  0x59   : > { %2785 = vmatmul.mubr.msk.bf16.gmra.mxu0 %vm681_vm2, %v2945_v40  ;;  %2849 = vmatmul.mubr.msk.bf16.gmra.mxu1 %vm681_vm2, %v2946_v41 }
  0x5a   : > { %2788 = vmatprep.mubr.msk.bf16.mxu0 %vm681_vm2, %v2947_v42  ;;  %2852 = vmatprep.mubr.msk.bf16.mxu1 %vm681_vm2, %v2948_v43 }
  0x61   : > { %2789 = vmatmul.mubr.msk.bf16.gmra.mxu0 %vm681_vm2, %v2949_v44  ;;  %2853 = vmatmul.mubr.msk.bf16.gmra.mxu1 %vm681_vm2, %v2950_v45 }
  0x62   : > { %2792 = vmatprep.mubr.msk.bf16.mxu0 %vm681_vm2, %v2951_v46  ;;  %2856 = vmatprep.mubr.msk.bf16.mxu1 %vm681_vm2, %v2952_v47 }
  0x69   : > { %2793 = vmatmul.mubr.msk.bf16.gmra.mxu0 %vm681_vm2, %v2953_v48  ;;  %2857 = vmatmul.mubr.msk.bf16.gmra.mxu1 %vm681_vm2, %v2954_v49 }
  0x6a   : > { %2796 = vmatprep.mubr.msk.bf16.mxu0 %vm681_vm2, %v2955_v50  ;;  %2860 = vmatprep.mubr.msk.bf16.mxu1 %vm681_vm2, %v2956_v51 }
  0x71   : > { %2797 = vmatmul.mubr.msk.bf16.gmra.mxu0 %vm681_vm2, %v2957_v52  ;;  %2861 = vmatmul.mubr.msk.bf16.gmra.mxu1 %vm681_vm2, %v2958_v53 }
  0x72   : > { %2800 = vmatprep.mubr.msk.bf16.mxu0 %vm681_vm2, %v2959_v54  ;;  %2864 = vmatprep.mubr.msk.bf16.mxu1 %vm681_vm2, %v2960_v55 }
  0x79   : > { %2801 = vmatmul.mubr.msk.bf16.gmra.mxu0 %vm681_vm2, %v2961_v56  ;;  %2865 = vmatmul.mubr.msk.bf16.gmra.mxu1 %vm681_vm2, %v2962_v57 }
  0x7a   : > { %2804 = vmatprep.mubr.msk.bf16.mxu0 %vm681_vm2, %v2963_v58  ;;  %2868 = vmatprep.mubr.msk.bf16.mxu1 %vm681_vm2, %v2964_v59 }
  0x81   : > { %2805 = vmatmul.mubr.msk.bf16.gmra.mxu0 %vm681_vm2, %v2965_v60  ;;  %2869 = vmatmul.mubr.msk.bf16.gmra.mxu1 %vm681_vm2, %v2966_v61 }
  0x82   : > { %2808 = vmatprep.mubr.msk.bf16.mxu0 %vm681_vm2, %v2967_v62  ;;  %2872 = vmatprep.mubr.msk.bf16.mxu1 %vm681_vm2, %v2968_v63 }
  0x89   : > { %2809 = vmatmul.mubr.msk.bf16.gmra.mxu0 %vm681_vm2, %v2969_v0  ;;  %2873 = vmatmul.mubr.msk.bf16.gmra.mxu1 %vm681_vm2, %v2970_v1 }
  0x8a   : > { %2812 = vmatprep.mubr.msk.bf16.mxu0 %vm681_vm2, %v2971_v2  ;;  %2876 = vmatprep.mubr.msk.bf16.mxu1 %vm681_vm2, %v2972_v3 }
  0x91   : > { %2813 = vmatmul.mubr.msk.bf16.gmra.mxu0 %vm681_vm2, %v2973_v4  ;;  %2877 = vmatmul.mubr.msk.bf16.gmra.mxu1 %vm681_vm2, %v2974_v5 }
  0xd9   : > { %v2754_v7 = vpop.f32.mrf.mxu0  ;;  %v2818_v8 = vpop.f32.mrf.mxu1 }
  0xda   : > { %v924_v9 = vadd.f32 %v2754_v7, %v3186_v6  ;;  %v1180_v10 = vadd.f32 %v2818_v8, %v3186_v6 }
  0xdb   : > { %v915_v11 = vpop.f32.mrf.mxu0  ;;  %v1171_v12 = vpop.f32.mrf.mxu1 }
  0xdc   : > { %v1428_v13 = vmax.f32 %v924_v9, 0.0  ;;  %v1492_v14 = vmax.f32 %v1180_v10, 0.0  ;;  %v916_v15 = vadd.f32 %v3186_v6, %v915_v11  ;;  %v1172_v16 = vadd.f32 %v3186_v6, %v1171_v12 }
  0xdd   : > { %v2755_v17 = vpop.f32.mrf.mxu0  ;;  %v2819_v18 = vpop.f32.mrf.mxu1 }
  0xde   : > { %v2556_v19 = vpack.c.bf16 %v1428_v13, %v1428_v13  ;;  %v2620_v20 = vpack.c.bf16 %v1492_v14, %v1492_v14  ;;  %v1426_v21 = vmax.f32 %v916_v15, 0.0  ;;  %v1490_v22 = vmax.f32 %v1172_v16, 0.0 }
  0xdf   : > { %v927_v23 = vadd.f32 %v2755_v17, %v3186_v6  ;;  %v1183_v24 = vadd.f32 %v2819_v18, %v3186_v6  ;;  %v918_v25 = vpop.f32.mrf.mxu0  ;;  %v1174_v26 = vpop.f32.mrf.mxu1 }
  0xe0   : > { %2069 = vst.msk [vmem:[%s3197_s28 + $0x8] sm:$0xf] %vm2066_vm3, %v2556_v19  ;;  %2133 = vst.msk [vmem:[%s3197_s28 + $0x108] sm:$0xf] %vm2066_vm3, %v2620_v20  ;;  %v2554_v27 = vpack.c.bf16 %v1426_v21, %v1426_v21  ;;  %v2618_v28 = vpack.c.bf16 %v1490_v22, %v1490_v22  ;;  %v919_v29 = vadd.f32 %v3186_v6, %v918_v25 }
  0xe1   : > { %v1175_v30 = vadd.f32 %v3186_v6, %v1174_v26  ;;  %v1429_v31 = vmax.f32 %v927_v23, 0.0  ;;  %v1493_v32 = vmax.f32 %v1183_v24, 0.0  ;;  %v2758_v33 = vpop.f32.mrf.mxu0  ;;  %v2822_v34 = vpop.f32.mrf.mxu1 }
  0xe2   : > { %2067 = vst.msk [vmem:[%s3197_s28] sm:$0xf] %vm2066_vm3, %v2554_v27  ;;  %2131 = vst.msk [vmem:[%s3197_s28 + $0x100] sm:$0xf] %vm2066_vm3, %v2618_v28  ;;  %v1427_v35 = vmax.f32 %v919_v29, 0.0  ;;  %v940_v37 = vadd.f32 %v2758_v33, %v3186_v6  ;;  %v1196_v38 = vadd.f32 %v2822_v34, %v3186_v6 }
  0xe3   : > { %v1491_v36 = vmax.f32 %v1175_v30, 0.0  ;;  %v2557_v39 = vpack.c.bf16 %v1429_v31, %v1429_v31  ;;  %v2621_v40 = vpack.c.bf16 %v1493_v32, %v1493_v32  ;;  %v931_v41 = vpop.f32.mrf.mxu0  ;;  %v1187_v42 = vpop.f32.mrf.mxu1 }
  0xe4   : > { %v2555_v43 = vpack.c.bf16 %v1427_v35, %v1427_v35  ;;  %v1432_v45 = vmax.f32 %v940_v37, 0.0  ;;  %v1496_v46 = vmax.f32 %v1196_v38, 0.0  ;;  %v932_v47 = vadd.f32 %v3186_v6, %v931_v41 }
  0xe5   : > { %v2619_v44 = vpack.c.bf16 %v1491_v36, %v1491_v36  ;;  %2070 = vst.msk [vmem:[%s3197_s28 + $0xc] sm:$0xf] %vm2066_vm3, %v2557_v39  ;;  %2134 = vst.msk [vmem:[%s3197_s28 + $0x10c] sm:$0xf] %vm2066_vm3, %v2621_v40  ;;  %v1188_v48 = vadd.f32 %v3186_v6, %v1187_v42  ;;  %v2759_v49 = vpop.f32.mrf.mxu0  ;;  %v2823_v50 = vpop.f32.mrf.mxu1 }
  0xe6   : > { %2068 = vst.msk [vmem:[%s3197_s28 + $0x4] sm:$0xf] %vm2066_vm3, %v2555_v43  ;;  %v2560_v51 = vpack.c.bf16 %v1432_v45, %v1432_v45  ;;  %v2624_v52 = vpack.c.bf16 %v1496_v46, %v1496_v46  ;;  %v943_v53 = vadd.f32 %v2759_v49, %v3186_v6  ;;  %v1199_v54 = vadd.f32 %v2823_v50, %v3186_v6 }
  0xe7   : > { %2132 = vst.msk [vmem:[%s3197_s28 + $0x104] sm:$0xf] %vm2066_vm3, %v2619_v44  ;;  %v1430_v55 = vmax.f32 %v932_v47, 0.0  ;;  %v1494_v56 = vmax.f32 %v1188_v48, 0.0  ;;  %v934_v57 = vpop.f32.mrf.mxu0  ;;  %v1190_v58 = vpop.f32.mrf.mxu1 }
  0xe8   : > { %2073 = vst.msk [vmem:[%s3197_s28 + $0x18] sm:$0xf] %vm2066_vm3, %v2560_v51  ;;  %2137 = vst.msk [vmem:[%s3197_s28 + $0x118] sm:$0xf] %vm2066_vm3, %v2624_v52  ;;  %v1433_v59 = vmax.f32 %v943_v53, 0.0  ;;  %v1497_v60 = vmax.f32 %v1199_v54, 0.0  ;;  %v935_v61 = vadd.f32 %v3186_v6, %v934_v57  ;;  %v1191_v62 = vadd.f32 %v3186_v6, %v1190_v58 }
  0xe9   : > { %v2558_v63 = vpack.c.bf16 %v1430_v55, %v1430_v55  ;;  %v2622_v0 = vpack.c.bf16 %v1494_v56, %v1494_v56  ;;  %v2762_v1 = vpop.f32.mrf.mxu0  ;;  %v2826_v2 = vpop.f32.mrf.mxu1 }
  0xea   : > { %v2561_v3 = vpack.c.bf16 %v1433_v59, %v1433_v59  ;;  %v2625_v4 = vpack.c.bf16 %v1497_v60, %v1497_v60  ;;  %v1431_v5 = vmax.f32 %v935_v61, 0.0  ;;  %v1495_v7 = vmax.f32 %v1191_v62, 0.0 }
  0xeb   : > { %2071 = vst.msk [vmem:[%s3197_s28 + $0x10] sm:$0xf] %vm2066_vm3, %v2558_v63  ;;  %2135 = vst.msk [vmem:[%s3197_s28 + $0x110] sm:$0xf] %vm2066_vm3, %v2622_v0  ;;  %v956_v8 = vadd.f32 %v2762_v1, %v3186_v6  ;;  %v1212_v9 = vadd.f32 %v2826_v2, %v3186_v6  ;;  %v947_v10 = vpop.f32.mrf.mxu0  ;;  %v1203_v11 = vpop.f32.mrf.mxu1 }
  0xec   : > { %2074 = vst.msk [vmem:[%s3197_s28 + $0x1c] sm:$0xf] %vm2066_vm3, %v2561_v3  ;;  %2138 = vst.msk [vmem:[%s3197_s28 + $0x11c] sm:$0xf] %vm2066_vm3, %v2625_v4  ;;  %v2559_v12 = vpack.c.bf16 %v1431_v5, %v1431_v5  ;;  %v2623_v13 = vpack.c.bf16 %v1495_v7, %v1495_v7  ;;  %v948_v14 = vadd.f32 %v3186_v6, %v947_v10 }
  0xed   : > { %v1204_v15 = vadd.f32 %v3186_v6, %v1203_v11  ;;  %v1436_v16 = vmax.f32 %v956_v8, 0.0  ;;  %v1500_v17 = vmax.f32 %v1212_v9, 0.0  ;;  %v2763_v18 = vpop.f32.mrf.mxu0  ;;  %v2827_v19 = vpop.f32.mrf.mxu1 }
  0xee   : > { %2072 = vst.msk [vmem:[%s3197_s28 + $0x14] sm:$0xf] %vm2066_vm3, %v2559_v12  ;;  %2136 = vst.msk [vmem:[%s3197_s28 + $0x114] sm:$0xf] %vm2066_vm3, %v2623_v13  ;;  %v1434_v20 = vmax.f32 %v948_v14, 0.0  ;;  %v959_v22 = vadd.f32 %v2763_v18, %v3186_v6  ;;  %v1215_v23 = vadd.f32 %v2827_v19, %v3186_v6 }
  0xef   : > { %v1498_v21 = vmax.f32 %v1204_v15, 0.0  ;;  %v2564_v24 = vpack.c.bf16 %v1436_v16, %v1436_v16  ;;  %v2628_v25 = vpack.c.bf16 %v1500_v17, %v1500_v17  ;;  %v950_v26 = vpop.f32.mrf.mxu0  ;;  %v1206_v27 = vpop.f32.mrf.mxu1 }
  0xf0   : > { %v2562_v28 = vpack.c.bf16 %v1434_v20, %v1434_v20  ;;  %v1437_v30 = vmax.f32 %v959_v22, 0.0  ;;  %v1501_v31 = vmax.f32 %v1215_v23, 0.0  ;;  %v951_v32 = vadd.f32 %v3186_v6, %v950_v26 }
  0xf1   : > { %v2626_v29 = vpack.c.bf16 %v1498_v21, %v1498_v21  ;;  %2077 = vst.msk [vmem:[%s3197_s28 + $0x28] sm:$0xf] %vm2066_vm3, %v2564_v24  ;;  %2141 = vst.msk [vmem:[%s3197_s28 + $0x128] sm:$0xf] %vm2066_vm3, %v2628_v25  ;;  %v1207_v33 = vadd.f32 %v3186_v6, %v1206_v27  ;;  %v2766_v34 = vpop.f32.mrf.mxu0  ;;  %v2830_v35 = vpop.f32.mrf.mxu1 }
  0xf2   : > { %2075 = vst.msk [vmem:[%s3197_s28 + $0x20] sm:$0xf] %vm2066_vm3, %v2562_v28  ;;  %v2565_v36 = vpack.c.bf16 %v1437_v30, %v1437_v30  ;;  %v2629_v37 = vpack.c.bf16 %v1501_v31, %v1501_v31  ;;  %v972_v38 = vadd.f32 %v2766_v34, %v3186_v6  ;;  %v1228_v39 = vadd.f32 %v2830_v35, %v3186_v6 }
  0xf3   : > { %2139 = vst.msk [vmem:[%s3197_s28 + $0x120] sm:$0xf] %vm2066_vm3, %v2626_v29  ;;  %v1435_v40 = vmax.f32 %v951_v32, 0.0  ;;  %v1499_v41 = vmax.f32 %v1207_v33, 0.0  ;;  %v963_v42 = vpop.f32.mrf.mxu0  ;;  %v1219_v43 = vpop.f32.mrf.mxu1 }
  0xf4   : > { %2078 = vst.msk [vmem:[%s3197_s28 + $0x2c] sm:$0xf] %vm2066_vm3, %v2565_v36  ;;  %2142 = vst.msk [vmem:[%s3197_s28 + $0x12c] sm:$0xf] %vm2066_vm3, %v2629_v37  ;;  %v1440_v44 = vmax.f32 %v972_v38, 0.0  ;;  %v1504_v45 = vmax.f32 %v1228_v39, 0.0  ;;  %v964_v46 = vadd.f32 %v3186_v6, %v963_v42  ;;  %v1220_v47 = vadd.f32 %v3186_v6, %v1219_v43 }
  0xf5   : > { %v2563_v48 = vpack.c.bf16 %v1435_v40, %v1435_v40  ;;  %v2627_v49 = vpack.c.bf16 %v1499_v41, %v1499_v41  ;;  %v2767_v50 = vpop.f32.mrf.mxu0  ;;  %v2831_v51 = vpop.f32.mrf.mxu1 }
  0xf6   : > { %v2568_v52 = vpack.c.bf16 %v1440_v44, %v1440_v44  ;;  %v2632_v53 = vpack.c.bf16 %v1504_v45, %v1504_v45  ;;  %v1438_v54 = vmax.f32 %v964_v46, 0.0  ;;  %v1502_v55 = vmax.f32 %v1220_v47, 0.0 }
  0xf7   : > { %2076 = vst.msk [vmem:[%s3197_s28 + $0x24] sm:$0xf] %vm2066_vm3, %v2563_v48  ;;  %2140 = vst.msk [vmem:[%s3197_s28 + $0x124] sm:$0xf] %vm2066_vm3, %v2627_v49  ;;  %v975_v56 = vadd.f32 %v2767_v50, %v3186_v6  ;;  %v1231_v57 = vadd.f32 %v2831_v51, %v3186_v6  ;;  %v966_v58 = vpop.f32.mrf.mxu0  ;;  %v1222_v59 = vpop.f32.mrf.mxu1 }
  0xf8   : > { %2081 = vst.msk [vmem:[%s3197_s28 + $0x38] sm:$0xf] %vm2066_vm3, %v2568_v52  ;;  %2145 = vst.msk [vmem:[%s3197_s28 + $0x138] sm:$0xf] %vm2066_vm3, %v2632_v53  ;;  %v2566_v60 = vpack.c.bf16 %v1438_v54, %v1438_v54  ;;  %v2630_v61 = vpack.c.bf16 %v1502_v55, %v1502_v55  ;;  %v967_v62 = vadd.f32 %v3186_v6, %v966_v58 }
  0xf9   : > { %v1223_v63 = vadd.f32 %v3186_v6, %v1222_v59  ;;  %v1441_v0 = vmax.f32 %v975_v56, 0.0  ;;  %v1505_v1 = vmax.f32 %v1231_v57, 0.0  ;;  %v2770_v2 = vpop.f32.mrf.mxu0  ;;  %v2834_v3 = vpop.f32.mrf.mxu1 }
  0xfa   : > { %2079 = vst.msk [vmem:[%s3197_s28 + $0x30] sm:$0xf] %vm2066_vm3, %v2566_v60  ;;  %2143 = vst.msk [vmem:[%s3197_s28 + $0x130] sm:$0xf] %vm2066_vm3, %v2630_v61  ;;  %v1439_v4 = vmax.f32 %v967_v62, 0.0  ;;  %v988_v7 = vadd.f32 %v2770_v2, %v3186_v6  ;;  %v1244_v8 = vadd.f32 %v2834_v3, %v3186_v6 }
  0xfb   : > { %v1503_v5 = vmax.f32 %v1223_v63, 0.0  ;;  %v2569_v9 = vpack.c.bf16 %v1441_v0, %v1441_v0  ;;  %v2633_v10 = vpack.c.bf16 %v1505_v1, %v1505_v1  ;;  %v979_v11 = vpop.f32.mrf.mxu0  ;;  %v1235_v12 = vpop.f32.mrf.mxu1 }
  0xfc   : > { %v2567_v13 = vpack.c.bf16 %v1439_v4, %v1439_v4  ;;  %v1444_v15 = vmax.f32 %v988_v7, 0.0  ;;  %v1508_v16 = vmax.f32 %v1244_v8, 0.0  ;;  %v980_v17 = vadd.f32 %v3186_v6, %v979_v11 }
  0xfd   : > { %v2631_v14 = vpack.c.bf16 %v1503_v5, %v1503_v5  ;;  %2082 = vst.msk [vmem:[%s3197_s28 + $0x3c] sm:$0xf] %vm2066_vm3, %v2569_v9  ;;  %2146 = vst.msk [vmem:[%s3197_s28 + $0x13c] sm:$0xf] %vm2066_vm3, %v2633_v10  ;;  %v1236_v18 = vadd.f32 %v3186_v6, %v1235_v12  ;;  %v2771_v19 = vpop.f32.mrf.mxu0  ;;  %v2835_v20 = vpop.f32.mrf.mxu1 }
  0xfe   : > { %2080 = vst.msk [vmem:[%s3197_s28 + $0x34] sm:$0xf] %vm2066_vm3, %v2567_v13  ;;  %v2572_v21 = vpack.c.bf16 %v1444_v15, %v1444_v15  ;;  %v2636_v22 = vpack.c.bf16 %v1508_v16, %v1508_v16  ;;  %v991_v23 = vadd.f32 %v2771_v19, %v3186_v6  ;;  %v1247_v24 = vadd.f32 %v2835_v20, %v3186_v6 }
  0xff   : > { %2144 = vst.msk [vmem:[%s3197_s28 + $0x134] sm:$0xf] %vm2066_vm3, %v2631_v14  ;;  %v1442_v25 = vmax.f32 %v980_v17, 0.0  ;;  %v1506_v26 = vmax.f32 %v1236_v18, 0.0  ;;  %v982_v27 = vpop.f32.mrf.mxu0  ;;  %v1238_v28 = vpop.f32.mrf.mxu1 }
 0x100   : > { %2085 = vst.msk [vmem:[%s3197_s28 + $0x48] sm:$0xf] %vm2066_vm3, %v2572_v21  ;;  %2149 = vst.msk [vmem:[%s3197_s28 + $0x148] sm:$0xf] %vm2066_vm3, %v2636_v22  ;;  %v1445_v29 = vmax.f32 %v991_v23, 0.0  ;;  %v1509_v30 = vmax.f32 %v1247_v24, 0.0  ;;  %v983_v31 = vadd.f32 %v3186_v6, %v982_v27  ;;  %v1239_v32 = vadd.f32 %v3186_v6, %v1238_v28 }
 0x101   : > { %v2570_v33 = vpack.c.bf16 %v1442_v25, %v1442_v25  ;;  %v2634_v34 = vpack.c.bf16 %v1506_v26, %v1506_v26  ;;  %v2774_v35 = vpop.f32.mrf.mxu0  ;;  %v2838_v36 = vpop.f32.mrf.mxu1 }
 0x102   : > { %v2573_v37 = vpack.c.bf16 %v1445_v29, %v1445_v29  ;;  %v2637_v38 = vpack.c.bf16 %v1509_v30, %v1509_v30  ;;  %v1443_v39 = vmax.f32 %v983_v31, 0.0  ;;  %v1507_v40 = vmax.f32 %v1239_v32, 0.0 }
 0x103   : > { %2083 = vst.msk [vmem:[%s3197_s28 + $0x40] sm:$0xf] %vm2066_vm3, %v2570_v33  ;;  %2147 = vst.msk [vmem:[%s3197_s28 + $0x140] sm:$0xf] %vm2066_vm3, %v2634_v34  ;;  %v1004_v41 = vadd.f32 %v2774_v35, %v3186_v6  ;;  %v1260_v42 = vadd.f32 %v2838_v36, %v3186_v6  ;;  %v995_v43 = vpop.f32.mrf.mxu0  ;;  %v1251_v44 = vpop.f32.mrf.mxu1 }
 0x104   : > { %2086 = vst.msk [vmem:[%s3197_s28 + $0x4c] sm:$0xf] %vm2066_vm3, %v2573_v37  ;;  %2150 = vst.msk [vmem:[%s3197_s28 + $0x14c] sm:$0xf] %vm2066_vm3, %v2637_v38  ;;  %v2571_v45 = vpack.c.bf16 %v1443_v39, %v1443_v39  ;;  %v2635_v46 = vpack.c.bf16 %v1507_v40, %v1507_v40  ;;  %v996_v47 = vadd.f32 %v3186_v6, %v995_v43 }
 0x105   : > { %v1252_v48 = vadd.f32 %v3186_v6, %v1251_v44  ;;  %v1448_v49 = vmax.f32 %v1004_v41, 0.0  ;;  %v1512_v50 = vmax.f32 %v1260_v42, 0.0  ;;  %v2775_v51 = vpop.f32.mrf.mxu0  ;;  %v2839_v52 = vpop.f32.mrf.mxu1 }
 0x106   : > { %2084 = vst.msk [vmem:[%s3197_s28 + $0x44] sm:$0xf] %vm2066_vm3, %v2571_v45  ;;  %2148 = vst.msk [vmem:[%s3197_s28 + $0x144] sm:$0xf] %vm2066_vm3, %v2635_v46  ;;  %v1446_v53 = vmax.f32 %v996_v47, 0.0  ;;  %v1007_v55 = vadd.f32 %v2775_v51, %v3186_v6  ;;  %v1263_v56 = vadd.f32 %v2839_v52, %v3186_v6 }
 0x107   : > { %v1510_v54 = vmax.f32 %v1252_v48, 0.0  ;;  %v2576_v57 = vpack.c.bf16 %v1448_v49, %v1448_v49  ;;  %v2640_v58 = vpack.c.bf16 %v1512_v50, %v1512_v50  ;;  %v998_v59 = vpop.f32.mrf.mxu0  ;;  %v1254_v60 = vpop.f32.mrf.mxu1 }
 0x108   : > { %v2574_v61 = vpack.c.bf16 %v1446_v53, %v1446_v53  ;;  %v1449_v63 = vmax.f32 %v1007_v55, 0.0  ;;  %v1513_v0 = vmax.f32 %v1263_v56, 0.0  ;;  %v999_v1 = vadd.f32 %v3186_v6, %v998_v59 }
 0x109   : > { %v2638_v62 = vpack.c.bf16 %v1510_v54, %v1510_v54  ;;  %2089 = vst.msk [vmem:[%s3197_s28 + $0x58] sm:$0xf] %vm2066_vm3, %v2576_v57  ;;  %2153 = vst.msk [vmem:[%s3197_s28 + $0x158] sm:$0xf] %vm2066_vm3, %v2640_v58  ;;  %v1255_v2 = vadd.f32 %v3186_v6, %v1254_v60  ;;  %v2778_v3 = vpop.f32.mrf.mxu0  ;;  %v2842_v4 = vpop.f32.mrf.mxu1 }
 0x10a   : > { %2087 = vst.msk [vmem:[%s3197_s28 + $0x50] sm:$0xf] %vm2066_vm3, %v2574_v61  ;;  %v2577_v5 = vpack.c.bf16 %v1449_v63, %v1449_v63  ;;  %v2641_v7 = vpack.c.bf16 %v1513_v0, %v1513_v0  ;;  %v1020_v8 = vadd.f32 %v2778_v3, %v3186_v6  ;;  %v1276_v9 = vadd.f32 %v2842_v4, %v3186_v6 }
 0x10b   : > { %2151 = vst.msk [vmem:[%s3197_s28 + $0x150] sm:$0xf] %vm2066_vm3, %v2638_v62  ;;  %v1447_v10 = vmax.f32 %v999_v1, 0.0  ;;  %v1511_v11 = vmax.f32 %v1255_v2, 0.0  ;;  %v1011_v12 = vpop.f32.mrf.mxu0  ;;  %v1267_v13 = vpop.f32.mrf.mxu1 }
 0x10c   : > { %2090 = vst.msk [vmem:[%s3197_s28 + $0x5c] sm:$0xf] %vm2066_vm3, %v2577_v5  ;;  %2154 = vst.msk [vmem:[%s3197_s28 + $0x15c] sm:$0xf] %vm2066_vm3, %v2641_v7  ;;  %v1452_v14 = vmax.f32 %v1020_v8, 0.0  ;;  %v1516_v15 = vmax.f32 %v1276_v9, 0.0  ;;  %v1012_v16 = vadd.f32 %v3186_v6, %v1011_v12  ;;  %v1268_v17 = vadd.f32 %v3186_v6, %v1267_v13 }
 0x10d   : > { %v2575_v18 = vpack.c.bf16 %v1447_v10, %v1447_v10  ;;  %v2639_v19 = vpack.c.bf16 %v1511_v11, %v1511_v11  ;;  %v2779_v20 = vpop.f32.mrf.mxu0  ;;  %v2843_v21 = vpop.f32.mrf.mxu1 }
 0x10e   : > { %v2580_v22 = vpack.c.bf16 %v1452_v14, %v1452_v14  ;;  %v2644_v23 = vpack.c.bf16 %v1516_v15, %v1516_v15  ;;  %v1450_v24 = vmax.f32 %v1012_v16, 0.0  ;;  %v1514_v25 = vmax.f32 %v1268_v17, 0.0 }
 0x10f   : > { %2088 = vst.msk [vmem:[%s3197_s28 + $0x54] sm:$0xf] %vm2066_vm3, %v2575_v18  ;;  %2152 = vst.msk [vmem:[%s3197_s28 + $0x154] sm:$0xf] %vm2066_vm3, %v2639_v19  ;;  %v1023_v26 = vadd.f32 %v2779_v20, %v3186_v6  ;;  %v1279_v27 = vadd.f32 %v2843_v21, %v3186_v6  ;;  %v1014_v28 = vpop.f32.mrf.mxu0  ;;  %v1270_v29 = vpop.f32.mrf.mxu1 }
 0x110   : > { %2093 = vst.msk [vmem:[%s3197_s28 + $0x68] sm:$0xf] %vm2066_vm3, %v2580_v22  ;;  %2157 = vst.msk [vmem:[%s3197_s28 + $0x168] sm:$0xf] %vm2066_vm3, %v2644_v23  ;;  %v2578_v30 = vpack.c.bf16 %v1450_v24, %v1450_v24  ;;  %v2642_v31 = vpack.c.bf16 %v1514_v25, %v1514_v25  ;;  %v1015_v32 = vadd.f32 %v3186_v6, %v1014_v28 }
 0x111   : > { %v1271_v33 = vadd.f32 %v3186_v6, %v1270_v29  ;;  %v1453_v34 = vmax.f32 %v1023_v26, 0.0  ;;  %v1517_v35 = vmax.f32 %v1279_v27, 0.0  ;;  %v2782_v36 = vpop.f32.mrf.mxu0  ;;  %v2846_v37 = vpop.f32.mrf.mxu1 }
 0x112   : > { %2091 = vst.msk [vmem:[%s3197_s28 + $0x60] sm:$0xf] %vm2066_vm3, %v2578_v30  ;;  %2155 = vst.msk [vmem:[%s3197_s28 + $0x160] sm:$0xf] %vm2066_vm3, %v2642_v31  ;;  %v1451_v38 = vmax.f32 %v1015_v32, 0.0  ;;  %v1036_v40 = vadd.f32 %v2782_v36, %v3186_v6  ;;  %v1292_v41 = vadd.f32 %v2846_v37, %v3186_v6 }
 0x113   : > { %v1515_v39 = vmax.f32 %v1271_v33, 0.0  ;;  %v2581_v42 = vpack.c.bf16 %v1453_v34, %v1453_v34  ;;  %v2645_v43 = vpack.c.bf16 %v1517_v35, %v1517_v35  ;;  %v1027_v44 = vpop.f32.mrf.mxu0  ;;  %v1283_v45 = vpop.f32.mrf.mxu1 }
 0x114   : > { %v2579_v46 = vpack.c.bf16 %v1451_v38, %v1451_v38  ;;  %v1456_v48 = vmax.f32 %v1036_v40, 0.0  ;;  %v1520_v49 = vmax.f32 %v1292_v41, 0.0  ;;  %v1028_v50 = vadd.f32 %v3186_v6, %v1027_v44 }
 0x115   : > { %v2643_v47 = vpack.c.bf16 %v1515_v39, %v1515_v39  ;;  %2094 = vst.msk [vmem:[%s3197_s28 + $0x6c] sm:$0xf] %vm2066_vm3, %v2581_v42  ;;  %2158 = vst.msk [vmem:[%s3197_s28 + $0x16c] sm:$0xf] %vm2066_vm3, %v2645_v43  ;;  %v1284_v51 = vadd.f32 %v3186_v6, %v1283_v45  ;;  %v2783_v52 = vpop.f32.mrf.mxu0  ;;  %v2847_v53 = vpop.f32.mrf.mxu1 }
 0x116   : > { %2092 = vst.msk [vmem:[%s3197_s28 + $0x64] sm:$0xf] %vm2066_vm3, %v2579_v46  ;;  %v2584_v54 = vpack.c.bf16 %v1456_v48, %v1456_v48  ;;  %v2648_v55 = vpack.c.bf16 %v1520_v49, %v1520_v49  ;;  %v1039_v56 = vadd.f32 %v2783_v52, %v3186_v6  ;;  %v1295_v57 = vadd.f32 %v2847_v53, %v3186_v6 }
 0x117   : > { %2156 = vst.msk [vmem:[%s3197_s28 + $0x164] sm:$0xf] %vm2066_vm3, %v2643_v47  ;;  %v1454_v58 = vmax.f32 %v1028_v50, 0.0  ;;  %v1518_v59 = vmax.f32 %v1284_v51, 0.0  ;;  %v1030_v60 = vpop.f32.mrf.mxu0  ;;  %v1286_v61 = vpop.f32.mrf.mxu1 }
 0x118   : > { %2097 = vst.msk [vmem:[%s3197_s28 + $0x78] sm:$0xf] %vm2066_vm3, %v2584_v54  ;;  %2161 = vst.msk [vmem:[%s3197_s28 + $0x178] sm:$0xf] %vm2066_vm3, %v2648_v55  ;;  %v1457_v62 = vmax.f32 %v1039_v56, 0.0  ;;  %v1521_v63 = vmax.f32 %v1295_v57, 0.0  ;;  %v1031_v0 = vadd.f32 %v3186_v6, %v1030_v60  ;;  %v1287_v1 = vadd.f32 %v3186_v6, %v1286_v61 }
 0x119   : > { %v2582_v2 = vpack.c.bf16 %v1454_v58, %v1454_v58  ;;  %v2646_v3 = vpack.c.bf16 %v1518_v59, %v1518_v59  ;;  %v2786_v4 = vpop.f32.mrf.mxu0  ;;  %v2850_v5 = vpop.f32.mrf.mxu1 }
 0x11a   : > { %v2585_v7 = vpack.c.bf16 %v1457_v62, %v1457_v62  ;;  %v2649_v8 = vpack.c.bf16 %v1521_v63, %v1521_v63  ;;  %v1455_v9 = vmax.f32 %v1031_v0, 0.0  ;;  %v1519_v10 = vmax.f32 %v1287_v1, 0.0 }
 0x11b   : > { %2095 = vst.msk [vmem:[%s3197_s28 + $0x70] sm:$0xf] %vm2066_vm3, %v2582_v2  ;;  %2159 = vst.msk [vmem:[%s3197_s28 + $0x170] sm:$0xf] %vm2066_vm3, %v2646_v3  ;;  %v1052_v11 = vadd.f32 %v2786_v4, %v3186_v6  ;;  %v1308_v12 = vadd.f32 %v2850_v5, %v3186_v6  ;;  %v1043_v13 = vpop.f32.mrf.mxu0  ;;  %v1299_v14 = vpop.f32.mrf.mxu1 }
 0x11c   : > { %2098 = vst.msk [vmem:[%s3197_s28 + $0x7c] sm:$0xf] %vm2066_vm3, %v2585_v7  ;;  %2162 = vst.msk [vmem:[%s3197_s28 + $0x17c] sm:$0xf] %vm2066_vm3, %v2649_v8  ;;  %v2583_v15 = vpack.c.bf16 %v1455_v9, %v1455_v9  ;;  %v2647_v16 = vpack.c.bf16 %v1519_v10, %v1519_v10  ;;  %v1044_v17 = vadd.f32 %v3186_v6, %v1043_v13 }
 0x11d   : > { %v1300_v18 = vadd.f32 %v3186_v6, %v1299_v14  ;;  %v1460_v19 = vmax.f32 %v1052_v11, 0.0  ;;  %v1524_v20 = vmax.f32 %v1308_v12, 0.0  ;;  %v2787_v21 = vpop.f32.mrf.mxu0  ;;  %v2851_v22 = vpop.f32.mrf.mxu1 }
 0x11e   : > { %2096 = vst.msk [vmem:[%s3197_s28 + $0x74] sm:$0xf] %vm2066_vm3, %v2583_v15  ;;  %2160 = vst.msk [vmem:[%s3197_s28 + $0x174] sm:$0xf] %vm2066_vm3, %v2647_v16  ;;  %v1458_v23 = vmax.f32 %v1044_v17, 0.0  ;;  %v1055_v25 = vadd.f32 %v2787_v21, %v3186_v6  ;;  %v1311_v26 = vadd.f32 %v2851_v22, %v3186_v6 }
 0x11f   : > { %v1522_v24 = vmax.f32 %v1300_v18, 0.0  ;;  %v2588_v27 = vpack.c.bf16 %v1460_v19, %v1460_v19  ;;  %v2652_v28 = vpack.c.bf16 %v1524_v20, %v1524_v20  ;;  %v1046_v29 = vpop.f32.mrf.mxu0  ;;  %v1302_v30 = vpop.f32.mrf.mxu1 }
 0x120   : > { %v2586_v31 = vpack.c.bf16 %v1458_v23, %v1458_v23  ;;  %v1461_v33 = vmax.f32 %v1055_v25, 0.0  ;;  %v1525_v34 = vmax.f32 %v1311_v26, 0.0  ;;  %v1047_v35 = vadd.f32 %v3186_v6, %v1046_v29 }
 0x121   : > { %v2650_v32 = vpack.c.bf16 %v1522_v24, %v1522_v24  ;;  %2101 = vst.msk [vmem:[%s3197_s28 + $0x88] sm:$0xf] %vm2066_vm3, %v2588_v27  ;;  %2165 = vst.msk [vmem:[%s3197_s28 + $0x188] sm:$0xf] %vm2066_vm3, %v2652_v28  ;;  %v1303_v36 = vadd.f32 %v3186_v6, %v1302_v30  ;;  %v2790_v37 = vpop.f32.mrf.mxu0  ;;  %v2854_v38 = vpop.f32.mrf.mxu1 }
 0x122   : > { %2099 = vst.msk [vmem:[%s3197_s28 + $0x80] sm:$0xf] %vm2066_vm3, %v2586_v31  ;;  %v2589_v39 = vpack.c.bf16 %v1461_v33, %v1461_v33  ;;  %v2653_v40 = vpack.c.bf16 %v1525_v34, %v1525_v34  ;;  %v1068_v41 = vadd.f32 %v2790_v37, %v3186_v6  ;;  %v1324_v42 = vadd.f32 %v2854_v38, %v3186_v6 }
 0x123   : > { %2163 = vst.msk [vmem:[%s3197_s28 + $0x180] sm:$0xf] %vm2066_vm3, %v2650_v32  ;;  %v1459_v43 = vmax.f32 %v1047_v35, 0.0  ;;  %v1523_v44 = vmax.f32 %v1303_v36, 0.0  ;;  %v1059_v45 = vpop.f32.mrf.mxu0  ;;  %v1315_v46 = vpop.f32.mrf.mxu1 }
 0x124   : > { %2102 = vst.msk [vmem:[%s3197_s28 + $0x8c] sm:$0xf] %vm2066_vm3, %v2589_v39  ;;  %2166 = vst.msk [vmem:[%s3197_s28 + $0x18c] sm:$0xf] %vm2066_vm3, %v2653_v40  ;;  %v1464_v47 = vmax.f32 %v1068_v41, 0.0  ;;  %v1528_v48 = vmax.f32 %v1324_v42, 0.0  ;;  %v1060_v49 = vadd.f32 %v3186_v6, %v1059_v45  ;;  %v1316_v50 = vadd.f32 %v3186_v6, %v1315_v46 }
 0x125   : > { %v2587_v51 = vpack.c.bf16 %v1459_v43, %v1459_v43  ;;  %v2651_v52 = vpack.c.bf16 %v1523_v44, %v1523_v44  ;;  %v2791_v53 = vpop.f32.mrf.mxu0  ;;  %v2855_v54 = vpop.f32.mrf.mxu1 }
 0x126   : > { %v2592_v55 = vpack.c.bf16 %v1464_v47, %v1464_v47  ;;  %v2656_v56 = vpack.c.bf16 %v1528_v48, %v1528_v48  ;;  %v1462_v57 = vmax.f32 %v1060_v49, 0.0  ;;  %v1526_v58 = vmax.f32 %v1316_v50, 0.0 }
 0x127   : > { %2100 = vst.msk [vmem:[%s3197_s28 + $0x84] sm:$0xf] %vm2066_vm3, %v2587_v51  ;;  %2164 = vst.msk [vmem:[%s3197_s28 + $0x184] sm:$0xf] %vm2066_vm3, %v2651_v52  ;;  %v1071_v59 = vadd.f32 %v2791_v53, %v3186_v6  ;;  %v1327_v60 = vadd.f32 %v2855_v54, %v3186_v6  ;;  %v1062_v61 = vpop.f32.mrf.mxu0  ;;  %v1318_v62 = vpop.f32.mrf.mxu1 }
 0x128   : > { %2105 = vst.msk [vmem:[%s3197_s28 + $0x98] sm:$0xf] %vm2066_vm3, %v2592_v55  ;;  %2169 = vst.msk [vmem:[%s3197_s28 + $0x198] sm:$0xf] %vm2066_vm3, %v2656_v56  ;;  %v2590_v63 = vpack.c.bf16 %v1462_v57, %v1462_v57  ;;  %v2654_v0 = vpack.c.bf16 %v1526_v58, %v1526_v58  ;;  %v1063_v1 = vadd.f32 %v3186_v6, %v1062_v61 }
 0x129   : > { %v1319_v2 = vadd.f32 %v3186_v6, %v1318_v62  ;;  %v1465_v3 = vmax.f32 %v1071_v59, 0.0  ;;  %v1529_v4 = vmax.f32 %v1327_v60, 0.0  ;;  %v2794_v5 = vpop.f32.mrf.mxu0  ;;  %v2858_v7 = vpop.f32.mrf.mxu1 }
 0x12a   : > { %2103 = vst.msk [vmem:[%s3197_s28 + $0x90] sm:$0xf] %vm2066_vm3, %v2590_v63  ;;  %2167 = vst.msk [vmem:[%s3197_s28 + $0x190] sm:$0xf] %vm2066_vm3, %v2654_v0  ;;  %v1463_v8 = vmax.f32 %v1063_v1, 0.0  ;;  %v1084_v10 = vadd.f32 %v2794_v5, %v3186_v6  ;;  %v1340_v11 = vadd.f32 %v2858_v7, %v3186_v6 }
 0x12b   : > { %v1527_v9 = vmax.f32 %v1319_v2, 0.0  ;;  %v2593_v12 = vpack.c.bf16 %v1465_v3, %v1465_v3  ;;  %v2657_v13 = vpack.c.bf16 %v1529_v4, %v1529_v4  ;;  %v1075_v14 = vpop.f32.mrf.mxu0  ;;  %v1331_v15 = vpop.f32.mrf.mxu1 }
 0x12c   : > { %v2591_v16 = vpack.c.bf16 %v1463_v8, %v1463_v8  ;;  %v1468_v18 = vmax.f32 %v1084_v10, 0.0  ;;  %v1532_v19 = vmax.f32 %v1340_v11, 0.0  ;;  %v1076_v20 = vadd.f32 %v3186_v6, %v1075_v14 }
 0x12d   : > { %v2655_v17 = vpack.c.bf16 %v1527_v9, %v1527_v9  ;;  %2106 = vst.msk [vmem:[%s3197_s28 + $0x9c] sm:$0xf] %vm2066_vm3, %v2593_v12  ;;  %2170 = vst.msk [vmem:[%s3197_s28 + $0x19c] sm:$0xf] %vm2066_vm3, %v2657_v13  ;;  %v1332_v21 = vadd.f32 %v3186_v6, %v1331_v15  ;;  %v2795_v22 = vpop.f32.mrf.mxu0  ;;  %v2859_v23 = vpop.f32.mrf.mxu1 }
 0x12e   : > { %2104 = vst.msk [vmem:[%s3197_s28 + $0x94] sm:$0xf] %vm2066_vm3, %v2591_v16  ;;  %v2596_v24 = vpack.c.bf16 %v1468_v18, %v1468_v18  ;;  %v2660_v25 = vpack.c.bf16 %v1532_v19, %v1532_v19  ;;  %v1087_v26 = vadd.f32 %v2795_v22, %v3186_v6  ;;  %v1343_v27 = vadd.f32 %v2859_v23, %v3186_v6 }
 0x12f   : > { %2168 = vst.msk [vmem:[%s3197_s28 + $0x194] sm:$0xf] %vm2066_vm3, %v2655_v17  ;;  %v1466_v28 = vmax.f32 %v1076_v20, 0.0  ;;  %v1530_v29 = vmax.f32 %v1332_v21, 0.0  ;;  %v1078_v30 = vpop.f32.mrf.mxu0  ;;  %v1334_v31 = vpop.f32.mrf.mxu1 }
 0x130   : > { %2109 = vst.msk [vmem:[%s3197_s28 + $0xa8] sm:$0xf] %vm2066_vm3, %v2596_v24  ;;  %2173 = vst.msk [vmem:[%s3197_s28 + $0x1a8] sm:$0xf] %vm2066_vm3, %v2660_v25  ;;  %v1469_v32 = vmax.f32 %v1087_v26, 0.0  ;;  %v1533_v33 = vmax.f32 %v1343_v27, 0.0  ;;  %v1079_v34 = vadd.f32 %v3186_v6, %v1078_v30  ;;  %v1335_v35 = vadd.f32 %v3186_v6, %v1334_v31 }
 0x131   : > { %v2594_v36 = vpack.c.bf16 %v1466_v28, %v1466_v28  ;;  %v2658_v37 = vpack.c.bf16 %v1530_v29, %v1530_v29  ;;  %v2798_v38 = vpop.f32.mrf.mxu0  ;;  %v2862_v39 = vpop.f32.mrf.mxu1 }
 0x132   : > { %v2597_v40 = vpack.c.bf16 %v1469_v32, %v1469_v32  ;;  %v2661_v41 = vpack.c.bf16 %v1533_v33, %v1533_v33  ;;  %v1467_v42 = vmax.f32 %v1079_v34, 0.0  ;;  %v1531_v43 = vmax.f32 %v1335_v35, 0.0 }
 0x133   : > { %2107 = vst.msk [vmem:[%s3197_s28 + $0xa0] sm:$0xf] %vm2066_vm3, %v2594_v36  ;;  %2171 = vst.msk [vmem:[%s3197_s28 + $0x1a0] sm:$0xf] %vm2066_vm3, %v2658_v37  ;;  %v1100_v44 = vadd.f32 %v2798_v38, %v3186_v6  ;;  %v1356_v45 = vadd.f32 %v2862_v39, %v3186_v6  ;;  %v1091_v46 = vpop.f32.mrf.mxu0  ;;  %v1347_v47 = vpop.f32.mrf.mxu1 }
 0x134   : > { %2110 = vst.msk [vmem:[%s3197_s28 + $0xac] sm:$0xf] %vm2066_vm3, %v2597_v40  ;;  %2174 = vst.msk [vmem:[%s3197_s28 + $0x1ac] sm:$0xf] %vm2066_vm3, %v2661_v41  ;;  %v2595_v48 = vpack.c.bf16 %v1467_v42, %v1467_v42  ;;  %v2659_v49 = vpack.c.bf16 %v1531_v43, %v1531_v43  ;;  %v1092_v50 = vadd.f32 %v3186_v6, %v1091_v46  ;;  %v3502_v43 = vld [vmem:[%s3595_s2] ss:$0 sm:$0xff] }
 0x135   : > { %v1348_v51 = vadd.f32 %v3186_v6, %v1347_v47  ;;  %v1472_v52 = vmax.f32 %v1100_v44, 0.0  ;;  %v1536_v53 = vmax.f32 %v1356_v45, 0.0  ;;  %v2799_v54 = vpop.f32.mrf.mxu0  ;;  %v2863_v55 = vpop.f32.mrf.mxu1 }
 0x136   : > { %2108 = vst.msk [vmem:[%s3197_s28 + $0xa4] sm:$0xf] %vm2066_vm3, %v2595_v48  ;;  %2172 = vst.msk [vmem:[%s3197_s28 + $0x1a4] sm:$0xf] %vm2066_vm3, %v2659_v49  ;;  %v1470_v56 = vmax.f32 %v1092_v50, 0.0  ;;  %v1103_v58 = vadd.f32 %v2799_v54, %v3186_v6  ;;  %v1359_v59 = vadd.f32 %v2863_v55, %v3186_v6 }
 0x137   : > { %v1534_v57 = vmax.f32 %v1348_v51, 0.0  ;;  %v2600_v60 = vpack.c.bf16 %v1472_v52, %v1472_v52  ;;  %v2664_v61 = vpack.c.bf16 %v1536_v53, %v1536_v53  ;;  %v1094_v62 = vpop.f32.mrf.mxu0  ;;  %v1350_v63 = vpop.f32.mrf.mxu1 }
 0x138   : > { %v2598_v0 = vpack.c.bf16 %v1470_v56, %v1470_v56  ;;  %v1473_v2 = vmax.f32 %v1103_v58, 0.0  ;;  %v1537_v3 = vmax.f32 %v1359_v59, 0.0  ;;  %v1095_v4 = vadd.f32 %v3186_v6, %v1094_v62 }
 0x139   : > { %v2662_v1 = vpack.c.bf16 %v1534_v57, %v1534_v57  ;;  %2113 = vst.msk [vmem:[%s3197_s28 + $0xb8] sm:$0xf] %vm2066_vm3, %v2600_v60  ;;  %2177 = vst.msk [vmem:[%s3197_s28 + $0x1b8] sm:$0xf] %vm2066_vm3, %v2664_v61  ;;  %v1351_v5 = vadd.f32 %v3186_v6, %v1350_v63  ;;  %v2802_v7 = vpop.f32.mrf.mxu0  ;;  %v2866_v8 = vpop.f32.mrf.mxu1 }
 0x13a   : > { %2111 = vst.msk [vmem:[%s3197_s28 + $0xb0] sm:$0xf] %vm2066_vm3, %v2598_v0  ;;  %v2601_v9 = vpack.c.bf16 %v1473_v2, %v1473_v2  ;;  %v2665_v10 = vpack.c.bf16 %v1537_v3, %v1537_v3  ;;  %v1116_v11 = vadd.f32 %v2802_v7, %v3186_v6  ;;  %v1372_v12 = vadd.f32 %v2866_v8, %v3186_v6 }
 0x13b   : > { %2175 = vst.msk [vmem:[%s3197_s28 + $0x1b0] sm:$0xf] %vm2066_vm3, %v2662_v1  ;;  %v1471_v13 = vmax.f32 %v1095_v4, 0.0  ;;  %v1535_v14 = vmax.f32 %v1351_v5, 0.0  ;;  %v1107_v15 = vpop.f32.mrf.mxu0  ;;  %v1363_v16 = vpop.f32.mrf.mxu1 }
 0x13c   : > { %2114 = vst.msk [vmem:[%s3197_s28 + $0xbc] sm:$0xf] %vm2066_vm3, %v2601_v9  ;;  %2178 = vst.msk [vmem:[%s3197_s28 + $0x1bc] sm:$0xf] %vm2066_vm3, %v2665_v10  ;;  %v1476_v17 = vmax.f32 %v1116_v11, 0.0  ;;  %v1540_v18 = vmax.f32 %v1372_v12, 0.0  ;;  %v1108_v19 = vadd.f32 %v3186_v6, %v1107_v15  ;;  %v1364_v20 = vadd.f32 %v3186_v6, %v1363_v16 }
 0x13d   : > { %v2599_v21 = vpack.c.bf16 %v1471_v13, %v1471_v13  ;;  %v2663_v22 = vpack.c.bf16 %v1535_v14, %v1535_v14  ;;  %v2803_v23 = vpop.f32.mrf.mxu0  ;;  %v2867_v24 = vpop.f32.mrf.mxu1 }
 0x13e   : > { %v2604_v25 = vpack.c.bf16 %v1476_v17, %v1476_v17  ;;  %v2668_v26 = vpack.c.bf16 %v1540_v18, %v1540_v18  ;;  %v1474_v27 = vmax.f32 %v1108_v19, 0.0  ;;  %v1538_v28 = vmax.f32 %v1364_v20, 0.0 }
 0x13f   : > { %2112 = vst.msk [vmem:[%s3197_s28 + $0xb4] sm:$0xf] %vm2066_vm3, %v2599_v21  ;;  %2176 = vst.msk [vmem:[%s3197_s28 + $0x1b4] sm:$0xf] %vm2066_vm3, %v2663_v22  ;;  %v1119_v29 = vadd.f32 %v2803_v23, %v3186_v6  ;;  %v1375_v30 = vadd.f32 %v2867_v24, %v3186_v6  ;;  %v1110_v31 = vpop.f32.mrf.mxu0  ;;  %v1366_v32 = vpop.f32.mrf.mxu1 }
 0x140   : > { %2117 = vst.msk [vmem:[%s3197_s28 + $0xc8] sm:$0xf] %vm2066_vm3, %v2604_v25  ;;  %2181 = vst.msk [vmem:[%s3197_s28 + $0x1c8] sm:$0xf] %vm2066_vm3, %v2668_v26  ;;  %v2602_v33 = vpack.c.bf16 %v1474_v27, %v1474_v27  ;;  %v2666_v34 = vpack.c.bf16 %v1538_v28, %v1538_v28  ;;  %v1111_v35 = vadd.f32 %v3186_v6, %v1110_v31 }
 0x141   : > { %v1367_v36 = vadd.f32 %v3186_v6, %v1366_v32  ;;  %v1477_v37 = vmax.f32 %v1119_v29, 0.0  ;;  %v1541_v38 = vmax.f32 %v1375_v30, 0.0  ;;  %v2806_v39 = vpop.f32.mrf.mxu0  ;;  %v2870_v40 = vpop.f32.mrf.mxu1 }
 0x142   : > { %2115 = vst.msk [vmem:[%s3197_s28 + $0xc0] sm:$0xf] %vm2066_vm3, %v2602_v33  ;;  %2179 = vst.msk [vmem:[%s3197_s28 + $0x1c0] sm:$0xf] %vm2066_vm3, %v2666_v34  ;;  %v1475_v41 = vmax.f32 %v1111_v35, 0.0  ;;  %v1132_v44 = vadd.f32 %v3502_v43, %v2806_v39  ;;  %v1388_v6 = vadd.f32 %v3502_v43, %v2870_v40 }
 0x143   : > { %v1539_v42 = vmax.f32 %v1367_v36, 0.0  ;;  %v2605_v45 = vpack.c.bf16 %v1477_v37, %v1477_v37  ;;  %v2669_v46 = vpack.c.bf16 %v1541_v38, %v1541_v38  ;;  %v1123_v47 = vpop.f32.mrf.mxu0  ;;  %v1379_v48 = vpop.f32.mrf.mxu1 }
 0x144   : > { %v2603_v49 = vpack.c.bf16 %v1475_v41, %v1475_v41  ;;  %v1480_v51 = vmax.f32 %v1132_v44, 0.0  ;;  %v1544_v52 = vmax.f32 %v1388_v6, 0.0  ;;  %v1124_v53 = vadd.f32 %v3502_v43, %v1123_v47 }
 0x145   : > { %v2667_v50 = vpack.c.bf16 %v1539_v42, %v1539_v42  ;;  %2118 = vst.msk [vmem:[%s3197_s28 + $0xcc] sm:$0xf] %vm2066_vm3, %v2605_v45  ;;  %2182 = vst.msk [vmem:[%s3197_s28 + $0x1cc] sm:$0xf] %vm2066_vm3, %v2669_v46  ;;  %v1380_v54 = vadd.f32 %v3502_v43, %v1379_v48  ;;  %v2807_v55 = vpop.f32.mrf.mxu0  ;;  %v2871_v56 = vpop.f32.mrf.mxu1 }
 0x146   : > { %2116 = vst.msk [vmem:[%s3197_s28 + $0xc4] sm:$0xf] %vm2066_vm3, %v2603_v49  ;;  %v2608_v57 = vpack.c.bf16 %v1480_v51, %v1480_v51  ;;  %v2672_v58 = vpack.c.bf16 %v1544_v52, %v1544_v52  ;;  %v1135_v59 = vadd.f32 %v3502_v43, %v2807_v55  ;;  %v1391_v60 = vadd.f32 %v3502_v43, %v2871_v56 }
 0x147   : > { %2180 = vst.msk [vmem:[%s3197_s28 + $0x1c4] sm:$0xf] %vm2066_vm3, %v2667_v50  ;;  %v1478_v61 = vmax.f32 %v1124_v53, 0.0  ;;  %v1542_v62 = vmax.f32 %v1380_v54, 0.0  ;;  %v1126_v63 = vpop.f32.mrf.mxu0  ;;  %v1382_v0 = vpop.f32.mrf.mxu1 }
 0x148   : > { %2121 = vst.msk [vmem:[%s3197_s28 + $0xd8] sm:$0xf] %vm2066_vm3, %v2608_v57  ;;  %2185 = vst.msk [vmem:[%s3197_s28 + $0x1d8] sm:$0xf] %vm2066_vm3, %v2672_v58  ;;  %v1481_v1 = vmax.f32 %v1135_v59, 0.0  ;;  %v1545_v2 = vmax.f32 %v1391_v60, 0.0  ;;  %v1127_v3 = vadd.f32 %v3502_v43, %v1126_v63  ;;  %v1383_v4 = vadd.f32 %v3502_v43, %v1382_v0 }
 0x149   : > { %v2606_v5 = vpack.c.bf16 %v1478_v61, %v1478_v61  ;;  %v2670_v7 = vpack.c.bf16 %v1542_v62, %v1542_v62  ;;  %v2810_v8 = vpop.f32.mrf.mxu0  ;;  %v2874_v9 = vpop.f32.mrf.mxu1 }
 0x14a   : > { %v2609_v10 = vpack.c.bf16 %v1481_v1, %v1481_v1  ;;  %v2673_v11 = vpack.c.bf16 %v1545_v2, %v1545_v2  ;;  %v1479_v12 = vmax.f32 %v1127_v3, 0.0  ;;  %v1543_v13 = vmax.f32 %v1383_v4, 0.0 }
 0x14b   : > { %2119 = vst.msk [vmem:[%s3197_s28 + $0xd0] sm:$0xf] %vm2066_vm3, %v2606_v5  ;;  %2183 = vst.msk [vmem:[%s3197_s28 + $0x1d0] sm:$0xf] %vm2066_vm3, %v2670_v7  ;;  %v1148_v14 = vadd.f32 %v3502_v43, %v2810_v8  ;;  %v1404_v15 = vadd.f32 %v3502_v43, %v2874_v9  ;;  %v1139_v16 = vpop.f32.mrf.mxu0  ;;  %v1395_v17 = vpop.f32.mrf.mxu1 }
 0x14c   : > { %2122 = vst.msk [vmem:[%s3197_s28 + $0xdc] sm:$0xf] %vm2066_vm3, %v2609_v10  ;;  %2186 = vst.msk [vmem:[%s3197_s28 + $0x1dc] sm:$0xf] %vm2066_vm3, %v2673_v11  ;;  %v2607_v18 = vpack.c.bf16 %v1479_v12, %v1479_v12  ;;  %v2671_v19 = vpack.c.bf16 %v1543_v13, %v1543_v13  ;;  %v1140_v20 = vadd.f32 %v3502_v43, %v1139_v16 }
 0x14d   : > { %v1396_v21 = vadd.f32 %v3502_v43, %v1395_v17  ;;  %v1484_v22 = vmax.f32 %v1148_v14, 0.0  ;;  %v1548_v23 = vmax.f32 %v1404_v15, 0.0  ;;  %v2811_v24 = vpop.f32.mrf.mxu0  ;;  %v2875_v25 = vpop.f32.mrf.mxu1 }
 0x14e   : > { %2120 = vst.msk [vmem:[%s3197_s28 + $0xd4] sm:$0xf] %vm2066_vm3, %v2607_v18  ;;  %2184 = vst.msk [vmem:[%s3197_s28 + $0x1d4] sm:$0xf] %vm2066_vm3, %v2671_v19  ;;  %v1482_v26 = vmax.f32 %v1140_v20, 0.0  ;;  %v1151_v28 = vadd.f32 %v3502_v43, %v2811_v24  ;;  %v1407_v29 = vadd.f32 %v3502_v43, %v2875_v25 }
 0x14f   : > { %v1546_v27 = vmax.f32 %v1396_v21, 0.0  ;;  %v2612_v30 = vpack.c.bf16 %v1484_v22, %v1484_v22  ;;  %v2676_v31 = vpack.c.bf16 %v1548_v23, %v1548_v23  ;;  %v1142_v32 = vpop.f32.mrf.mxu0  ;;  %v1398_v33 = vpop.f32.mrf.mxu1 }
 0x150   : > { %v2610_v34 = vpack.c.bf16 %v1482_v26, %v1482_v26  ;;  %v1485_v36 = vmax.f32 %v1151_v28, 0.0  ;;  %v1549_v37 = vmax.f32 %v1407_v29, 0.0  ;;  %v1143_v38 = vadd.f32 %v3502_v43, %v1142_v32 }
 0x151   : > { %v2674_v35 = vpack.c.bf16 %v1546_v27, %v1546_v27  ;;  %2125 = vst.msk [vmem:[%s3197_s28 + $0xe8] sm:$0xf] %vm2066_vm3, %v2612_v30  ;;  %2189 = vst.msk [vmem:[%s3197_s28 + $0x1e8] sm:$0xf] %vm2066_vm3, %v2676_v31  ;;  %v1399_v39 = vadd.f32 %v3502_v43, %v1398_v33  ;;  %v2814_v40 = vpop.f32.mrf.mxu0  ;;  %v2878_v41 = vpop.f32.mrf.mxu1 }
 0x152   : > { %2123 = vst.msk [vmem:[%s3197_s28 + $0xe0] sm:$0xf] %vm2066_vm3, %v2610_v34  ;;  %v2613_v42 = vpack.c.bf16 %v1485_v36, %v1485_v36  ;;  %v2677_v44 = vpack.c.bf16 %v1549_v37, %v1549_v37  ;;  %v1164_v6 = vadd.f32 %v3502_v43, %v2814_v40  ;;  %v1420_v45 = vadd.f32 %v3502_v43, %v2878_v41 }
 0x153   : > { %2187 = vst.msk [vmem:[%s3197_s28 + $0x1e0] sm:$0xf] %vm2066_vm3, %v2674_v35  ;;  %v1483_v46 = vmax.f32 %v1143_v38, 0.0  ;;  %v1547_v47 = vmax.f32 %v1399_v39, 0.0  ;;  %v1155_v48 = vpop.f32.mrf.mxu0  ;;  %v1411_v49 = vpop.f32.mrf.mxu1 }
 0x154   : > { %2126 = vst.msk [vmem:[%s3197_s28 + $0xec] sm:$0xf] %vm2066_vm3, %v2613_v42  ;;  %2190 = vst.msk [vmem:[%s3197_s28 + $0x1ec] sm:$0xf] %vm2066_vm3, %v2677_v44  ;;  %v1488_v50 = vmax.f32 %v1164_v6, 0.0  ;;  %v1552_v51 = vmax.f32 %v1420_v45, 0.0  ;;  %v1156_v52 = vadd.f32 %v3502_v43, %v1155_v48  ;;  %v1412_v53 = vadd.f32 %v3502_v43, %v1411_v49 }
 0x155   : > { %v2611_v54 = vpack.c.bf16 %v1483_v46, %v1483_v46  ;;  %v2675_v55 = vpack.c.bf16 %v1547_v47, %v1547_v47  ;;  %v2815_v56 = vpop.f32.mrf.mxu0  ;;  %v2879_v57 = vpop.f32.mrf.mxu1 }
 0x156   : > { %v2616_v58 = vpack.c.bf16 %v1488_v50, %v1488_v50  ;;  %v2680_v59 = vpack.c.bf16 %v1552_v51, %v1552_v51  ;;  %v1486_v60 = vmax.f32 %v1156_v52, 0.0  ;;  %v1550_v61 = vmax.f32 %v1412_v53, 0.0 }
 0x157   : > { %2124 = vst.msk [vmem:[%s3197_s28 + $0xe4] sm:$0xf] %vm2066_vm3, %v2611_v54  ;;  %2188 = vst.msk [vmem:[%s3197_s28 + $0x1e4] sm:$0xf] %vm2066_vm3, %v2675_v55  ;;  %v1167_v62 = vadd.f32 %v3502_v43, %v2815_v56  ;;  %v1423_v63 = vadd.f32 %v3502_v43, %v2879_v57  ;;  %v1158_v0 = vpop.f32.mrf.mxu0  ;;  %v1414_v1 = vpop.f32.mrf.mxu1 }
 0x158   : > { %2129 = vst.msk [vmem:[%s3197_s28 + $0xf8] sm:$0xf] %vm2066_vm3, %v2616_v58  ;;  %2193 = vst.msk [vmem:[%s3197_s28 + $0x1f8] sm:$0xf] %vm2066_vm3, %v2680_v59  ;;  %v2614_v2 = vpack.c.bf16 %v1486_v60, %v1486_v60  ;;  %v2678_v3 = vpack.c.bf16 %v1550_v61, %v1550_v61  ;;  %v1159_v4 = vadd.f32 %v3502_v43, %v1158_v0 }
 0x159   : > { %v1415_v5 = vadd.f32 %v3502_v43, %v1414_v1  ;;  %v1489_v7 = vmax.f32 %v1167_v62, 0.0  ;;  %v1553_v8 = vmax.f32 %v1423_v63, 0.0 }
 0x15a   : > { %2127 = vst.msk [vmem:[%s3197_s28 + $0xf0] sm:$0xf] %vm2066_vm3, %v2614_v2  ;;  %2191 = vst.msk [vmem:[%s3197_s28 + $0x1f0] sm:$0xf] %vm2066_vm3, %v2678_v3  ;;  %v1487_v9 = vmax.f32 %v1159_v4, 0.0 }
 0x15b   : > { %v1551_v10 = vmax.f32 %v1415_v5, 0.0  ;;  %v2617_v11 = vpack.c.bf16 %v1489_v7, %v1489_v7  ;;  %v2681_v12 = vpack.c.bf16 %v1553_v8, %v1553_v8 }
 0x15c   : > { %v2615_v13 = vpack.c.bf16 %v1487_v9, %v1487_v9 }
 0x15d   : > { %v2679_v14 = vpack.c.bf16 %v1551_v10, %v1551_v10  ;;  %2130 = vst.msk [vmem:[%s3197_s28 + $0xfc] sm:$0xf] %vm2066_vm3, %v2617_v11  ;;  %2194 = vst.msk [vmem:[%s3197_s28 + $0x1fc] sm:$0xf] %vm2066_vm3, %v2681_v12 }
 0x15e   : > { %2128 = vst.msk [vmem:[%s3197_s28 + $0xf4] sm:$0xf] %vm2066_vm3, %v2615_v13 }
 0x15f   : > { %2192 = vst.msk [vmem:[%s3197_s28 + $0x1f4] sm:$0xf] %vm2066_vm3, %v2679_v14 }
 0x160 PF: > { %s13_s14 = sadd.s32 1, %s2998_s14   ;;  %s3597_s12 = smov %s2994_s13 }
 0x161   : > { %p10_p5 = scmp.ge.s32.totalorder %s13_s14, 4   ;;  %s3598_s13 = smov %s3600_s15 }
 0x163   :  { %12 = sbr.rel (!%p10_p5) target bundleno = 2 (0x2), region = 62 }

// kernel: latent_encoder_forward.5
= control target key start
LH: loop header
LB: loop body
LE: loop exit
PB: predicated region body
PF: predicated region fallthrough
CT: control target
= control target key end

     0   :  { %s1524_s9 = smov 0   ;;  %s1526_s10 = smov 0   ;;  %s2126_s0 = inlined_call_operand.vmem [shape: bf16[2,256,72], index: 0, kind: input, shape index: {}]   ;;  %s2127_s1 = inlined_call_operand.vmem [shape: bf16[72,16], index: 1, kind: input, shape index: {}]   ;;  %s2128_s2 = inlined_call_operand.vmem [shape: bf16[2,256,16], index: 2, kind: output, shape index: {}]  }
   0x1   :  { %s1528_s11 = smov 0   ;;  %s1530_s12 = smov 0  }
   0x2   :  { %s1532_s13 = smov 0  }
   0x3 LB: > { %s27_s14 = sadd.s32 1, %s1498_s11  ;;  %s31_s15 = sadd.s32 1, %s1502_s12  ;;  %s1506_s13 = sphi %s1532_s13, %s12_s13   ;;  %s1502_s12 = sphi %s1530_s12, %s2140_s12   ;;  %s1498_s11 = sphi %s1528_s11, %s2139_s11   ;;  %s1494_s10 = sphi %s1526_s10, %s2138_s10   ;;  %s1490_s9 = sphi %s1524_s9, %s2137_s9  }
   0x4   : > { %p29_p0 = scmp.ge.s32.totalorder %s27_s14, 2  ;;  %p1215_p1 = scmp.ge.s32.totalorder %s1506_s13, 1 }
   0x5   : > { %p150_p2 = scmp.lt.s32.totalorder %s1506_s13, 5 }
   0x6   : > { %s2142_s14 = smov (%p29_p0, %s27_s14), 0  ;;  %s2144_s15 = smov (!%p29_p0, %s31_s15), %s1502_s12 }
   0x7   : > { %p151_p3 = pnand %p1215_p1, %p150_p2  ;;  %p33_p4 = scmp.ge.s32.totalorder %s2144_s15, 2 }
   0x8   : > { %p186_p5 = scmp.lt.s32.totalorder (!%p151_p3), %s1494_s10, 1  ;;  %p210_p6 = scmp.eq.s32.totalorder (!%p151_p3), %s1490_s9, 0 }
   0x9   : > { %s2146_s15 = smov (%p33_p4, %s2144_s15), 0  ;;  %154 = sbr.rel (%p151_p3) target bundleno = 389 (0x185), region = 28 }
   0xe   : > { %s2148_s10 = smov (!%p186_p5, %s1494_s10), 1  ;;  %215 = sbr.rel (!%p210_p6) target bundleno = 19 (0x13), region = 32  ;;  %vm216_vm0 = vcmask (%p210_p6), 122880   ;;  %v1508_v0 = vmov (%p210_p6), 0.0  }
   0xf   : > { %s1294_s16 = sshll.u32 %s2148_s10, 7  ;;  %217 = vst.msk [vmem:[#allocation3] sm:$0x1] (%p210_p6), %vm216_vm0, %v1508_v0  ;;  %218 = vst.msk [vmem:[#allocation4] sm:$0x1] (%p210_p6), %vm216_vm0, %v1508_v0 }
  0x10   : > { %s1560_s19 = scalar_lea.vmem %s2126_s0, %s1294_s16  ;;  %s1565_s22 = scalar_lea.vmem %s2128_s2, %s1294_s16 }
  0x13 PF: > { %p1221_p7 = scmp.ne.s32.totalorder %s1490_s9, 0 }
  0x15   : > { %221 = sbr.rel (%p1221_p7) target bundleno = 326 (0x146), region = 36 }
  0x1a   : > { %v1445_v1 = vld [vmem:[%s2127_s1 + $0x20] ss:$0 sps:$4 sm:$0xff]   ;;  %vm419_vm1 = vcmask 1043456   ;;  %v1446_v2 = vld [vmem:[%s2127_s1 + $0x18] sm:$0xff]   ;;  %v1447_v4 = vld [vmem:[%s2127_s1 + $0x10] sm:$0xff]   ;;  %vm370_vm2 = vcmask 588800  }
  0x1b   : > { %1402 = vmatprep.subr.msk.bf16.mxu0 %vm419_vm1, %v1445_v1  ;;  %v421_v3 = vsel %vm419_vm1, %v1445_v1, 0  ;;  %1403 = vmatprep.subr.msk.bf16.mxu1 %vm419_vm1, %v1445_v1  ;;  %v1450_v5 = vld [vmem:[%s1560_s19] sm:$0xff]   ;;  %v1448_v6 = vld [vmem:[%s2127_s1 + $0x8] sm:$0xff]   ;;  %v1452_v10 = vld [vmem:[%s1560_s19 + $0x10] sm:$0xff]   ;;  %vm586_vm3 = vcmask 130048   ;;  %vm690_vm4 = vcmask 122880  }
  0x1c   : > { %1351 = vmatpush3.bf16.msra.mxu0 %v421_v3  ;;  %1397 = vmatpush3.bf16.msra.mxu1 %v421_v3  ;;  %v1449_v7 = vld [vmem:[%s2127_s1] sm:$0xff]   ;;  %v1451_v9 = vld [vmem:[%s1560_s19 + $0x8] sm:$0xff]   ;;  %v1460_v12 = vld [vmem:[%s1560_s19 + $0x50] sm:$0xff]  }
  0x1d   : > { %1352 = vmatprep.subr.bf16.mxu0 %v1446_v2  ;;  %1393 = vmatprep.subr.bf16.mxu1 %v1446_v2  ;;  %v1458_v8 = vld [vmem:[%s1560_s19 + $0x40] sm:$0xff]   ;;  %v1459_v11 = vld [vmem:[%s1560_s19 + $0x48] sm:$0xff]   ;;  %v1453_v13 = vld [vmem:[%s1560_s19 + $0x18] sm:$0xff]  }
  0x1e   : > { %1360 = vmatprep.mubr.msk.bf16.mxu0 %vm370_vm2, %v1450_v5  ;;  %1376 = vmatprep.mubr.msk.bf16.mxu1 %vm370_vm2, %v1458_v8  ;;  %v1454_v14 = vld [vmem:[%s1560_s19 + $0x20] sm:$0xff]   ;;  %v1461_v15 = vld [vmem:[%s1560_s19 + $0x58] sm:$0xff]   ;;  %v1455_v17 = vld [vmem:[%s1560_s19 + $0x28] sm:$0xff]  }
  0x1f   : > { %v1462_v16 = vld [vmem:[%s1560_s19 + $0x60] sm:$0xff]   ;;  %v1456_v18 = vld [vmem:[%s1560_s19 + $0x30] sm:$0xff]   ;;  %v1463_v19 = vld [vmem:[%s1560_s19 + $0x68] sm:$0xff]  }
  0x20   : > { %1353 = vmatpush3.bf16.msra.mxu0 %v1446_v2  ;;  %1398 = vmatpush3.bf16.msra.mxu1 %v1446_v2  ;;  %v1464_v20 = vld [vmem:[%s1560_s19 + $0x70] sm:$0xff]   ;;  %v1457_v21 = vld [vmem:[%s1560_s19 + $0x38] sm:$0xff]  }
  0x21   : > { %1354 = vmatprep.subr.bf16.mxu0 %v1447_v4  ;;  %1394 = vmatprep.subr.bf16.mxu1 %v1447_v4  ;;  %v1465_v22 = vld [vmem:[%s1560_s19 + $0x78] sm:$0xff]  }
  0x24   : > { %1355 = vmatpush3.bf16.msra.mxu0 %v1447_v4  ;;  %1399 = vmatpush3.bf16.msra.mxu1 %v1447_v4 }
  0x25   : > { %1356 = vmatprep.subr.bf16.mxu0 %v1448_v6  ;;  %1395 = vmatprep.subr.bf16.mxu1 %v1448_v6 }
  0x28   : > { %1357 = vmatpush3.bf16.msra.mxu0 %v1448_v6  ;;  %1400 = vmatpush3.bf16.msra.mxu1 %v1448_v6 }
  0x29   : > { %1358 = vmatprep.subr.bf16.mxu0 %v1449_v7  ;;  %1396 = vmatprep.subr.bf16.mxu1 %v1449_v7 }
  0x2c   : > { %1359 = vmatpush3.bf16.msra.mxu0 %v1449_v7  ;;  %1401 = vmatpush3.bf16.msra.mxu1 %v1449_v7 }
  0x2f   : > { %1361 = vmatmul.mubr.msk.bf16.vlgmr.msra.gmra.mxu0 %vm370_vm2, %v1451_v9  ;;  %1377 = vmatmul.mubr.msk.bf16.vlgmr.msra.gmra.mxu1 %vm370_vm2, %v1459_v11 }
  0x30   : > { %1364 = vmatprep.mubr.msk.bf16.mxu0 %vm370_vm2, %v1452_v10  ;;  %1380 = vmatprep.mubr.msk.bf16.mxu1 %vm370_vm2, %v1460_v12 }
  0x37   : > { %1365 = vmatmul.mubr.msk.bf16.gmra.mxu0 %vm370_vm2, %v1453_v13  ;;  %1381 = vmatmul.mubr.msk.bf16.gmra.mxu1 %vm370_vm2, %v1461_v15 }
  0x38   : > { %1368 = vmatprep.mubr.msk.bf16.mxu0 %vm370_vm2, %v1454_v14  ;;  %1384 = vmatprep.mubr.msk.bf16.mxu1 %vm370_vm2, %v1462_v16 }
  0x3f   : > { %1369 = vmatmul.mubr.msk.bf16.gmra.mxu0 %vm370_vm2, %v1455_v17  ;;  %1385 = vmatmul.mubr.msk.bf16.gmra.mxu1 %vm370_vm2, %v1463_v19 }
  0x40   : > { %1372 = vmatprep.mubr.msk.bf16.mxu0 %vm370_vm2, %v1456_v18  ;;  %1388 = vmatprep.mubr.msk.bf16.mxu1 %vm370_vm2, %v1464_v20 }
  0x47   : > { %1373 = vmatmul.mubr.msk.bf16.gmra.mxu0 %vm370_vm2, %v1457_v21  ;;  %1389 = vmatmul.mubr.msk.bf16.gmra.mxu1 %vm370_vm2, %v1465_v22 }
  0xef   : > { %v1362_v23 = vpop.f32.mrf.mxu0  ;;  %v1616_v24 = vpop.f32.mrf.mxu1 }
  0xf0   : > { %589 = vst.msk [vmem:[#allocation2 + $0x10] sm:$0xff] %vm586_vm3, %v1362_v23  ;;  %605 = vst.msk [vmem:[#allocation2 + $0x90] sm:$0xff] %vm586_vm3, %v1616_v24  ;;  %v695_v31 = vmul.f32 %v1362_v23, %v1362_v23  ;;  %v623_v38 = vsel %vm586_vm3, %v1362_v23, 0.0 }
  0xf1   : > { %v457_v25 = vpop.f32.mrf.mxu0  ;;  %v1621_v26 = vpop.f32.mrf.mxu1 }
  0xf2   : > { %587 = vst.msk [vmem:[#allocation2] sm:$0xff] %vm586_vm3, %v457_v25  ;;  %603 = vst.msk [vmem:[#allocation2 + $0x80] sm:$0xff] %vm586_vm3, %v1621_v26  ;;  %v693_v28 = vmul.f32 %v457_v25, %v457_v25  ;;  %v620_v32 = vsel %vm586_vm3, %v457_v25, 0.0  ;;  %v728_v46 = vsel %vm586_vm3, %v695_v31, 0.0 }
  0xf3   : > { %v1363_v27 = vpop.f32.mrf.mxu0  ;;  %v1626_v29 = vpop.f32.mrf.mxu1 }
  0xf4   : > { %590 = vst.msk [vmem:[#allocation2 + $0x18] sm:$0xff] %vm586_vm3, %v1363_v27  ;;  %606 = vst.msk [vmem:[#allocation2 + $0x98] sm:$0xff] %vm586_vm3, %v1626_v29  ;;  %v725_v39 = vsel %vm586_vm3, %v693_v28, 0.0  ;;  %v696_v40 = vmul.f32 %v1363_v27, %v1363_v27  ;;  %v625_v47 = vsel %vm586_vm3, %v1363_v27, 0.0 }
  0xf5   : > { %v460_v30 = vpop.f32.mrf.mxu0  ;;  %v1633_v35 = vpop.f32.mrf.mxu1 }
  0xf6   : > { %588 = vst.msk [vmem:[#allocation2 + $0x8] sm:$0xff] %vm586_vm3, %v460_v30  ;;  %v621_v33 = vsel %vm586_vm3, %v460_v30, 0.0  ;;  %v694_v34 = vmul.f32 %v460_v30, %v460_v30  ;;  %604 = vst.msk [vmem:[#allocation2 + $0x88] sm:$0xff] %vm586_vm3, %v1633_v35  ;;  %v730_v53 = vsel %vm586_vm3, %v696_v40, 0.0 }
  0xf7   : > { %v622_v36 = vadd.f32 %v621_v33, %v620_v32  ;;  %v1366_v37 = vpop.f32.mrf.mxu0  ;;  %v1641_v42 = vpop.f32.mrf.mxu1 }
  0xf8   : > { %v726_v41 = vsel %vm586_vm3, %v694_v34, 0.0  ;;  %593 = vst.msk [vmem:[#allocation2 + $0x30] sm:$0xff] %vm586_vm3, %v1366_v37  ;;  %609 = vst.msk [vmem:[#allocation2 + $0xb0] sm:$0xff] %vm586_vm3, %v1641_v42  ;;  %v699_v59 = vmul.f32 %v1366_v37, %v1366_v37  ;;  %v631_v3 = vsel %vm586_vm3, %v1366_v37, 0.0 }
  0xf9   : > { %v624_v43 = vadd.f32 %v623_v38, %v622_v36  ;;  %v727_v44 = vadd.f32 %v726_v41, %v725_v39  ;;  %v473_v45 = vpop.f32.mrf.mxu0  ;;  %v1648_v49 = vpop.f32.mrf.mxu1 }
  0xfa   : > { %591 = vst.msk [vmem:[#allocation2 + $0x20] sm:$0xff] %vm586_vm3, %v473_v45  ;;  %v697_v48 = vmul.f32 %v473_v45, %v473_v45  ;;  %607 = vst.msk [vmem:[#allocation2 + $0xa0] sm:$0xff] %vm586_vm3, %v1648_v49  ;;  %v627_v54 = vsel %vm586_vm3, %v473_v45, 0.0  ;;  %v736_v10 = vsel %vm586_vm3, %v699_v59, 0.0 }
  0xfb   : > { %v729_v50 = vadd.f32 %v728_v46, %v727_v44  ;;  %v626_v51 = vadd.f32 %v625_v47, %v624_v43  ;;  %v1367_v52 = vpop.f32.mrf.mxu0  ;;  %v1655_v55 = vpop.f32.mrf.mxu1 }
  0xfc   : > { %594 = vst.msk [vmem:[#allocation2 + $0x38] sm:$0xff] %vm586_vm3, %v1367_v52  ;;  %610 = vst.msk [vmem:[#allocation2 + $0xb8] sm:$0xff] %vm586_vm3, %v1655_v55  ;;  %v732_v60 = vsel %vm586_vm3, %v697_v48, 0.0  ;;  %v700_v4 = vmul.f32 %v1367_v52, %v1367_v52  ;;  %v633_v11 = vsel %vm586_vm3, %v1367_v52, 0.0 }
  0xfd   : > { %v628_v56 = vadd.f32 %v627_v54, %v626_v51  ;;  %v731_v57 = vadd.f32 %v730_v53, %v729_v50  ;;  %v476_v58 = vpop.f32.mrf.mxu0  ;;  %v1662_v63 = vpop.f32.mrf.mxu1 }
  0xfe   : > { %592 = vst.msk [vmem:[#allocation2 + $0x28] sm:$0xff] %vm586_vm3, %v476_v58  ;;  %v629_v61 = vsel %vm586_vm3, %v476_v58, 0.0  ;;  %v698_v62 = vmul.f32 %v476_v58, %v476_v58  ;;  %608 = vst.msk [vmem:[#allocation2 + $0xa8] sm:$0xff] %vm586_vm3, %v1662_v63  ;;  %v738_v17 = vsel %vm586_vm3, %v700_v4, 0.0 }
  0xff   : > { %v733_v0 = vadd.f32 %v732_v60, %v731_v57  ;;  %v630_v1 = vadd.f32 %v629_v61, %v628_v56  ;;  %v1370_v2 = vpop.f32.mrf.mxu0  ;;  %v1669_v6 = vpop.f32.mrf.mxu1 }
 0x100   : > { %v734_v5 = vsel %vm586_vm3, %v698_v62, 0.0  ;;  %597 = vst.msk [vmem:[#allocation2 + $0x50] sm:$0xff] %vm586_vm3, %v1370_v2  ;;  %613 = vst.msk [vmem:[#allocation2 + $0xd0] sm:$0xff] %vm586_vm3, %v1669_v6  ;;  %v703_v23 = vmul.f32 %v1370_v2, %v1370_v2  ;;  %v639_v34 = vsel %vm586_vm3, %v1370_v2, 0.0 }
 0x101   : > { %v632_v7 = vadd.f32 %v631_v3, %v630_v1  ;;  %v735_v8 = vadd.f32 %v734_v5, %v733_v0  ;;  %v489_v9 = vpop.f32.mrf.mxu0  ;;  %v1676_v13 = vpop.f32.mrf.mxu1 }
 0x102   : > { %595 = vst.msk [vmem:[#allocation2 + $0x40] sm:$0xff] %vm586_vm3, %v489_v9  ;;  %v701_v12 = vmul.f32 %v489_v9, %v489_v9  ;;  %611 = vst.msk [vmem:[#allocation2 + $0xc0] sm:$0xff] %vm586_vm3, %v1676_v13  ;;  %v635_v18 = vsel %vm586_vm3, %v489_v9, 0.0  ;;  %v744_v43 = vsel %vm586_vm3, %v703_v23, 0.0 }
 0x103   : > { %v737_v14 = vadd.f32 %v736_v10, %v735_v8  ;;  %v634_v15 = vadd.f32 %v633_v11, %v632_v7  ;;  %v1371_v16 = vpop.f32.mrf.mxu0  ;;  %v1683_v19 = vpop.f32.mrf.mxu1  ;;  %v709_v10 = vmul.f32 %v1621_v26, %v1621_v26 }
 0x104   : > { %598 = vst.msk [vmem:[#allocation2 + $0x58] sm:$0xff] %vm586_vm3, %v1371_v16  ;;  %614 = vst.msk [vmem:[#allocation2 + $0xd8] sm:$0xff] %vm586_vm3, %v1683_v19  ;;  %v740_v25 = vsel %vm586_vm3, %v701_v12, 0.0  ;;  %v704_v36 = vmul.f32 %v1371_v16, %v1371_v16  ;;  %v641_v44 = vsel %vm586_vm3, %v1371_v16, 0.0  ;;  %v710_v16 = vmul.f32 %v1633_v35, %v1633_v35 }
 0x105   : > { %v636_v20 = vadd.f32 %v635_v18, %v634_v15  ;;  %v739_v21 = vadd.f32 %v738_v17, %v737_v14  ;;  %v492_v22 = vpop.f32.mrf.mxu0  ;;  %v1690_v30 = vpop.f32.mrf.mxu1  ;;  %v651_v15 = vsel %vm586_vm3, %v1621_v26, 0.0  ;;  %v712_v26 = vmul.f32 %v1626_v29, %v1626_v29 }
 0x106   : > { %596 = vst.msk [vmem:[#allocation2 + $0x48] sm:$0xff] %vm586_vm3, %v492_v22  ;;  %v637_v27 = vsel %vm586_vm3, %v492_v22, 0.0  ;;  %v702_v28 = vmul.f32 %v492_v22, %v492_v22  ;;  %612 = vst.msk [vmem:[#allocation2 + $0xc8] sm:$0xff] %vm586_vm3, %v1690_v30  ;;  %v746_v51 = vsel %vm586_vm3, %v704_v36, 0.0  ;;  %v653_v22 = vsel %vm586_vm3, %v1633_v35, 0.0 }
 0x107   : > { %v741_v31 = vadd.f32 %v740_v25, %v739_v21  ;;  %v638_v32 = vadd.f32 %v637_v27, %v636_v20  ;;  %v1374_v33 = vpop.f32.mrf.mxu0  ;;  %v1697_v38 = vpop.f32.mrf.mxu1  ;;  %v711_v20 = vmul.f32 %v1616_v24, %v1616_v24  ;;  %v756_v21 = vsel %vm586_vm3, %v709_v10, 0.0 }
 0x108   : > { %v742_v37 = vsel %vm586_vm3, %v702_v28, 0.0  ;;  %601 = vst.msk [vmem:[#allocation2 + $0x70] sm:$0xff] %vm586_vm3, %v1374_v33  ;;  %617 = vst.msk [vmem:[#allocation2 + $0xf0] sm:$0xff] %vm586_vm3, %v1697_v38  ;;  %v707_v58 = vmul.f32 %v1374_v33, %v1374_v33  ;;  %v647_v2 = vsel %vm586_vm3, %v1374_v33, 0.0  ;;  %v655_v27 = vsel %vm586_vm3, %v1616_v24, 0.0 }
 0x109   : > { %v640_v39 = vadd.f32 %v639_v34, %v638_v32  ;;  %v743_v40 = vadd.f32 %v742_v37, %v741_v31  ;;  %v505_v41 = vpop.f32.mrf.mxu0  ;;  %v1704_v46 = vpop.f32.mrf.mxu1  ;;  %v758_v28 = vsel %vm586_vm3, %v710_v16, 0.0  ;;  %v760_v33 = vsel %vm586_vm3, %v711_v20, 0.0 }
 0x10a   : > { %599 = vst.msk [vmem:[#allocation2 + $0x60] sm:$0xff] %vm586_vm3, %v505_v41  ;;  %v705_v45 = vmul.f32 %v505_v41, %v505_v41  ;;  %615 = vst.msk [vmem:[#allocation2 + $0xe0] sm:$0xff] %vm586_vm3, %v1704_v46  ;;  %v643_v52 = vsel %vm586_vm3, %v505_v41, 0.0  ;;  %v752_v8 = vsel %vm586_vm3, %v707_v58, 0.0  ;;  %v657_v34 = vsel %vm586_vm3, %v1626_v29, 0.0 }
 0x10b   : > { %v745_v47 = vadd.f32 %v744_v43, %v743_v40  ;;  %v642_v48 = vadd.f32 %v641_v44, %v640_v39  ;;  %v1375_v50 = vpop.f32.mrf.mxu0  ;;  %v1711_v53 = vpop.f32.mrf.mxu1  ;;  %v713_v35 = vmul.f32 %v1648_v49, %v1648_v49  ;;  %v762_v39 = vsel %vm586_vm3, %v712_v26, 0.0 }
 0x10c   : > { %602 = vst.msk [vmem:[#allocation2 + $0x78] sm:$0xff] %vm586_vm3, %v1375_v50  ;;  %618 = vst.msk [vmem:[#allocation2 + $0xf8] sm:$0xff] %vm586_vm3, %v1711_v53  ;;  %v748_v59 = vsel %vm586_vm3, %v705_v45, 0.0  ;;  %v708_v3 = vmul.f32 %v1375_v50, %v1375_v50  ;;  %v649_v9 = vsel %vm586_vm3, %v1375_v50, 0.0  ;;  %v659_v24 = vsel %vm586_vm3, %v1648_v49, 0.0 }
 0x10d   : > { %v644_v54 = vadd.f32 %v643_v52, %v642_v48  ;;  %v747_v56 = vadd.f32 %v746_v51, %v745_v47  ;;  %v508_v57 = vpop.f32.mrf.mxu0  ;;  %v1718_v62 = vpop.f32.mrf.mxu1  ;;  %v714_v40 = vmul.f32 %v1662_v63, %v1662_v63  ;;  %v715_v44 = vmul.f32 %v1641_v42, %v1641_v42 }
 0x10e   : > { %600 = vst.msk [vmem:[#allocation2 + $0x68] sm:$0xff] %vm586_vm3, %v508_v57  ;;  %v645_v60 = vsel %vm586_vm3, %v508_v57, 0.0  ;;  %v706_v61 = vmul.f32 %v508_v57, %v508_v57  ;;  %616 = vst.msk [vmem:[#allocation2 + $0xe8] sm:$0xff] %vm586_vm3, %v1718_v62  ;;  %v754_v14 = vsel %vm586_vm3, %v708_v3, 0.0  ;;  %v764_v29 = vsel %vm586_vm3, %v713_v35, 0.0 }
 0x10f   : > { %v749_v0 = vadd.f32 %v748_v59, %v747_v56  ;;  %v646_v1 = vadd.f32 %v645_v60, %v644_v54  ;;  %v661_v45 = vsel %vm586_vm3, %v1662_v63, 0.0  ;;  %v663_v50 = vsel %vm586_vm3, %v1641_v42, 0.0 }
 0x110   : > { %v750_v4 = vsel %vm586_vm3, %v706_v61, 0.0  ;;  %v716_v49 = vmul.f32 %v1655_v55, %v1655_v55  ;;  %v766_v51 = vsel %vm586_vm3, %v714_v40, 0.0  ;;  %v768_v56 = vsel %vm586_vm3, %v715_v44, 0.0 }
 0x111   : > { %v648_v5 = vadd.f32 %v647_v2, %v646_v1  ;;  %v751_v7 = vadd.f32 %v750_v4, %v749_v0  ;;  %v665_v57 = vsel %vm586_vm3, %v1655_v55, 0.0  ;;  %v717_v63 = vmul.f32 %v1676_v13, %v1676_v13 }
 0x112   : > { %v770_v60 = vsel %vm586_vm3, %v716_v49, 0.0  ;;  %v667_v42 = vsel %vm586_vm3, %v1676_v13, 0.0  ;;  %v718_v61 = vmul.f32 %v1690_v30, %v1690_v30  ;;  %v719_v2 = vmul.f32 %v1669_v6, %v1669_v6 }
 0x113   : > { %v650_v11 = vadd.f32 %v649_v9, %v648_v5  ;;  %v753_v12 = vadd.f32 %v752_v8, %v751_v7  ;;  %v772_v55 = vsel %vm586_vm3, %v717_v63, 0.0  ;;  %v669_v3 = vsel %vm586_vm3, %v1690_v30, 0.0 }
 0x114   : > { %v671_v7 = vsel %vm586_vm3, %v1669_v6, 0.0  ;;  %v720_v13 = vmul.f32 %v1683_v19, %v1683_v19  ;;  %v774_v8 = vsel %vm586_vm3, %v718_v61, 0.0  ;;  %v721_v30 = vmul.f32 %v1704_v46, %v1704_v46 }
 0x115   : > { %v755_v17 = vadd.f32 %v754_v14, %v753_v12  ;;  %v652_v18 = vadd.f32 %v651_v15, %v650_v11  ;;  %v776_v11 = vsel %vm586_vm3, %v719_v2, 0.0  ;;  %v673_v12 = vsel %vm586_vm3, %v1683_v19, 0.0 }
 0x116   : > { %v778_v16 = vsel %vm586_vm3, %v720_v13, 0.0  ;;  %v675_v6 = vsel %vm586_vm3, %v1704_v46, 0.0  ;;  %v780_v19 = vsel %vm586_vm3, %v721_v30, 0.0  ;;  %v724_v46 = vmul.f32 %v1711_v53, %v1711_v53 }
 0x117   : > { %v654_v23 = vadd.f32 %v653_v22, %v652_v18  ;;  %v757_v25 = vadd.f32 %v756_v21, %v755_v17  ;;  %v722_v17 = vmul.f32 %v1718_v62, %v1718_v62  ;;  %v723_v21 = vmul.f32 %v1697_v38, %v1697_v38 }
 0x118   : > { %v677_v22 = vsel %vm586_vm3, %v1718_v62, 0.0  ;;  %v786_v62 = vsel %vm586_vm3, %v724_v46, 0.0 }
 0x119   : > { %v656_v31 = vadd.f32 %v655_v27, %v654_v23  ;;  %v759_v32 = vadd.f32 %v758_v28, %v757_v25  ;;  %v679_v27 = vsel %vm586_vm3, %v1697_v38, 0.0  ;;  %v782_v26 = vsel %vm586_vm3, %v722_v17, 0.0 }
 0x11b   : > { %v761_v36 = vadd.f32 %v760_v33, %v759_v32  ;;  %v658_v37 = vadd.f32 %v657_v34, %v656_v31  ;;  %v784_v32 = vsel %vm586_vm3, %v723_v21, 0.0  ;;  %v681_v33 = vsel %vm586_vm3, %v1711_v53, 0.0 }
 0x11d   : > { %v660_v41 = vadd.f32 %v659_v24, %v658_v37  ;;  %v763_v43 = vadd.f32 %v762_v39, %v761_v36 }
 0x11f   : > { %v765_v47 = vadd.f32 %v764_v29, %v763_v43  ;;  %v662_v48 = vadd.f32 %v661_v45, %v660_v41  ;;  %v619_v45 = vld [vmem:[#allocation3] sm:$0x1] }
 0x121   : > { %v664_v52 = vadd.f32 %v663_v50, %v662_v48  ;;  %v767_v54 = vadd.f32 %v766_v51, %v765_v47  ;;  %v692_v50 = vld [vmem:[#allocation4] sm:$0x1] }
 0x123   : > { %v769_v58 = vadd.f32 %v768_v56, %v767_v54  ;;  %v666_v59 = vadd.f32 %v665_v57, %v664_v52 }
 0x125   : > { %v668_v0 = vadd.f32 %v667_v42, %v666_v59  ;;  %v771_v1 = vadd.f32 %v770_v60, %v769_v58 }
 0x127   : > { %v773_v4 = vadd.f32 %v772_v55, %v771_v1  ;;  %v670_v5 = vadd.f32 %v669_v3, %v668_v0 }
 0x129   : > { %v672_v9 = vadd.f32 %v671_v7, %v670_v5  ;;  %v775_v10 = vadd.f32 %v774_v8, %v773_v4 }
 0x12b   : > { %v777_v14 = vadd.f32 %v776_v11, %v775_v10  ;;  %v674_v15 = vadd.f32 %v673_v12, %v672_v9 }
 0x12d   : > { %v676_v18 = vadd.f32 %v675_v6, %v674_v15  ;;  %v779_v20 = vadd.f32 %v778_v16, %v777_v14 }
 0x12f   : > { %v781_v23 = vadd.f32 %v780_v19, %v779_v20  ;;  %v678_v25 = vadd.f32 %v677_v22, %v676_v18 }
 0x131   : > { %v680_v28 = vadd.f32 %v679_v27, %v678_v25  ;;  %v783_v31 = vadd.f32 %v782_v26, %v781_v23 }
 0x133   : > { %v682_v34 = vadd.f32 %v681_v33, %v680_v28  ;;  %v785_v35 = vadd.f32 %v784_v32, %v783_v31 }
 0x135   : > { %v683_v36 = vrot.slane %v682_v34, 4  ;;  %v787_v37 = vadd.f32 %v786_v62, %v785_v35 }
 0x137   : > { %v684_v39 = vadd.f32 %v683_v36, %v682_v34  ;;  %v788_v38 = vrot.slane %v787_v37, 4 }
 0x139   : > { %v685_v24 = vrot.slane %v684_v39, 2  ;;  %v789_v40 = vadd.f32 %v788_v38, %v787_v37 }
 0x13b   : > { %v686_v41 = vadd.f32 %v685_v24, %v684_v39  ;;  %v790_v43 = vrot.slane %v789_v40, 2 }
 0x13d   : > { %v687_v44 = vrot.slane %v686_v41, 1  ;;  %v791_v29 = vadd.f32 %v790_v43, %v789_v40 }
 0x13f   : > { %v688_v47 = vadd.f32 %v687_v44, %v686_v41  ;;  %v792_v48 = vrot.slane %v791_v29, 1 }
 0x141   : > { %v689_v53 = vadd.f32 %v688_v47, %v619_v45  ;;  %v793_v49 = vadd.f32 %v792_v48, %v791_v29 }
 0x143   : > { %691 = vst.msk [vmem:[#allocation3] sm:$0x1] %vm690_vm4, %v689_v53  ;;  %v794_v51 = vadd.f32 %v793_v49, %v692_v50 }
 0x145   : > { %795 = vst.msk [vmem:[#allocation4] sm:$0x1] %vm690_vm4, %v794_v51 }
 0x146 PF: > { %p1259_p8 = scmp.ne.s32.totalorder %s1490_s9, 1 }
 0x148   : > { %799 = sbr.rel (%p1259_p8) target bundleno = 389 (0x185), region = 40 }
 0x14d   : > { %v834_v52 = vld [vmem:[#allocation3] sm:$0x1]  ;;  %v836_v54 = vld [vmem:[#allocation4] sm:$0x1]  ;;  %v843_v56 = vlaneseq  ;;  %v1815_v2 = vld [vmem:[#allocation2 + $0x8] sm:$0xff]  ;;  %vm1078_vm5 = vcmask 125952  }
 0x14e   : > { %v835_v57 = vmul.f32 0.00390625, %v834_v52  ;;  %v837_v63 = vmul.f32 0.00390625, %v836_v54  ;;  %v1811_v0 = vld [vmem:[#allocation2] sm:$0xff]  ;;  %v1817_v55 = vld [vmem:[#allocation2 + $0x10] sm:$0xff]  ;;  %v1819_v3 = vld [vmem:[#allocation2 + $0x18] sm:$0xff] }
 0x14f   : > { %v1808_v59 = vshrl.u32 %v843_v56, 7  ;;  %v1821_v4 = vld [vmem:[#allocation2 + $0x20] sm:$0xff]  ;;  %v1823_v5 = vld [vmem:[#allocation2 + $0x28] sm:$0xff]  ;;  %v1825_v7 = vld [vmem:[#allocation2 + $0x30] sm:$0xff] }
 0x150   : > { %v838_v58 = vmul.f32 %v835_v57, %v835_v57  ;;  %v1827_v13 = vld [vmem:[#allocation2 + $0x38] sm:$0xff]  ;;  %v1829_v8 = vld [vmem:[#allocation2 + $0x40] sm:$0xff]  ;;  %v1831_v9 = vld [vmem:[#allocation2 + $0x48] sm:$0xff] }
 0x151   : > { %v845_v61 = vsub.s32 0, %v1808_v59  ;;  %v1833_v10 = vld [vmem:[#allocation2 + $0x50] sm:$0xff]  ;;  %v1835_v11 = vld [vmem:[#allocation2 + $0x58] sm:$0xff]  ;;  %v1837_v12 = vld [vmem:[#allocation2 + $0x60] sm:$0xff] }
 0x152   : > { %v839_v60 = vsub.f32 %v837_v63, %v838_v58  ;;  %v1839_v30 = vld [vmem:[#allocation2 + $0x68] sm:$0xff]  ;;  %v1843_v15 = vld [vmem:[#allocation2 + $0x70] sm:$0xff]  ;;  %v1845_v16 = vld [vmem:[#allocation2 + $0x78] sm:$0xff] }
 0x153   : > { %v1813_v1 = vrot.slane %v835_v57, %v845_v61  ;;  %v1847_v6 = vld [vmem:[#allocation2 + $0x80] sm:$0xff]  ;;  %v1857_v19 = vld [vmem:[#allocation2 + $0x88] sm:$0xff]  ;;  %v1859_v22 = vld [vmem:[#allocation2 + $0x90] sm:$0xff] }
 0x154   : > { %v840_v42 = vadd.f32 1e-05, %v839_v60  ;;  %v1861_v23 = vld [vmem:[#allocation2 + $0x98] sm:$0xff]  ;;  %v1871_v28 = vld [vmem:[#allocation2 + $0xa0] sm:$0xff]  ;;  %v1873_v31 = vld [vmem:[#allocation2 + $0xa8] sm:$0xff] }
 0x155   : > { %v848_v14 = vsub.f32 %v1811_v0, %v1813_v1  ;;  %v849_v17 = vsub.f32 %v1815_v2, %v1813_v1  ;;  %v850_v18 = vsub.f32 %v1817_v55, %v1813_v1  ;;  %v851_v20 = vsub.f32 %v1819_v3, %v1813_v1  ;;  %v1875_v32 = vld [vmem:[#allocation2 + $0xb0] sm:$0xff]  ;;  %v1885_v36 = vld [vmem:[#allocation2 + $0xb8] sm:$0xff]  ;;  %v1887_v37 = vld [vmem:[#allocation2 + $0xc0] sm:$0xff] }
 0x156   : > { %1466 = vrsqrt.f32 %v840_v42  ;;  %v852_v21 = vsub.f32 %v1821_v4, %v1813_v1  ;;  %v853_v25 = vsub.f32 %v1823_v5, %v1813_v1  ;;  %v854_v27 = vsub.f32 %v1825_v7, %v1813_v1  ;;  %v1889_v39 = vld [vmem:[#allocation2 + $0xc8] sm:$0xff]  ;;  %v1899_v43 = vld [vmem:[#allocation2 + $0xd0] sm:$0xff]  ;;  %v1901_v44 = vld [vmem:[#allocation2 + $0xd8] sm:$0xff] }
 0x157   : > { %v855_v46 = vsub.f32 %v1827_v13, %v1813_v1  ;;  %v856_v26 = vsub.f32 %v1829_v8, %v1813_v1  ;;  %v857_v33 = vsub.f32 %v1831_v9, %v1813_v1  ;;  %v858_v34 = vsub.f32 %v1833_v10, %v1813_v1  ;;  %v1903_v29 = vld [vmem:[#allocation2 + $0xe0] sm:$0xff]  ;;  %v1913_v53 = vld [vmem:[#allocation2 + $0xe8] sm:$0xff]  ;;  %v1915_v49 = vld [vmem:[#allocation2 + $0xf0] sm:$0xff] }
 0x158   : > { %v859_v35 = vsub.f32 %v1835_v11, %v1813_v1  ;;  %v860_v62 = vsub.f32 %v1837_v12, %v1813_v1  ;;  %v861_v38 = vsub.f32 %v1839_v30, %v1813_v1  ;;  %v862_v24 = vsub.f32 %v1843_v15, %v1813_v1  ;;  %v1917_v51 = vld [vmem:[#allocation2 + $0xf8] sm:$0xff] }
 0x159   : > { %v863_v40 = vsub.f32 %v1845_v16, %v1813_v1  ;;  %v864_v41 = vsub.f32 %v1847_v6, %v1813_v1  ;;  %v865_v45 = vsub.f32 %v1857_v19, %v1813_v1  ;;  %v866_v47 = vsub.f32 %v1859_v22, %v1813_v1 }
 0x15a   : > { %v867_v48 = vsub.f32 %v1861_v23, %v1813_v1  ;;  %v868_v50 = vsub.f32 %v1871_v28, %v1813_v1  ;;  %v869_v54 = vsub.f32 %v1873_v31, %v1813_v1  ;;  %v870_v56 = vsub.f32 %v1875_v32, %v1813_v1 }
 0x15b   : > { %v871_v57 = vsub.f32 %v1885_v36, %v1813_v1 }
 0x163   : > { %v1467_v52 = vpop.eup %1466 }
 0x164   : > { %v1927_v58 = vrot.slane %v1467_v52, %v845_v61 }
 0x166   : > { %v886_v3 = vmul.f32 %v1927_v58, %v848_v14  ;;  %v887_v4 = vmul.f32 %v1927_v58, %v849_v17  ;;  %v888_v5 = vmul.f32 %v1927_v58, %v850_v18  ;;  %v889_v7 = vmul.f32 %v1927_v58, %v851_v20 }
 0x167   : > { %v890_v13 = vmul.f32 %v1927_v58, %v852_v21  ;;  %v891_v52 = vmul.f32 %v1927_v58, %v853_v25  ;;  %v892_v2 = vmul.f32 %v1927_v58, %v854_v27  ;;  %v893_v0 = vmul.f32 %v1927_v58, %v855_v46 }
 0x168   : > { %v918_v55 = vmax.f32 %v886_v3, 0.0  ;;  %v919_v42 = vmax.f32 %v887_v4, 0.0  ;;  %v920_v61 = vmax.f32 %v888_v5, 0.0  ;;  %v921_v14 = vmax.f32 %v889_v7, 0.0 }
 0x169   : > { %v922_v17 = vmax.f32 %v890_v13, 0.0  ;;  %v923_v18 = vmax.f32 %v891_v52, 0.0  ;;  %v924_v60 = vmax.f32 %v892_v2, 0.0  ;;  %v925_v20 = vmax.f32 %v893_v0, 0.0 }
 0x16a   : > { %v1297_v59 = vpack.c.bf16 %v918_v55, %v918_v55  ;;  %v1298_v21 = vpack.c.bf16 %v919_v42, %v919_v42  ;;  %v1299_v25 = vpack.c.bf16 %v920_v61, %v920_v61  ;;  %v1300_v27 = vpack.c.bf16 %v921_v14, %v921_v14 }
 0x16b   : > { %v1301_v46 = vpack.c.bf16 %v922_v17, %v922_v17  ;;  %v1302_v3 = vpack.c.bf16 %v923_v18, %v923_v18  ;;  %v1303_v4 = vpack.c.bf16 %v924_v60, %v924_v60  ;;  %v1304_v63 = vpack.c.bf16 %v925_v20, %v925_v20 }
 0x16c   : > { %1079 = vst.msk [vmem:[%s1565_s22] sm:$0xf] %vm1078_vm5, %v1297_v59  ;;  %1080 = vst.msk [vmem:[%s1565_s22 + $0x4] sm:$0xf] %vm1078_vm5, %v1298_v21  ;;  %v894_v42 = vmul.f32 %v1927_v58, %v856_v26  ;;  %v895_v0 = vmul.f32 %v1927_v58, %v857_v33  ;;  %v896_v59 = vmul.f32 %v1927_v58, %v858_v34 }
 0x16d   : > { %1081 = vst.msk [vmem:[%s1565_s22 + $0x8] sm:$0xf] %vm1078_vm5, %v1299_v25  ;;  %1082 = vst.msk [vmem:[%s1565_s22 + $0xc] sm:$0xf] %vm1078_vm5, %v1300_v27  ;;  %v897_v60 = vmul.f32 %v1927_v58, %v859_v35  ;;  %v898_v8 = vmul.f32 %v1927_v58, %v860_v62  ;;  %v899_v9 = vmul.f32 %v1927_v58, %v861_v38 }
 0x16e   : > { %1083 = vst.msk [vmem:[%s1565_s22 + $0x10] sm:$0xf] %vm1078_vm5, %v1301_v46  ;;  %1084 = vst.msk [vmem:[%s1565_s22 + $0x14] sm:$0xf] %vm1078_vm5, %v1302_v3  ;;  %v900_v10 = vmul.f32 %v1927_v58, %v862_v24  ;;  %v901_v11 = vmul.f32 %v1927_v58, %v863_v40  ;;  %v926_v26 = vmax.f32 %v894_v42, 0.0  ;;  %v927_v12 = vmax.f32 %v895_v0, 0.0 }
 0x16f   : > { %1085 = vst.msk [vmem:[%s1565_s22 + $0x18] sm:$0xf] %vm1078_vm5, %v1303_v4  ;;  %1086 = vst.msk [vmem:[%s1565_s22 + $0x1c] sm:$0xf] %vm1078_vm5, %v1304_v63  ;;  %v928_v33 = vmax.f32 %v896_v59, 0.0  ;;  %v929_v34 = vmax.f32 %v897_v60, 0.0  ;;  %v902_v5 = vmul.f32 %v1927_v58, %v864_v41  ;;  %v903_v7 = vmul.f32 %v1927_v58, %v865_v45 }
 0x170   : > { %v930_v30 = vmax.f32 %v898_v8, 0.0  ;;  %v931_v35 = vmax.f32 %v899_v9, 0.0  ;;  %v932_v62 = vmax.f32 %v900_v10, 0.0  ;;  %v933_v38 = vmax.f32 %v901_v11, 0.0 }
 0x171   : > { %v1305_v15 = vpack.c.bf16 %v926_v26, %v926_v26  ;;  %v1306_v24 = vpack.c.bf16 %v927_v12, %v927_v12  ;;  %v1307_v63 = vpack.c.bf16 %v928_v33, %v928_v33  ;;  %v1308_v16 = vpack.c.bf16 %v929_v34, %v929_v34 }
 0x172   : > { %v1309_v40 = vpack.c.bf16 %v930_v30, %v930_v30  ;;  %v1310_v2 = vpack.c.bf16 %v931_v35, %v931_v35  ;;  %v1311_v55 = vpack.c.bf16 %v932_v62, %v932_v62  ;;  %v1312_v61 = vpack.c.bf16 %v933_v38, %v933_v38 }
 0x173   : > { %1087 = vst.msk [vmem:[%s1565_s22 + $0x20] sm:$0xf] %vm1078_vm5, %v1305_v15  ;;  %1088 = vst.msk [vmem:[%s1565_s22 + $0x24] sm:$0xf] %vm1078_vm5, %v1306_v24  ;;  %v904_v13 = vmul.f32 %v1927_v58, %v866_v47  ;;  %v905_v52 = vmul.f32 %v1927_v58, %v867_v48  ;;  %v906_v6 = vmul.f32 %v1927_v58, %v868_v50  ;;  %v934_v41 = vmax.f32 %v902_v5, 0.0 }
 0x174   : > { %1089 = vst.msk [vmem:[%s1565_s22 + $0x28] sm:$0xf] %vm1078_vm5, %v1307_v63  ;;  %1090 = vst.msk [vmem:[%s1565_s22 + $0x2c] sm:$0xf] %vm1078_vm5, %v1308_v16  ;;  %v907_v19 = vmul.f32 %v1927_v58, %v869_v54  ;;  %v908_v22 = vmul.f32 %v1927_v58, %v870_v56  ;;  %v909_v23 = vmul.f32 %v1927_v58, %v871_v57  ;;  %v935_v28 = vmax.f32 %v903_v7, 0.0 }
 0x175   : > { %1091 = vst.msk [vmem:[%s1565_s22 + $0x30] sm:$0xf] %vm1078_vm5, %v1309_v40  ;;  %1092 = vst.msk [vmem:[%s1565_s22 + $0x34] sm:$0xf] %vm1078_vm5, %v1310_v2  ;;  %v936_v45 = vmax.f32 %v904_v13, 0.0  ;;  %v937_v47 = vmax.f32 %v905_v52, 0.0  ;;  %v1313_v32 = vpack.c.bf16 %v934_v41, %v934_v41  ;;  %v2129_v21 = vsub.f32 %v1887_v37, %v1813_v1 }
 0x176   : > { %1093 = vst.msk [vmem:[%s1565_s22 + $0x38] sm:$0xf] %vm1078_vm5, %v1311_v55  ;;  %1094 = vst.msk [vmem:[%s1565_s22 + $0x3c] sm:$0xf] %vm1078_vm5, %v1312_v61  ;;  %v938_v31 = vmax.f32 %v906_v6, 0.0  ;;  %v939_v48 = vmax.f32 %v907_v19, 0.0  ;;  %v1314_v56 = vpack.c.bf16 %v935_v28, %v935_v28  ;;  %v2130_v27 = vsub.f32 %v1889_v39, %v1813_v1 }
 0x177   : > { %v940_v50 = vmax.f32 %v908_v22, 0.0  ;;  %v941_v54 = vmax.f32 %v909_v23, 0.0  ;;  %v1315_v14 = vpack.c.bf16 %v936_v45, %v936_v45  ;;  %v1316_v36 = vpack.c.bf16 %v937_v47, %v937_v47  ;;  %1095 = vst.msk [vmem:[%s1565_s22 + $0x40] sm:$0xf] %vm1078_vm5, %v1313_v32 }
 0x178   : > { %v1317_v57 = vpack.c.bf16 %v938_v31, %v938_v31  ;;  %v1318_v17 = vpack.c.bf16 %v939_v48, %v939_v48  ;;  %1096 = vst.msk [vmem:[%s1565_s22 + $0x44] sm:$0xf] %vm1078_vm5, %v1314_v56  ;;  %v910_v25 = vmul.f32 %v1927_v58, %v2129_v21  ;;  %v911_v46 = vmul.f32 %v1927_v58, %v2130_v27 }
 0x179   : > { %v1319_v18 = vpack.c.bf16 %v940_v50, %v940_v50  ;;  %v1320_v20 = vpack.c.bf16 %v941_v54, %v941_v54  ;;  %1097 = vst.msk [vmem:[%s1565_s22 + $0x48] sm:$0xf] %vm1078_vm5, %v1315_v14  ;;  %1098 = vst.msk [vmem:[%s1565_s22 + $0x4c] sm:$0xf] %vm1078_vm5, %v1316_v36  ;;  %v2131_v3 = vsub.f32 %v1899_v43, %v1813_v1 }
 0x17a   : > { %v2132_v42 = vsub.f32 %v1901_v44, %v1813_v1  ;;  %1099 = vst.msk [vmem:[%s1565_s22 + $0x50] sm:$0xf] %vm1078_vm5, %v1317_v57  ;;  %1100 = vst.msk [vmem:[%s1565_s22 + $0x54] sm:$0xf] %vm1078_vm5, %v1318_v17  ;;  %v2133_v37 = vsub.f32 %v1903_v29, %v1813_v1  ;;  %v2134_v43 = vsub.f32 %v1913_v53, %v1813_v1  ;;  %v942_v10 = vmax.f32 %v910_v25, 0.0 }
 0x17b   : > { %v912_v4 = vmul.f32 %v1927_v58, %v2131_v3  ;;  %1101 = vst.msk [vmem:[%s1565_s22 + $0x58] sm:$0xf] %vm1078_vm5, %v1319_v18  ;;  %1102 = vst.msk [vmem:[%s1565_s22 + $0x5c] sm:$0xf] %vm1078_vm5, %v1320_v20  ;;  %v2135_v59 = vsub.f32 %v1915_v49, %v1813_v1  ;;  %v2136_v8 = vsub.f32 %v1917_v51, %v1813_v1  ;;  %v943_v29 = vmax.f32 %v911_v46, 0.0 }
 0x17c   : > { %v913_v0 = vmul.f32 %v1927_v58, %v2132_v42  ;;  %v914_v39 = vmul.f32 %v1927_v58, %v2133_v37  ;;  %v915_v44 = vmul.f32 %v1927_v58, %v2134_v43  ;;  %v1321_v34 = vpack.c.bf16 %v942_v10, %v942_v10 }
 0x17d   : > { %v916_v60 = vmul.f32 %v1927_v58, %v2135_v59  ;;  %v917_v9 = vmul.f32 %v1927_v58, %v2136_v8  ;;  %v944_v11 = vmax.f32 %v912_v4, 0.0  ;;  %v1322_v1 = vpack.c.bf16 %v943_v29, %v943_v29 }
 0x17e   : > { %v945_v26 = vmax.f32 %v913_v0, 0.0  ;;  %v946_v53 = vmax.f32 %v914_v39, 0.0  ;;  %v947_v12 = vmax.f32 %v915_v44, 0.0  ;;  %1103 = vst.msk [vmem:[%s1565_s22 + $0x60] sm:$0xf] %vm1078_vm5, %v1321_v34 }
 0x17f   : > { %v948_v49 = vmax.f32 %v916_v60, 0.0  ;;  %v949_v33 = vmax.f32 %v917_v9, 0.0  ;;  %v1323_v51 = vpack.c.bf16 %v944_v11, %v944_v11  ;;  %1104 = vst.msk [vmem:[%s1565_s22 + $0x64] sm:$0xf] %vm1078_vm5, %v1322_v1 }
 0x180   : > { %v1324_v58 = vpack.c.bf16 %v945_v26, %v945_v26  ;;  %v1325_v30 = vpack.c.bf16 %v946_v53, %v946_v53  ;;  %v1326_v35 = vpack.c.bf16 %v947_v12, %v947_v12 }
 0x181   : > { %v1327_v62 = vpack.c.bf16 %v948_v49, %v948_v49  ;;  %v1328_v38 = vpack.c.bf16 %v949_v33, %v949_v33  ;;  %1105 = vst.msk [vmem:[%s1565_s22 + $0x68] sm:$0xf] %vm1078_vm5, %v1323_v51 }
 0x182   : > { %1106 = vst.msk [vmem:[%s1565_s22 + $0x6c] sm:$0xf] %vm1078_vm5, %v1324_v58  ;;  %1107 = vst.msk [vmem:[%s1565_s22 + $0x70] sm:$0xf] %vm1078_vm5, %v1325_v30 }
 0x183   : > { %1108 = vst.msk [vmem:[%s1565_s22 + $0x74] sm:$0xf] %vm1078_vm5, %v1326_v35  ;;  %1109 = vst.msk [vmem:[%s1565_s22 + $0x78] sm:$0xf] %vm1078_vm5, %v1327_v62 }
 0x184   : > { %1110 = vst.msk [vmem:[%s1565_s22 + $0x7c] sm:$0xf] %vm1078_vm5, %v1328_v38 }
 0x185 PF: > { %s12_s13 = sadd.s32 1, %s1506_s13   ;;  %s2137_s9 = smov %s1498_s11 }
 0x186   : > { %p9_p9 = scmp.ge.s32.totalorder %s12_s13, 6   ;;  %s2138_s10 = smov %s1502_s12 }
 0x187   : > { %s2139_s11 = smov %s2142_s14  ;;  %s2140_s12 = smov %s2146_s15 }
 0x188   :  { %11 = sbr.rel (!%p9_p9) target bundleno = 3 (0x3), region = 72 }

// kernel: latent_encoder_forward.6
= control target key start
LH: loop header
LB: loop body
LE: loop exit
PB: predicated region body
PF: predicated region fallthrough
CT: control target
= control target key end

     0   :  { %s883_s9 = smov 0   ;;  %s885_s10 = smov 0   ;;  %s1022_s0 = inlined_call_operand.vmem [shape: bf16[2,64,144], index: 0, kind: input, shape index: {}]   ;;  %s1023_s1 = inlined_call_operand.vmem [shape: bf16[144,32], index: 1, kind: input, shape index: {}]   ;;  %s1024_s2 = inlined_call_operand.vmem [shape: bf16[2,64,32], index: 2, kind: output, shape index: {}]  }
   0x1   :  { %s887_s11 = smov 0   ;;  %s889_s12 = smov 0  }
   0x2   :  { %s891_s13 = smov 0  }
   0x3 LB: > { %s27_s14 = sadd.s32 1, %s856_s11  ;;  %s31_s15 = sadd.s32 1, %s860_s12  ;;  %s864_s13 = sphi %s891_s13, %s12_s13   ;;  %s860_s12 = sphi %s889_s12, %s1028_s12   ;;  %s856_s11 = sphi %s887_s11, %s1027_s11   ;;  %s852_s10 = sphi %s885_s10, %s1026_s10   ;;  %s848_s9 = sphi %s883_s9, %s1025_s9  }
   0x4   : > { %p29_p0 = scmp.ge.s32.totalorder %s27_s14, 2  ;;  %p693_p1 = scmp.ge.s32.totalorder %s864_s13, 1 }
   0x5   : > { %p151_p2 = scmp.lt.s32.totalorder %s864_s13, 5 }
   0x6   : > { %s1030_s14 = smov (%p29_p0, %s27_s14), 0  ;;  %s1032_s15 = smov (!%p29_p0, %s31_s15), %s860_s12 }
   0x7   : > { %p152_p3 = pnand %p693_p1, %p151_p2  ;;  %p33_p4 = scmp.ge.s32.totalorder %s1032_s15, 2 }
   0x8   : > { %p188_p5 = scmp.lt.s32.totalorder (!%p152_p3), %s852_s10, 1  ;;  %p213_p6 = scmp.eq.s32.totalorder (!%p152_p3), %s848_s9, 0 }
   0x9   : > { %s1034_s15 = smov (%p33_p4, %s1032_s15), 0  ;;  %155 = sbr.rel (%p152_p3) target bundleno = 338 (0x152), region = 28 }
   0xe   : > { %s1036_s10 = smov (!%p188_p5, %s852_s10), 1  ;;  %218 = sbr.rel (!%p213_p6) target bundleno = 19 (0x13), region = 32  ;;  %vm219_vm0 = vcmask (%p213_p6), 253952   ;;  %v866_v0 = vmov (%p213_p6), 0.0  }
   0xf   : > { %s732_s16 = sshll.u32 %s1036_s10, 6  ;;  %s733_s17 = sshll.u32 %s1036_s10, 5  ;;  %220 = vst.msk [vmem:[#allocation3] sm:$0x1] (%p213_p6), %vm219_vm0, %v866_v0  ;;  %221 = vst.msk [vmem:[#allocation4] sm:$0x1] (%p213_p6), %vm219_vm0, %v866_v0 }
  0x10   : > { %s919_s20 = scalar_lea.vmem %s1022_s0, %s732_s16  ;;  %s924_s23 = scalar_lea.vmem %s1024_s2, %s733_s17 }
  0x13 PF: > { %p699_p7 = scmp.ne.s32.totalorder %s848_s9, 0 }
  0x15   : > { %224 = sbr.rel (%p699_p7) target bundleno = 296 (0x128), region = 36 }
  0x1a   : > { %v803_v1 = vld [vmem:[%s1023_s1 + $0x38] sm:$0xff]   ;;  %v867_v2 = vmov 0   ;;  %v804_v3 = vld [vmem:[%s1023_s1 + $0x30] sm:$0xff]   ;;  %v805_v4 = vld [vmem:[%s1023_s1 + $0x28] sm:$0xff]   ;;  %vm341_vm1 = vcmask 130048   ;;  %vm421_vm2 = vcmask 261120  }
  0x1b   : > { %354 = vmatprep.subr.bf16.mxu0 %v867_v2  ;;  %743 = vmatprep.subr.bf16.mxu1 %v867_v2  ;;  %v806_v5 = vld [vmem:[%s1023_s1 + $0x20] sm:$0xff]   ;;  %v807_v8 = vld [vmem:[%s1023_s1 + $0x18] sm:$0xff]   ;;  %v808_v9 = vld [vmem:[%s1023_s1 + $0x10] sm:$0xff]   ;;  %vm453_vm3 = vcmask 253952  }
  0x1c   : > { %355 = vmatpush1.bf16.msra.mxu0 %v803_v1  ;;  %752 = vmatpush1.bf16.msra.mxu1 %v803_v1  ;;  %v814_v6 = vld [vmem:[%s919_s20 + $0x4] ss:$8 sps:$4 sm:$0xff]   ;;  %v812_v13 = vld [vmem:[%s919_s20] ss:$8 sps:$4 sm:$0xff]   ;;  %v818_v15 = vld [vmem:[%s919_s20 + $0x14] ss:$8 sps:$4 sm:$0xff]  }
  0x1d   : > { %356 = vmatprep.subr.bf16.mxu0 %v867_v2  ;;  %744 = vmatprep.subr.bf16.mxu1 %v867_v2  ;;  %v817_v7 = vld [vmem:[%s919_s20 + $0x24] ss:$8 sps:$4 sm:$0xff]   ;;  %v815_v14 = vld [vmem:[%s919_s20 + $0x20] ss:$8 sps:$4 sm:$0xff]   ;;  %v821_v16 = vld [vmem:[%s919_s20 + $0x34] ss:$8 sps:$4 sm:$0xff]  }
  0x1e   : > { %717 = vmatprep.mubr.msk.bf16.mxu0 %vm341_vm1, %v814_v6  ;;  %719 = vmatprep.mubr.msk.bf16.mxu1 %vm341_vm1, %v817_v7  ;;  %v809_v10 = vld [vmem:[%s1023_s1 + $0x8] sm:$0xff]   ;;  %v810_v11 = vld [vmem:[%s1023_s1] sm:$0xff]   ;;  %v820_v17 = vld [vmem:[%s919_s20 + $0x10] ss:$8 sps:$4 sm:$0xff]  }
  0x1f   : > { %v811_v12 = vld [vmem:[%s1023_s1 + $0x40] sm:$0xff]   ;;  %v823_v18 = vld [vmem:[%s919_s20 + $0x30] ss:$8 sps:$4 sm:$0xff]  }
  0x20   : > { %357 = vmatpush1.bf16.msra.mxu0 %v804_v3  ;;  %753 = vmatpush1.bf16.msra.mxu1 %v804_v3 }
  0x21   : > { %358 = vmatprep.subr.bf16.mxu0 %v867_v2  ;;  %745 = vmatprep.subr.bf16.mxu1 %v867_v2 }
  0x24   : > { %359 = vmatpush1.bf16.msra.mxu0 %v805_v4  ;;  %754 = vmatpush1.bf16.msra.mxu1 %v805_v4 }
  0x25   : > { %360 = vmatprep.subr.bf16.mxu0 %v867_v2  ;;  %746 = vmatprep.subr.bf16.mxu1 %v867_v2 }
  0x28   : > { %361 = vmatpush1.bf16.msra.mxu0 %v806_v5  ;;  %755 = vmatpush1.bf16.msra.mxu1 %v806_v5 }
  0x29   : > { %362 = vmatprep.subr.bf16.mxu0 %v867_v2  ;;  %747 = vmatprep.subr.bf16.mxu1 %v867_v2 }
  0x2c   : > { %363 = vmatpush1.bf16.msra.mxu0 %v807_v8  ;;  %756 = vmatpush1.bf16.msra.mxu1 %v807_v8 }
  0x2d   : > { %364 = vmatprep.subr.bf16.mxu0 %v867_v2  ;;  %748 = vmatprep.subr.bf16.mxu1 %v867_v2 }
  0x30   : > { %365 = vmatpush1.bf16.msra.mxu0 %v808_v9  ;;  %757 = vmatpush1.bf16.msra.mxu1 %v808_v9 }
  0x31   : > { %366 = vmatprep.subr.bf16.mxu0 %v867_v2  ;;  %749 = vmatprep.subr.bf16.mxu1 %v867_v2 }
  0x34   : > { %367 = vmatpush1.bf16.msra.mxu0 %v809_v10  ;;  %758 = vmatpush1.bf16.msra.mxu1 %v809_v10 }
  0x35   : > { %368 = vmatprep.subr.bf16.mxu0 %v867_v2  ;;  %750 = vmatprep.subr.bf16.mxu1 %v867_v2 }
  0x38   : > { %369 = vmatpush1.bf16.msra.mxu0 %v810_v11  ;;  %759 = vmatpush1.bf16.msra.mxu1 %v810_v11 }
  0x39   : > { %384 = vmatprep.subr.bf16.mxu0 %v867_v2  ;;  %751 = vmatprep.subr.bf16.mxu1 %v867_v2 }
  0x3c   : > { %385 = vmatpush2.bf16.msra.mxu0 %v811_v12  ;;  %760 = vmatpush2.bf16.msra.mxu1 %v811_v12 }
  0x3f   : > { %387 = vmatmul.mubr.bf16.vlgmr.msra.gmra.mxu0 %v812_v13  ;;  %403 = vmatmul.mubr.bf16.vlgmr.msra.gmra.mxu1 %v815_v14 }
  0x40   : > { %718 = vmatprep.mubr.msk.bf16.mxu0 %vm341_vm1, %v818_v15  ;;  %720 = vmatprep.mubr.msk.bf16.mxu1 %vm341_vm1, %v821_v16 }
  0x47   : > { %395 = vmatmul.mubr.bf16.gmra.mxu0 %v820_v17  ;;  %411 = vmatmul.mubr.bf16.gmra.mxu1 %v823_v18  ;;  %v430_v18 = vld [vmem:[#allocation3] sm:$0x1] }
  0xff   : > { %v388_v19 = vpop.f32.mrf.mxu0  ;;  %v404_v20 = vpop.f32.mrf.mxu1 }
 0x100   : > { %422 = vst.msk [vmem:[#allocation2] sm:$0xff] %vm421_vm2, %v388_v19  ;;  %426 = vst.msk [vmem:[#allocation2 + $0x20] sm:$0xff] %vm421_vm2, %v404_v20  ;;  %v456_v28 = vmul.f32 %v388_v19, %v388_v19  ;;  %v431_v32 = vsel %vm421_vm2, %v388_v19, 0.0  ;;  %v460_v45 = vmul.f32 %v404_v20, %v404_v20  ;;  %v438_v52 = vsel %vm421_vm2, %v404_v20, 0.0 }
 0x101   : > { %v390_v21 = vpop.f32.mrf.mxu0  ;;  %v406_v22 = vpop.f32.mrf.mxu1 }
 0x102   : > { %v464_v39 = vsel %vm421_vm2, %v456_v28, 0.0  ;;  %v471_v57 = vsel %vm421_vm2, %v460_v45, 0.0  ;;  %v455_v21 = vld [vmem:[#allocation4] sm:$0x1] }
 0x103   : > { %v391_v23 = vpop.f32.mrf.mxu0  ;;  %v407_v24 = vpop.f32.mrf.mxu1 }
 0x104   : > { %423 = vst.msk [vmem:[#allocation2 + $0x8] sm:$0xff] %vm421_vm2, %v391_v23  ;;  %v457_v25 = vmul.f32 %v391_v23, %v391_v23  ;;  %427 = vst.msk [vmem:[#allocation2 + $0x28] sm:$0xff] %vm421_vm2, %v407_v24  ;;  %v432_v29 = vsel %vm421_vm2, %v391_v23, 0.0  ;;  %v461_v53 = vmul.f32 %v407_v24, %v407_v24  ;;  %v440_v58 = vsel %vm421_vm2, %v407_v24, 0.0 }
 0x105   : > { %v393_v26 = vpop.f32.mrf.mxu0  ;;  %v409_v27 = vpop.f32.mrf.mxu1  ;;  %v433_v36 = vadd.f32 %v432_v29, %v431_v32 }
 0x106   : > { %v465_v33 = vsel %vm421_vm2, %v457_v25, 0.0  ;;  %v473_v62 = vsel %vm421_vm2, %v461_v53, 0.0 }
 0x107   : > { %v396_v30 = vpop.f32.mrf.mxu0  ;;  %v412_v31 = vpop.f32.mrf.mxu1  ;;  %v466_v41 = vadd.f32 %v465_v33, %v464_v39 }
 0x108   : > { %424 = vst.msk [vmem:[#allocation2 + $0x10] sm:$0xff] %vm421_vm2, %v396_v30  ;;  %v434_v34 = vsel %vm421_vm2, %v396_v30, 0.0  ;;  %v458_v35 = vmul.f32 %v396_v30, %v396_v30  ;;  %428 = vst.msk [vmem:[#allocation2 + $0x30] sm:$0xff] %vm421_vm2, %v412_v31  ;;  %v462_v59 = vmul.f32 %v412_v31, %v412_v31  ;;  %v442_v63 = vsel %vm421_vm2, %v412_v31, 0.0 }
 0x109   : > { %v398_v37 = vpop.f32.mrf.mxu0  ;;  %v414_v38 = vpop.f32.mrf.mxu1  ;;  %v435_v42 = vadd.f32 %v434_v34, %v433_v36 }
 0x10a   : > { %v467_v40 = vsel %vm421_vm2, %v458_v35, 0.0  ;;  %v475_v3 = vsel %vm421_vm2, %v462_v59, 0.0 }
 0x10b   : > { %v399_v43 = vpop.f32.mrf.mxu0  ;;  %v415_v44 = vpop.f32.mrf.mxu1  ;;  %v468_v48 = vadd.f32 %v467_v40, %v466_v41 }
 0x10c   : > { %425 = vst.msk [vmem:[#allocation2 + $0x18] sm:$0xff] %vm421_vm2, %v399_v43  ;;  %v436_v46 = vsel %vm421_vm2, %v399_v43, 0.0  ;;  %v459_v47 = vmul.f32 %v399_v43, %v399_v43  ;;  %429 = vst.msk [vmem:[#allocation2 + $0x38] sm:$0xff] %vm421_vm2, %v415_v44  ;;  %v463_v0 = vmul.f32 %v415_v44, %v415_v44  ;;  %v444_v4 = vsel %vm421_vm2, %v415_v44, 0.0 }
 0x10d   : > { %v437_v49 = vadd.f32 %v436_v46, %v435_v42  ;;  %v401_v50 = vpop.f32.mrf.mxu0  ;;  %v417_v51 = vpop.f32.mrf.mxu1 }
 0x10e   : > { %v469_v54 = vsel %vm421_vm2, %v459_v47, 0.0  ;;  %v477_v7 = vsel %vm421_vm2, %v463_v0, 0.0 }
 0x10f   : > { %v439_v55 = vadd.f32 %v438_v52, %v437_v49  ;;  %v470_v56 = vadd.f32 %v469_v54, %v468_v48 }
 0x111   : > { %v472_v60 = vadd.f32 %v471_v57, %v470_v56  ;;  %v441_v61 = vadd.f32 %v440_v58, %v439_v55 }
 0x113   : > { %v443_v1 = vadd.f32 %v442_v63, %v441_v61  ;;  %v474_v2 = vadd.f32 %v473_v62, %v472_v60 }
 0x115   : > { %v445_v5 = vadd.f32 %v444_v4, %v443_v1  ;;  %v476_v6 = vadd.f32 %v475_v3, %v474_v2 }
 0x117   : > { %v446_v8 = vrot.slane %v445_v5, 4  ;;  %v478_v9 = vadd.f32 %v477_v7, %v476_v6 }
 0x119   : > { %v447_v10 = vadd.f32 %v446_v8, %v445_v5  ;;  %v479_v11 = vrot.slane %v478_v9, 4 }
 0x11b   : > { %v448_v12 = vrot.slane %v447_v10, 2  ;;  %v480_v13 = vadd.f32 %v479_v11, %v478_v9 }
 0x11d   : > { %v449_v14 = vadd.f32 %v448_v12, %v447_v10  ;;  %v481_v15 = vrot.slane %v480_v13, 2 }
 0x11f   : > { %v450_v16 = vrot.slane %v449_v14, 1  ;;  %v482_v17 = vadd.f32 %v481_v15, %v480_v13 }
 0x121   : > { %v451_v19 = vadd.f32 %v450_v16, %v449_v14  ;;  %v483_v20 = vrot.slane %v482_v17, 1 }
 0x123   : > { %v452_v22 = vadd.f32 %v451_v19, %v430_v18  ;;  %v484_v23 = vadd.f32 %v483_v20, %v482_v17 }
 0x125   : > { %454 = vst.msk [vmem:[#allocation3] sm:$0x1] %vm453_vm3, %v452_v22  ;;  %v485_v24 = vadd.f32 %v484_v23, %v455_v21 }
 0x127   : > { %486 = vst.msk [vmem:[#allocation4] sm:$0x1] %vm453_vm3, %v485_v24 }
 0x128 PF: > { %p721_p8 = scmp.ne.s32.totalorder %s848_s9, 1 }
 0x12a   : > { %490 = sbr.rel (%p721_p8) target bundleno = 338 (0x152), region = 40 }
 0x12f   : > { %v501_v25 = vld [vmem:[#allocation3] sm:$0x1]  ;;  %v503_v26 = vld [vmem:[#allocation4] sm:$0x1]  ;;  %v510_v31 = vlaneseq  ;;  %v494_v37 = vld [vmem:[#allocation2 + $0x8] sm:$0xff]  ;;  %vm577_vm4 = vcmask 257024  }
 0x130   : > { %v502_v27 = vmul.f32 0.015625, %v501_v25  ;;  %v504_v28 = vmul.f32 0.015625, %v503_v26  ;;  %v493_v35 = vld [vmem:[#allocation2] sm:$0xff]  ;;  %v495_v38 = vld [vmem:[#allocation2 + $0x10] sm:$0xff]  ;;  %v496_v39 = vld [vmem:[#allocation2 + $0x18] sm:$0xff] }
 0x131   : > { %v511_v33 = vshrl.u32 %v510_v31, 7  ;;  %v497_v40 = vld [vmem:[#allocation2 + $0x20] sm:$0xff]  ;;  %v498_v41 = vld [vmem:[#allocation2 + $0x28] sm:$0xff]  ;;  %v499_v42 = vld [vmem:[#allocation2 + $0x30] sm:$0xff] }
 0x132   : > { %v505_v29 = vmul.f32 %v502_v27, %v502_v27  ;;  %v500_v43 = vld [vmem:[#allocation2 + $0x38] sm:$0xff] }
 0x133   : > { %v512_v34 = vsub.s32 0, %v511_v33 }
 0x134   : > { %v506_v30 = vsub.f32 %v504_v28, %v505_v29 }
 0x135   : > { %v513_v36 = vrot.slane %v502_v27, %v512_v34 }
 0x136   : > { %v507_v32 = vadd.f32 1e-05, %v506_v30 }
 0x137   : > { %v515_v44 = vsub.f32 %v493_v35, %v513_v36  ;;  %v516_v45 = vsub.f32 %v494_v37, %v513_v36  ;;  %v517_v46 = vsub.f32 %v495_v38, %v513_v36  ;;  %v518_v47 = vsub.f32 %v496_v39, %v513_v36 }
 0x138   : > { %824 = vrsqrt.f32 %v507_v32  ;;  %v519_v49 = vsub.f32 %v497_v40, %v513_v36  ;;  %v520_v50 = vsub.f32 %v498_v41, %v513_v36  ;;  %v521_v51 = vsub.f32 %v499_v42, %v513_v36 }
 0x139   : > { %v522_v52 = vsub.f32 %v500_v43, %v513_v36 }
 0x145   : > { %v825_v48 = vpop.eup %824 }
 0x146   : > { %v527_v53 = vrot.slane %v825_v48, %v512_v34 }
 0x148   : > { %v529_v54 = vmul.f32 %v527_v53, %v515_v44  ;;  %v530_v55 = vmul.f32 %v527_v53, %v516_v45  ;;  %v531_v56 = vmul.f32 %v527_v53, %v517_v46  ;;  %v532_v57 = vmul.f32 %v527_v53, %v518_v47 }
 0x149   : > { %v533_v58 = vmul.f32 %v527_v53, %v519_v49  ;;  %v534_v59 = vmul.f32 %v527_v53, %v520_v50  ;;  %v535_v60 = vmul.f32 %v527_v53, %v521_v51  ;;  %v536_v61 = vmul.f32 %v527_v53, %v522_v52 }
 0x14a   : > { %v537_v62 = vmax.f32 %v529_v54, 0.0  ;;  %v538_v63 = vmax.f32 %v530_v55, 0.0  ;;  %v539_v0 = vmax.f32 %v531_v56, 0.0  ;;  %v540_v1 = vmax.f32 %v532_v57, 0.0 }
 0x14b   : > { %v541_v2 = vmax.f32 %v533_v58, 0.0  ;;  %v542_v3 = vmax.f32 %v534_v59, 0.0  ;;  %v543_v4 = vmax.f32 %v535_v60, 0.0  ;;  %v544_v5 = vmax.f32 %v536_v61, 0.0 }
 0x14c   : > { %v735_v6 = vpack.c.bf16 %v537_v62, %v537_v62  ;;  %v736_v7 = vpack.c.bf16 %v538_v63, %v538_v63  ;;  %v737_v8 = vpack.c.bf16 %v539_v0, %v539_v0  ;;  %v738_v9 = vpack.c.bf16 %v540_v1, %v540_v1 }
 0x14d   : > { %v739_v10 = vpack.c.bf16 %v541_v2, %v541_v2  ;;  %v740_v11 = vpack.c.bf16 %v542_v3, %v542_v3  ;;  %v741_v12 = vpack.c.bf16 %v543_v4, %v543_v4  ;;  %v742_v13 = vpack.c.bf16 %v544_v5, %v544_v5 }
 0x14e   : > { %578 = vst.msk [vmem:[%s924_s23] sm:$0xf] %vm577_vm4, %v735_v6  ;;  %579 = vst.msk [vmem:[%s924_s23 + $0x4] sm:$0xf] %vm577_vm4, %v736_v7 }
 0x14f   : > { %580 = vst.msk [vmem:[%s924_s23 + $0x8] sm:$0xf] %vm577_vm4, %v737_v8  ;;  %581 = vst.msk [vmem:[%s924_s23 + $0xc] sm:$0xf] %vm577_vm4, %v738_v9 }
 0x150   : > { %582 = vst.msk [vmem:[%s924_s23 + $0x10] sm:$0xf] %vm577_vm4, %v739_v10  ;;  %583 = vst.msk [vmem:[%s924_s23 + $0x14] sm:$0xf] %vm577_vm4, %v740_v11 }
 0x151   : > { %584 = vst.msk [vmem:[%s924_s23 + $0x18] sm:$0xf] %vm577_vm4, %v741_v12  ;;  %585 = vst.msk [vmem:[%s924_s23 + $0x1c] sm:$0xf] %vm577_vm4, %v742_v13 }
 0x152 PF: > { %s12_s13 = sadd.s32 1, %s864_s13   ;;  %s1025_s9 = smov %s856_s11 }
 0x153   : > { %p9_p9 = scmp.ge.s32.totalorder %s12_s13, 6   ;;  %s1026_s10 = smov %s860_s12 }
 0x154   : > { %s1027_s11 = smov %s1030_s14  ;;  %s1028_s12 = smov %s1034_s15 }
 0x155   :  { %11 = sbr.rel (!%p9_p9) target bundleno = 3 (0x3), region = 72 }

// kernel: latent_encoder_forward.7
= control target key start
LH: loop header
LB: loop body
LE: loop exit
PB: predicated region body
PF: predicated region fallthrough
CT: control target
= control target key end

     0   :  { %vm203_vm0 = vcmask 261120   ;;  %vm308_vm1 = vcmask 523264   ;;  %vm342_vm2 = vcmask 516096   ;;  %s1750_s22 = smov 64   ;;  %vm357_vm3 = vcmask 1040896   ;;  %s2185_s1 = inlined_call_operand.vmem [shape: bf16[288,64], index: 1, kind: input, shape index: {}]   ;;  %s2186_s0 = inlined_call_operand.vmem [shape: bf16[32,288], index: 0, kind: input, shape index: {}]   ;;  %s2187_s2 = inlined_call_operand.vmem [shape: bf16[1024,64], index: 2, kind: input, shape index: {}]   ;;  %s2188_s3 = inlined_call_operand.vmem [shape: bf16[64,128], index: 3, kind: input, shape index: {}]   ;;  %s2189_s4 = inlined_call_operand.vmem [shape: f32[1,128], index: 4, kind: input, shape index: {}]   ;;  %s2190_s5 = inlined_call_operand.vmem [shape: f32[2,128], index: 5, kind: output, shape index: {}]  }
   0x1   :  { %v1650_v0 = vld [vmem:[%s2185_s1 + $0x78] sm:$0xff]   ;;  %v1652_v2 = vld [vmem:[%s2185_s1 + $0x70] sm:$0xff]   ;;  %v1654_v4 = vld [vmem:[%s2185_s1 + $0x68] sm:$0xff]   ;;  %vm1752_vm4 = vmmov 0  }
   0x2   :  { %v1651_v1 = vld [vmem:[%s2185_s1 + $0x38] sm:$0xff]   ;;  %1501 = vmatprep.subr.bf16.mxu0 %v1650_v0  ;;  %v1653_v3 = vld [vmem:[%s2185_s1 + $0x30] sm:$0xff]   ;;  %v1655_v5 = vld [vmem:[%s2185_s1 + $0x28] sm:$0xff]  }
   0x3   :  { %1502 = vmatpush3.bf16.msra.mxu0 %v1651_v1  ;;  %v1656_v6 = vld [vmem:[%s2185_s1 + $0x60] sm:$0xff]   ;;  %v1661_v8 = vld [vmem:[%s2185_s1 + $0x88] sm:$0xff]   ;;  %v1658_v9 = vld [vmem:[%s2185_s1 + $0x58] sm:$0xff]  }
   0x4   :  { %1503 = vmatprep.subr.bf16.mxu0 %v1652_v2  ;;  %v1657_v7 = vld [vmem:[%s2185_s1 + $0x20] sm:$0xff]   ;;  %v1659_v10 = vld [vmem:[%s2185_s1 + $0x18] sm:$0xff]   ;;  %1626 = vmatprep.subr.bf16.mxu1 %v1661_v8  ;;  %v1660_v12 = vld [vmem:[%s2185_s1 + $0x50] sm:$0xff]  }
   0x5   :  { %1627 = vmatpush3.bf16.msra.mxu1 %v1661_v8  ;;  %v1664_v11 = vld [vmem:[%s2185_s1 + $0x80] sm:$0xff]   ;;  %v1666_v13 = vld [vmem:[%s2186_s0 + $0x8] ss:$12 sps:$4 sm:$0xff]   ;;  %v1676_v24 = vld [vmem:[%s2187_s2 + $0x78] sm:$0xff]  }
   0x6   :  { %1628 = vmatprep.subr.bf16.mxu1 %v1664_v11  ;;  %1630 = vmatprep.mubr.msk.bf16.mxu1 %vm203_vm0, %v1666_v13  ;;  %v1668_v14 = vld [vmem:[%s2186_s0 + $0x20] ss:$12 sps:$4 sm:$0xff]   ;;  %v1662_v15 = vld [vmem:[%s2185_s1 + $0x10] sm:$0xff]   ;;  %v1673_v22 = vld [vmem:[%s2186_s0 + $0x1c] ss:$12 sps:$4 sm:$0xff]  }
   0x7   :  { %1504 = vmatpush3.bf16.msra.mxu0 %v1653_v3  ;;  %v1663_v16 = vld [vmem:[%s2185_s1 + $0x48] sm:$0xff]   ;;  %v1672_v17 = vld [vmem:[%s2186_s0 + $0x4] ss:$12 sps:$4 sm:$0xff]   ;;  %v1677_v25 = vld [vmem:[%s2187_s2 + $0x38] sm:$0xff]  }
   0x8   :  { %1505 = vmatprep.subr.bf16.mxu0 %v1654_v4  ;;  %v1665_v18 = vld [vmem:[%s2185_s1 + $0x8] sm:$0xff]   ;;  %242 = vmatprep.mubr.bf16.mxu0 %v1672_v17  ;;  %v1667_v19 = vld [vmem:[%s2185_s1 + $0x40] sm:$0xff]   ;;  %v1678_v26 = vld [vmem:[%s2187_s2 + $0xf8] sm:$0xff]  }
   0x9   :  { %1629 = vmatpush3.bf16.msra.mxu1 %v1664_v11  ;;  %v1669_v20 = vld [vmem:[%s2185_s1] sm:$0xff]   ;;  %v1679_v27 = vld [vmem:[%s2187_s2 + $0xb8] sm:$0xff]  }
   0xa   :  { %v1670_v21 = vld [vmem:[%s2186_s0] ss:$12 sps:$4 sm:$0xff]   ;;  %v1675_v23 = vld [vmem:[%s2186_s0 + $0x18] ss:$12 sps:$4 sm:$0xff]   ;;  %1533 = vmatprep.subr.bf16.mxu1 %v1676_v24 }
   0xb   :  { %1506 = vmatpush3.bf16.msra.mxu0 %v1655_v5 }
   0xc   :  { %1507 = vmatprep.subr.bf16.mxu0 %v1656_v6  ;;  %1631 = vmatmul.mubr.msk.bf16.vlgmr.msra.gmra.mxu1 %vm203_vm0, %v1668_v14 }
   0xd   :  { %1534 = vmatpush3.bf16.msra.mxu1 %v1677_v25 }
   0xf   :  { %1508 = vmatpush3.bf16.msra.mxu0 %v1657_v7 }
  0x10   :  { %1509 = vmatprep.subr.bf16.mxu0 %v1658_v9 }
  0x13   :  { %1510 = vmatpush3.bf16.msra.mxu0 %v1659_v10 }
  0x14   :  { %1511 = vmatprep.subr.bf16.mxu0 %v1660_v12 }
  0x17   :  { %1512 = vmatpush3.bf16.msra.mxu0 %v1662_v15 }
  0x18   :  { %1513 = vmatprep.subr.bf16.mxu0 %v1663_v16 }
  0x1b   :  { %1514 = vmatpush3.bf16.msra.mxu0 %v1665_v18 }
  0x1c   :  { %1515 = vmatprep.subr.bf16.mxu0 %v1667_v19 }
  0x1f   :  { %1516 = vmatpush3.bf16.msra.mxu0 %v1669_v20 }
  0x20   :  { %1555 = vmatprep.subr.bf16.mxu0 %v1678_v26 }
  0x22   :  { %243 = vmatmul.mubr.bf16.vlgmr.msra.gmra.mxu0 %v1670_v21 }
  0x23   :  { %250 = vmatprep.mubr.bf16.mxu0 %v1673_v22  ;;  %1556 = vmatpush3.bf16.msra.mxu0 %v1679_v27 }
  0x2a   :  { %251 = vmatmul.mubr.bf16.gmra.mxu0 %v1675_v23 }
  0xcc   :  { %v1632_v28 = vpop.f32.mrf.mxu1 }
  0xce   :  { %v293_v29 = vpop.f32.mrf.mxu1 }
  0xd0   :  { %v1633_v33 = vpop.f32.mrf.mxu1 }
  0xd2   :  { %v296_v38 = vpop.f32.mrf.mxu1 }
  0xe2   :  { %v1517_v30 = vpop.f32.mrf.mxu0 }
  0xe4   :  { %v1518_v31 = vpop.f32.mrf.mxu0 }
  0xe5   :  { %v1519_v32 = vadd.f32 %v1518_v31, %v1517_v30 }
  0xe6   :  { %v1520_v34 = vpop.f32.mrf.mxu0 }
  0xe7   :  { %v1867_v35 = vadd.f32 %v1519_v32, %v293_v29 }
  0xe8   :  { %v1521_v36 = vpop.f32.mrf.mxu0 }
  0xe9   :  { %v1522_v37 = vadd.f32 %v1521_v36, %v1520_v34  ;;  %v320_v40 = vmul.f32 %v1867_v35, %v1867_v35  ;;  %v309_v43 = vsel %vm308_vm1, %v1867_v35, 0.0  ;;  %v348_v36 = vlaneseq }
  0xea   :  { %v1523_v39 = vpop.f32.mrf.mxu0 }
  0xeb   :  { %v1871_v41 = vadd.f32 %v1522_v37, %v296_v38  ;;  %v322_v49 = vsel %vm308_vm1, %v320_v40, 0.0  ;;  %v1680_v38 = vld [vmem:[%s2187_s2 + $0x70] sm:$0xff]  }
  0xec   :  { %v1524_v42 = vpop.f32.mrf.mxu0  ;;  %1535 = vmatprep.subr.bf16.mxu1 %v1680_v38  ;;  %v1702_v38 = vld [vmem:[%s2187_s2 + $0xc8] sm:$0xff]  }
  0xed   :  { %v310_v44 = vsel %vm308_vm1, %v1871_v41, 0.0  ;;  %v321_v45 = vmul.f32 %v1871_v41, %v1871_v41  ;;  %v1525_v46 = vadd.f32 %v1524_v42, %v1523_v39  ;;  %v1681_v39 = vld [vmem:[%s2187_s2 + $0x30] sm:$0xff]   ;;  %v349_v42 = vshrl.u32 %v348_v36, 7 }
  0xee   :  { %v311_v47 = vadd.f32 %v310_v44, %v309_v43  ;;  %v1526_v48 = vpop.f32.mrf.mxu0  ;;  %v1682_v43 = vld [vmem:[%s2187_s2 + $0xf0] sm:$0xff]   ;;  %1536 = vmatpush3.bf16.msra.mxu1 %v1681_v39 }
  0xef   :  { %v323_v50 = vsel %vm308_vm1, %v321_v45, 0.0  ;;  %v1881_v51 = vadd.f32 %v1632_v28, %v1525_v46  ;;  %v1683_v44 = vld [vmem:[%s2187_s2 + $0xb0] sm:$0xff]   ;;  %1557 = vmatprep.subr.bf16.mxu0 %v1682_v43  ;;  %v1704_v43 = vld [vmem:[%s2187_s2 + $0x40] sm:$0xff]  }
  0xf0   :  { %v312_v52 = vrot.slane %v311_v47, 4  ;;  %v324_v53 = vadd.f32 %v323_v50, %v322_v49  ;;  %v1527_v54 = vpop.f32.mrf.mxu0  ;;  %v1685_v49 = vld [vmem:[%s2187_s2 + $0x28] sm:$0xff]   ;;  %1558 = vmatpush3.bf16.msra.mxu0 %v1683_v44  ;;  %v1705_v44 = vld [vmem:[%s2187_s2] sm:$0xff]  }
  0xf1   :  { %v1528_v55 = vadd.f32 %v1527_v54, %v1526_v48  ;;  %v452_v58 = vmul.f32 %v1881_v51, %v1881_v51  ;;  %v442_v62 = vsel %vm308_vm1, %v1881_v51, 0.0  ;;  %v1684_v48 = vld [vmem:[%s2187_s2 + $0x68] sm:$0xff]  }
  0xf2   :  { %v313_v56 = vadd.f32 %v312_v52, %v311_v47  ;;  %v325_v57 = vrot.slane %v324_v53, 4  ;;  %1537 = vmatprep.subr.bf16.mxu1 %v1684_v48 }
  0xf3   :  { %v1885_v59 = vadd.f32 %v1633_v33, %v1528_v55  ;;  %v454_v4 = vsel %vm308_vm1, %v452_v58, 0.0  ;;  %v1749_v33 = vmov 1983009808   ;;  %1538 = vmatpush3.bf16.msra.mxu1 %v1685_v49  ;;  %v1708_v49 = vld [vmem:[%s2187_s2 + $0x178] sm:$0xff]  }
  0xf4   :  { %v314_v60 = vrot.slane %v313_v56, 2  ;;  %v326_v61 = vadd.f32 %v325_v57, %v324_v53  ;;  %v346_v34 = vunpack.c.l.s4 %v1749_v33 }
  0xf5   :  { %v443_v63 = vsel %vm308_vm1, %v1885_v59, 0.0  ;;  %v453_v0 = vmul.f32 %v1885_v59, %v1885_v59 }
  0xf6   :  { %v315_v1 = vadd.f32 %v314_v60, %v313_v56  ;;  %v327_v2 = vrot.slane %v326_v61, 2  ;;  %v444_v3 = vadd.f32 %v443_v63, %v442_v62  ;;  %v347_v40 = vunpack.c.0.s8 %v346_v34  ;;  %v1688_v56 = vld [vmem:[%s2187_s2 + $0x60] sm:$0xff]   ;;  %v1701_v34 = vld [vmem:[%s2187_s2 + $0x8] sm:$0xff]  }
  0xf7   :  { %v455_v5 = vsel %vm308_vm1, %v453_v0, 0.0  ;;  %v1689_v62 = vld [vmem:[%s2187_s2 + $0x20] sm:$0xff]   ;;  %1539 = vmatprep.subr.bf16.mxu1 %v1688_v56 }
  0xf8   :  { %v316_v6 = vrot.slane %v315_v1, 1  ;;  %v328_v7 = vadd.f32 %v327_v2, %v326_v61  ;;  %v445_v8 = vrot.slane %v444_v3, 4  ;;  %v456_v9 = vadd.f32 %v455_v5, %v454_v4  ;;  %v1690_v63 = vld [vmem:[%s2187_s2 + $0xe0] sm:$0xff]   ;;  %1540 = vmatpush3.bf16.msra.mxu1 %v1689_v62 }
  0xf9   :  { %v1919_v53 = vsub.s32 %v347_v40, %v349_v42  ;;  %v1703_v40 = vld [vmem:[%s2187_s2 + $0x88] sm:$0xff]  }
  0xfa   :  { %v317_v10 = vadd.f32 %v316_v6, %v315_v1  ;;  %v329_v11 = vrot.slane %v328_v7, 1  ;;  %v446_v12 = vadd.f32 %v445_v8, %v444_v3  ;;  %v457_v13 = vrot.slane %v456_v9, 4  ;;  %v1691_v3 = vld [vmem:[%s2187_s2 + $0xa0] sm:$0xff]   ;;  %v1692_v8 = vld [vmem:[%s2187_s2 + $0x58] sm:$0xff]  }
  0xfb   :  { %1541 = vmatprep.subr.bf16.mxu1 %v1692_v8 }
  0xfc   :  { %v319_v14 = vmul.f32 0.0625, %v317_v10  ;;  %v330_v15 = vadd.f32 %v329_v11, %v328_v7  ;;  %v447_v16 = vrot.slane %v446_v12, 2  ;;  %v458_v17 = vadd.f32 %v457_v13, %v456_v9  ;;  %v1694_v13 = vld [vmem:[%s2187_s2 + $0xd8] sm:$0xff]  }
  0xfe   :  { %v331_v18 = vmul.f32 0.0625, %v330_v15  ;;  %v332_v19 = vmul.f32 %v319_v14, %v319_v14  ;;  %v448_v20 = vadd.f32 %v447_v16, %v446_v12  ;;  %v459_v21 = vrot.slane %v458_v17, 2  ;;  %v1695_v16 = vld [vmem:[%s2187_s2 + $0x98] sm:$0xff]  }
  0xff   :  { %v335_v45 = vsub.f32 %v1871_v41, %v319_v14  ;;  %v334_v46 = vsub.f32 %v1867_v35, %v319_v14  ;;  %v1686_v35 = vld [vmem:[%s2187_s2 + $0xe8] sm:$0xff]  }
 0x100   :  { %v333_v22 = vsub.f32 %v331_v18, %v332_v19  ;;  %v449_v23 = vrot.slane %v448_v20, 1  ;;  %v460_v24 = vadd.f32 %v459_v21, %v458_v17  ;;  %v1687_v41 = vld [vmem:[%s2187_s2 + $0xa8] sm:$0xff]   ;;  %1559 = vmatprep.subr.bf16.mxu0 %v1686_v35  ;;  %v1696_v19 = vld [vmem:[%s2187_s2 + $0x50] sm:$0xff]  }
 0x101   :  { %1560 = vmatpush3.bf16.msra.mxu0 %v1687_v41  ;;  %v1697_v21 = vld [vmem:[%s2187_s2 + $0x10] sm:$0xff]  }
 0x102   :  { %v336_v25 = vadd.f32 1e-05, %v333_v22  ;;  %v450_v26 = vadd.f32 %v449_v23, %v448_v20  ;;  %v461_v27 = vrot.slane %v460_v24, 1  ;;  %1561 = vmatprep.subr.bf16.mxu0 %v1690_v63 }
 0x104   :  { %1745 = vrsqrt.f32 %v336_v25  ;;  %v1895_v28 = vmul.f32 0.0625, %v450_v26  ;;  %v462_v29 = vadd.f32 %v461_v27, %v460_v24  ;;  %v1698_v26 = vld [vmem:[%s2187_s2 + $0xd0] sm:$0xff]  }
 0x105   :  { %1562 = vmatpush3.bf16.msra.mxu0 %v1691_v3  ;;  %v1699_v27 = vld [vmem:[%s2187_s2 + $0x90] sm:$0xff]  }
 0x106   :  { %v464_v30 = vmul.f32 %v1895_v28, %v1895_v28  ;;  %v463_v31 = vmul.f32 0.0625, %v462_v29  ;;  %v467_v4 = vsub.f32 %v1885_v59, %v1895_v28  ;;  %v466_v5 = vsub.f32 %v1881_v51, %v1895_v28  ;;  %v1693_v51 = vld [vmem:[%s2187_s2 + $0x18] sm:$0xff]   ;;  %1563 = vmatprep.subr.bf16.mxu0 %v1694_v13 }
 0x107   :  { %1542 = vmatpush3.bf16.msra.mxu1 %v1693_v51  ;;  %v1709_v13 = vld [vmem:[%s2187_s2 + $0x138] sm:$0xff]  }
 0x108   :  { %v465_v32 = vsub.f32 %v463_v31, %v464_v30  ;;  %1543 = vmatprep.subr.bf16.mxu1 %v1696_v19  ;;  %v1700_v31 = vld [vmem:[%s2187_s2 + $0x48] sm:$0xff]   ;;  %v1711_v19 = vld [vmem:[%s2187_s2 + $0x1b8] sm:$0xff]  }
 0x109   :  { %1564 = vmatpush3.bf16.msra.mxu0 %v1695_v16 }
 0x10a   :  { %v468_v37 = vadd.f32 1e-05, %v465_v32  ;;  %1565 = vmatprep.subr.bf16.mxu0 %v1698_v26  ;;  %v1718_v26 = vld [vmem:[%s2187_s2 + $0x1e8] sm:$0xff]  }
 0x10b   :  { %1544 = vmatpush3.bf16.msra.mxu1 %v1697_v21 }
 0x10c   :  { %1747 = vrsqrt.f32 %v468_v37  ;;  %1545 = vmatprep.subr.bf16.mxu1 %v1700_v31 }
 0x10d   :  { %1566 = vmatpush3.bf16.msra.mxu0 %v1699_v27  ;;  %v1717_v27 = vld [vmem:[%s2187_s2 + $0x128] sm:$0xff]  }
 0x10e   :  { %1567 = vmatprep.subr.bf16.mxu0 %v1702_v38 }
 0x10f   :  { %1546 = vmatpush3.bf16.msra.mxu1 %v1701_v34 }
 0x110   :  { %1547 = vmatprep.subr.bf16.mxu1 %v1704_v43  ;;  %v1725_v43 = vld [vmem:[%s2187_s2 + $0x118] sm:$0xff]  }
 0x111   :  { %v1746_v47 = vpop.eup %1745  ;;  %1568 = vmatpush3.bf16.msra.mxu0 %v1703_v40  ;;  %v1726_v40 = vld [vmem:[%s2187_s2 + $0x1d8] sm:$0xff]  }
 0x112   :  { %v339_v50 = vmul.f32 %v1746_v47, %v335_v45  ;;  %v338_v52 = vmul.f32 %v1746_v47, %v334_v46  ;;  %v1706_v46 = vld [vmem:[%s2187_s2 + $0xc0] sm:$0xff]  }
 0x113   :  { %1548 = vmatpush3.bf16.msra.mxu1 %v1705_v44  ;;  %v1707_v47 = vld [vmem:[%s2187_s2 + $0x80] sm:$0xff]   ;;  %1569 = vmatprep.subr.bf16.mxu0 %v1706_v46  ;;  %v1728_v46 = vld [vmem:[%s2187_s2 + $0x198] sm:$0xff]  }
 0x114   :  { %v341_v54 = vmax.f32 %v339_v50, 0.0  ;;  %v340_v55 = vmax.f32 %v338_v52, 0.0  ;;  %1577 = vmatprep.subr.bf16.mxu1 %v1708_v49  ;;  %v1710_v52 = vld [vmem:[%s2187_s2 + $0x1f8] sm:$0xff]   ;;  %v1733_v49 = vld [vmem:[%s2187_s2 + $0x148] sm:$0xff]  }
 0x115   :  { %1570 = vmatpush3.bf16.msra.mxu0 %v1707_v47  ;;  %v1731_v47 = vld [vmem:[%s2187_s2 + $0x1d0] sm:$0xff]  }
 0x116   :  { %v351_v57 = vrot.slane %v340_v55, %v1919_v53  ;;  %v368_v58 = vcombine.high %v340_v55, %v340_v55  ;;  %v1932_v60 = vrot.slane %v341_v54, %v1919_v53  ;;  %v417_v61 = vcombine.high %v341_v54, %v341_v54  ;;  %343 = vst.msk [vmem:[#allocation2] sm:$0x1] %vm342_vm2, %v340_v55 }
 0x117   :  { %393 = vst.msk [vmem:[#allocation2 + $0x8] sm:$0x1] %vm342_vm2, %v341_v54  ;;  %1599 = vmatprep.subr.bf16.mxu0 %v1710_v52  ;;  %v1735_v52 = vld [vmem:[%s2187_s2 + $0x1c8] sm:$0xff]  }
 0x118   :  { %v1415_v0 = vrot.slane %v351_v57, 9  ;;  %v359_v1 = vcombine.high %v351_v57, %v351_v57  ;;  %v375_v2 = vrot.slane %v368_v58, %v1919_v53  ;;  %v1952_v6 = vcombine.high %v1932_v60, %v1932_v60 }
 0x119   :  { %v1955_v7 = vrot.slane %v417_v61, %v1919_v53  ;;  %v1748_v9 = vpop.eup %1747  ;;  %v1419_v48 = vrot.slane %v1932_v60, 9 }
 0x11a   :  { %354 = vrot.lane.b32.xlu0 %v1415_v0, %s1750_s22  ;;  %v1417_v59 = vrot.slane %v375_v2, 9  ;;  %v384_v10 = vcombine.high %v375_v2, %v375_v2  ;;  %361 = vst.msk [vmem:[#allocation2 + $0x2] sm:$0x1] %vm342_vm2, %v359_v1  ;;  %377 = vst.msk [vmem:[#allocation2 + $0x4] sm:$0x1] %vm342_vm2, %v375_v2  ;;  %v471_v11 = vmul.f32 %v1748_v9, %v467_v4  ;;  %v1416_v14 = vrot.slane %v359_v1, 9 }
 0x11b   :  { %v470_v12 = vmul.f32 %v1748_v9, %v466_v5  ;;  %410 = vst.msk [vmem:[#allocation2 + $0xa] sm:$0x1] %vm342_vm2, %v1952_v6  ;;  %426 = vst.msk [vmem:[#allocation2 + $0xc] sm:$0x1] %vm342_vm2, %v1955_v7  ;;  %v1976_v15 = vcombine.high %v1955_v7, %v1955_v7  ;;  %v1420_v50 = vrot.slane %v1952_v6, 9  ;;  %v1421_v35 = vrot.slane %v1955_v7, 9 }
 0x11c   :  { %380 = vrot.lane.b32.xlu1 %v1417_v59, %s1750_s22  ;;  %386 = vst.msk [vmem:[#allocation2 + $0x6] sm:$0x1] %vm342_vm2, %v384_v10  ;;  %v473_v17 = vmax.f32 %v471_v11, 0.0  ;;  %v1418_v20 = vrot.slane %v384_v10, 9 }
 0x11d   :  { %v472_v18 = vmax.f32 %v470_v12, 0.0  ;;  %435 = vst.msk [vmem:[#allocation2 + $0xe] sm:$0x1] %vm342_vm2, %v1976_v15  ;;  %v1422_v41 = vrot.slane %v1976_v15, 9 }
 0x11e   :  { %364 = vrot.lane.b32.xlu0 %v1416_v14, %s1750_s22  ;;  %v531_v24 = vrot.slane %v473_v17, %v1919_v53  ;;  %v547_v25 = vcombine.high %v473_v17, %v473_v17  ;;  %523 = vst.msk [vmem:[#allocation2 + $0x9] sm:$0x1] %vm342_vm2, %v473_v17  ;;  %v1712_v17 = vld [vmem:[%s2187_s2 + $0x170] sm:$0xff]  }
 0x11f   :  { %v482_v22 = vrot.slane %v472_v18, %v1919_v53  ;;  %v498_v23 = vcombine.high %v472_v18, %v472_v18  ;;  %474 = vst.msk [vmem:[#allocation2 + $0x1] sm:$0x1] %vm342_vm2, %v472_v18 }
 0x120   :  { %389 = vrot.lane.b32.xlu1 %v1418_v20, %s1750_s22  ;;  %v538_v32 = vcombine.high %v531_v24, %v531_v24  ;;  %v554_v33 = vrot.slane %v547_v25, %v1919_v53  ;;  %v1427_v54 = vrot.slane %v531_v24, 9  ;;  %v1716_v24 = vld [vmem:[%s2187_s2 + $0x168] sm:$0xff]   ;;  %v1715_v25 = vld [vmem:[%s2187_s2 + $0x1b0] sm:$0xff]  }
 0x121   :  { %v1423_v28 = vrot.slane %v482_v22, 9  ;;  %v489_v29 = vcombine.high %v482_v22, %v482_v22  ;;  %v505_v30 = vrot.slane %v498_v23, %v1919_v53  ;;  %v1714_v22 = vld [vmem:[%s2187_s2 + $0x1f0] sm:$0xff]  }
 0x122   :  { %v563_v39 = vcombine.high %v554_v33, %v554_v33  ;;  %540 = vst.msk [vmem:[#allocation2 + $0xb] sm:$0x1] %vm342_vm2, %v538_v32  ;;  %556 = vst.msk [vmem:[#allocation2 + $0xd] sm:$0x1] %vm342_vm2, %v554_v33  ;;  %v1428_v55 = vrot.slane %v538_v32, 9  ;;  %v1429_v56 = vrot.slane %v554_v33, 9 }
 0x123   :  { %485 = vrot.lane.b32.xlu0 %v1423_v28, %s1750_s22  ;;  %v1424_v36 = vrot.slane %v489_v29, 9  ;;  %v514_v37 = vcombine.high %v505_v30, %v505_v30  ;;  %491 = vst.msk [vmem:[#allocation2 + $0x3] sm:$0x1] %vm342_vm2, %v489_v29  ;;  %507 = vst.msk [vmem:[#allocation2 + $0x5] sm:$0x1] %vm342_vm2, %v505_v30  ;;  %v1425_v42 = vrot.slane %v505_v30, 9 }
 0x124   :  { %565 = vst.msk [vmem:[#allocation2 + $0xf] sm:$0x1] %vm342_vm2, %v563_v39  ;;  %v1430_v57 = vrot.slane %v563_v39, 9  ;;  %v1713_v23 = vld [vmem:[%s2187_s2 + $0x130] sm:$0xff]   ;;  %v1720_v28 = vld [vmem:[%s2187_s2 + $0x160] sm:$0xff]   ;;  %v1719_v29 = vld [vmem:[%s2187_s2 + $0x1a8] sm:$0xff]  }
 0x125   :  { %494 = vrot.lane.b32.xlu1 %v1424_v36, %s1750_s22  ;;  %516 = vst.msk [vmem:[#allocation2 + $0x7] sm:$0x1] %vm342_vm2, %v514_v37  ;;  %v1426_v45 = vrot.slane %v514_v37, 9  ;;  %v1722_v30 = vld [vmem:[%s2187_s2 + $0x1e0] sm:$0xff]   ;;  %v1724_v36 = vld [vmem:[%s2187_s2 + $0x158] sm:$0xff]  }
 0x126   :  { %v1721_v32 = vld [vmem:[%s2187_s2 + $0x120] sm:$0xff]  }
 0x127   :  { %510 = vrot.lane.b32.xlu0 %v1425_v42, %s1750_s22  ;;  %v1723_v37 = vld [vmem:[%s2187_s2 + $0x1a0] sm:$0xff]  }
 0x129   :  { %519 = vrot.lane.b32.xlu1 %v1426_v45, %s1750_s22  ;;  %v1729_v45 = vld [vmem:[%s2187_s2 + $0x150] sm:$0xff]  }
 0x12b   :  { %404 = vrot.lane.b32.xlu0 %v1419_v48, %s1750_s22  ;;  %v1730_v48 = vld [vmem:[%s2187_s2 + $0x110] sm:$0xff]  }
 0x12d   :  { %413 = vrot.lane.b32.xlu1 %v1420_v50, %s1750_s22  ;;  %v1732_v50 = vld [vmem:[%s2187_s2 + $0x190] sm:$0xff]  }
 0x12f   :  { %429 = vrot.lane.b32.xlu0 %v1421_v35, %s1750_s22  ;;  %v1734_v35 = vld [vmem:[%s2187_s2 + $0x108] sm:$0xff]  }
 0x131   :  { %438 = vrot.lane.b32.xlu1 %v1422_v41, %s1750_s22  ;;  %v1737_v41 = vld [vmem:[%s2187_s2 + $0x140] sm:$0xff]  }
 0x133   :  { %534 = vrot.lane.b32.xlu0 %v1427_v54, %s1750_s22  ;;  %v1736_v54 = vld [vmem:[%s2187_s2 + $0x188] sm:$0xff]  }
 0x135   :  { %543 = vrot.lane.b32.xlu1 %v1428_v55, %s1750_s22  ;;  %v1739_v55 = vld [vmem:[%s2187_s2 + $0x1c0] sm:$0xff]  }
 0x137   :  { %559 = vrot.lane.b32.xlu0 %v1429_v56, %s1750_s22  ;;  %v1738_v56 = vld [vmem:[%s2187_s2 + $0x100] sm:$0xff]  }
 0x139   :  { %568 = vrot.lane.b32.xlu1 %v1430_v57, %s1750_s22  ;;  %v1740_v57 = vld [vmem:[%s2187_s2 + $0x180] sm:$0xff]  }
 0x18c   :  { %v355_v58 = vpop.permute.xlu0 %354 }
 0x18d   :  { %358 = vst.msk [vmem:[#allocation2] sm:$0x1] %vm357_vm3, %v355_v58 }
 0x18e   :  { %v381_v60 = vpop.permute.xlu1 %380 }
 0x18f   :  { %383 = vst.msk [vmem:[#allocation2 + $0x4] sm:$0x1] %vm357_vm3, %v381_v60 }
 0x190   :  { %v365_v61 = vpop.permute.xlu0 %364 }
 0x191   :  { %367 = vst.msk [vmem:[#allocation2 + $0x2] sm:$0x1] %vm357_vm3, %v365_v61  ;;  %v1741_v61 = vld [vmem:[%s2188_s3 + $0x18] sm:$0xff]  }
 0x192   :  { %v390_v62 = vpop.permute.xlu1 %389 }
 0x193   :  { %392 = vst.msk [vmem:[#allocation2 + $0x6] sm:$0x1] %vm357_vm3, %v390_v62  ;;  %v1751_v62 = vmov 0.0  }
 0x195   :  { %v486_v63 = vpop.permute.xlu0 %485 }
 0x196   :  { %488 = vst.msk [vmem:[#allocation2 + $0x1] sm:$0x1] %vm357_vm3, %v486_v63  ;;  %v1742_v63 = vld [vmem:[%s2188_s3 + $0x10] sm:$0xff]  }
 0x197   :  { %v495_v0 = vpop.permute.xlu1 %494 }
 0x198   :  { %497 = vst.msk [vmem:[#allocation2 + $0x3] sm:$0x1] %vm357_vm3, %v495_v0  ;;  %v1743_v0 = vld [vmem:[%s2188_s3 + $0x8] sm:$0xff]  }
 0x199   :  { %v511_v1 = vpop.permute.xlu0 %510 }
 0x19a   :  { %513 = vst.msk [vmem:[#allocation2 + $0x5] sm:$0x1] %vm357_vm3, %v511_v1  ;;  %v1744_v1 = vld [vmem:[%s2188_s3] sm:$0xff]  }
 0x19b   :  { %v520_v2 = vpop.permute.xlu1 %519 }
 0x19c   :  { %522 = vst.msk [vmem:[#allocation2 + $0x7] sm:$0x1] %vm357_vm3, %v520_v2 }
 0x19d   :  { %v405_v3 = vpop.permute.xlu0 %404 }
 0x19e   :  { %407 = vst.msk [vmem:[#allocation2 + $0x8] sm:$0x1] %vm357_vm3, %v405_v3 }
 0x19f   :  { %v414_v4 = vpop.permute.xlu1 %413 }
 0x1a0   :  { %416 = vst.msk [vmem:[#allocation2 + $0xa] sm:$0x1] %vm357_vm3, %v414_v4 }
 0x1a1   :  { %v430_v5 = vpop.permute.xlu0 %429 }
 0x1a2   :  { %432 = vst.msk [vmem:[#allocation2 + $0xc] sm:$0x1] %vm357_vm3, %v430_v5 }
 0x1a3   :  { %v439_v6 = vpop.permute.xlu1 %438  ;;  %v572_v7 = vld [vmem:[#allocation2] sm:$0xff] }
 0x1a4   :  { %441 = vst.msk [vmem:[#allocation2 + $0xe] sm:$0x1] %vm357_vm3, %v439_v6  ;;  %v583_v8 = vrot.slane %v572_v7, %v1919_v53  ;;  %v576_v9 = vcombine.high %v572_v7, %v572_v7 }
 0x1a5   :  { %v535_v59 = vpop.permute.xlu0 %534 }
 0x1a6   :  { %537 = vst.msk [vmem:[#allocation2 + $0x9] sm:$0x1] %vm357_vm3, %v535_v59  ;;  %v591_v10 = vcombine.high %v583_v8, %v583_v8  ;;  %v590_v51 = vrot.slane %v576_v9, %v1919_v53  ;;  %v618_v16 = vpack.c.bf16 %v583_v8, %v583_v8 }
 0x1a7   :  { %v544_v11 = vpop.permute.xlu1 %543 }
 0x1a8   :  { %546 = vst.msk [vmem:[#allocation2 + $0xb] sm:$0x1] %vm357_vm3, %v544_v11  ;;  %v619_v12 = vpack.c.bf16 %v591_v10, %v591_v10  ;;  %v592_v14 = vcombine.high %v590_v51, %v590_v51  ;;  %v620_v21 = vpack.c.bf16 %v590_v51, %v590_v51 }
 0x1a9   :  { %v560_v15 = vpop.permute.xlu0 %559 }
 0x1aa   :  { %562 = vst.msk [vmem:[#allocation2 + $0xd] sm:$0x1] %vm357_vm3, %v560_v15  ;;  %1170 = vmatprep.mubr.bf16.mxu1 %v619_v12  ;;  %v621_v18 = vpack.c.bf16 %v592_v14, %v592_v14 }
 0x1ab   :  { %v569_v20 = vpop.permute.xlu1 %568  ;;  %1171 = vmatmul.mubr.bf16.vlgmr.msra.gmra.mxu1 %v618_v16 }
 0x1ac   :  { %571 = vst.msk [vmem:[#allocation2 + $0xf] sm:$0x1] %vm357_vm3, %v569_v20  ;;  %1578 = vmatpush3.bf16.msra.mxu1 %v1709_v13  ;;  %1210 = vmatprep.mubr.bf16.mxu0 %v621_v18 }
 0x1ad   :  { %1211 = vmatmul.mubr.bf16.vlgmr.msra.gmra.mxu0 %v620_v21  ;;  %1579 = vmatprep.subr.bf16.mxu1 %v1712_v17 }
 0x1ae   :  { %1600 = vmatpush3.bf16.msra.mxu0 %v1711_v19 }
 0x1af   :  { %1601 = vmatprep.subr.bf16.mxu0 %v1714_v22 }
 0x1b0   :  { %1580 = vmatpush3.bf16.msra.mxu1 %v1713_v23 }
 0x1b1   :  { %1581 = vmatprep.subr.bf16.mxu1 %v1716_v24 }
 0x1b2   :  { %1602 = vmatpush3.bf16.msra.mxu0 %v1715_v25 }
 0x1b3   :  { %1603 = vmatprep.subr.bf16.mxu0 %v1718_v26  ;;  %v573_v31 = vld [vmem:[#allocation2 + $0x8] sm:$0xff] }
 0x1b4   :  { %1582 = vmatpush3.bf16.msra.mxu1 %v1717_v27  ;;  %v600_v33 = vrot.slane %v573_v31, %v1919_v53  ;;  %v593_v34 = vcombine.high %v573_v31, %v573_v31  ;;  %v1495_v27 = vld [vmem:[%s2189_s4] ss:$0 sm:$0xff] }
 0x1b5   :  { %1583 = vmatprep.subr.bf16.mxu1 %v1720_v28 }
 0x1b6   :  { %1604 = vmatpush3.bf16.msra.mxu0 %v1719_v29  ;;  %v608_v38 = vcombine.high %v600_v33, %v600_v33  ;;  %v607_v39 = vrot.slane %v593_v34, %v1919_v53  ;;  %v622_v58 = vpack.c.bf16 %v600_v33, %v600_v33 }
 0x1b7   :  { %1605 = vmatprep.subr.bf16.mxu0 %v1722_v30 }
 0x1b8   :  { %1584 = vmatpush3.bf16.msra.mxu1 %v1721_v32  ;;  %v623_v42 = vpack.c.bf16 %v608_v38, %v608_v38  ;;  %v609_v44 = vcombine.high %v607_v39, %v607_v39  ;;  %v624_v60 = vpack.c.bf16 %v607_v39, %v607_v39 }
 0x1b9   :  { %1585 = vmatprep.subr.bf16.mxu1 %v1724_v36 }
 0x1ba   :  { %1606 = vmatpush3.bf16.msra.mxu0 %v1723_v37  ;;  %1250 = vmatprep.mubr.bf16.mxu1 %v623_v42  ;;  %v625_v53 = vpack.c.bf16 %v609_v44, %v609_v44 }
 0x1bb   :  { %1607 = vmatprep.subr.bf16.mxu0 %v1726_v40 }
 0x1bc   :  { %1586 = vmatpush3.bf16.msra.mxu1 %v1725_v43  ;;  %1290 = vmatprep.mubr.bf16.mxu0 %v625_v53 }
 0x1bd   :  { %1587 = vmatprep.subr.bf16.mxu1 %v1729_v45 }
 0x1be   :  { %1608 = vmatpush3.bf16.msra.mxu0 %v1728_v46 }
 0x1bf   :  { %1609 = vmatprep.subr.bf16.mxu0 %v1731_v47 }
 0x1c0   :  { %1588 = vmatpush3.bf16.msra.mxu1 %v1730_v48 }
 0x1c1   :  { %1589 = vmatprep.subr.bf16.mxu1 %v1733_v49 }
 0x1c2   :  { %1610 = vmatpush3.bf16.msra.mxu0 %v1732_v50 }
 0x1c3   :  { %1611 = vmatprep.subr.bf16.mxu0 %v1735_v52 }
 0x1c4   :  { %1590 = vmatpush3.bf16.msra.mxu1 %v1734_v35 }
 0x1c5   :  { %1591 = vmatprep.subr.bf16.mxu1 %v1737_v41 }
 0x1c6   :  { %1612 = vmatpush3.bf16.msra.mxu0 %v1736_v54 }
 0x1c7   :  { %1613 = vmatprep.subr.bf16.mxu0 %v1739_v55 }
 0x1c8   :  { %1592 = vmatpush3.bf16.msra.mxu1 %v1738_v56 }
 0x1c9   :  { %1634 = vmatprep.subr.bf16.mxu1 %v1751_v62 }
 0x1ca   :  { %1614 = vmatpush3.bf16.msra.mxu0 %v1740_v57 }
 0x1cb   :  { %1251 = vmatmul.mubr.bf16.vlgmr.msra.gmra.mxu1 %v622_v58 }
 0x1cc   :  { %1635 = vmatpush3.bf16.msra.mxu1 %v1741_v61  ;;  %1642 = vmatprep.mubr.msk.bf16.mxu1 %vm1752_vm4, %v1751_v62 }
 0x1cd   :  { %1291 = vmatmul.mubr.bf16.vlgmr.msra.gmra.mxu0 %v624_v60  ;;  %1636 = vmatprep.subr.bf16.mxu1 %v1751_v62 }
 0x1d0   :  { %1637 = vmatpush3.bf16.msra.mxu1 %v1742_v63 }
 0x1d1   :  { %1638 = vmatprep.subr.bf16.mxu1 %v1751_v62 }
 0x1d4   :  { %1639 = vmatpush3.bf16.msra.mxu1 %v1743_v0 }
 0x1d5   :  { %1640 = vmatprep.subr.bf16.mxu1 %v1751_v62 }
 0x1d8   :  { %1641 = vmatpush3.bf16.msra.mxu1 %v1744_v1 }
 0x26b   :  { %v1549_v2 = vpop.f32.mrf.mxu1 }
 0x26d   :  { %v1550_v3 = vpop.f32.mrf.mxu1  ;;  %v1571_v4 = vpop.f32.mrf.mxu0 }
 0x26e   :  { %v1551_v51 = vadd.f32 %v1550_v3, %v1549_v2 }
 0x26f   :  { %v1552_v5 = vpop.f32.mrf.mxu1  ;;  %v1572_v6 = vpop.f32.mrf.mxu0 }
 0x270   :  { %v1573_v59 = vadd.f32 %v1572_v6, %v1571_v4 }
 0x271   :  { %v1553_v7 = vpop.f32.mrf.mxu1  ;;  %v1574_v8 = vpop.f32.mrf.mxu0 }
 0x272   :  { %v1213_v13 = vadd.f32 %v1573_v59, %v1551_v51 }
 0x273   :  { %v1575_v9 = vpop.f32.mrf.mxu0 }
 0x28b   :  { %v1593_v10 = vpop.f32.mrf.mxu1 }
 0x28d   :  { %v1594_v11 = vpop.f32.mrf.mxu1  ;;  %v1615_v12 = vpop.f32.mrf.mxu0 }
 0x28e   :  { %v1595_v14 = vadd.f32 %v1594_v11, %v1593_v10 }
 0x28f   :  { %v1596_v15 = vpop.f32.mrf.mxu1  ;;  %v1616_v16 = vpop.f32.mrf.mxu0 }
 0x290   :  { %v1253_v17 = vadd.f32 %v1595_v14, %v1213_v13  ;;  %v1617_v18 = vadd.f32 %v1616_v16, %v1615_v12 }
 0x291   :  { %v1597_v19 = vpop.f32.mrf.mxu1  ;;  %v1618_v20 = vpop.f32.mrf.mxu0 }
 0x292   :  { %v1293_v21 = vadd.f32 %v1617_v18, %v1253_v17 }
 0x293   :  { %v1619_v22 = vpop.f32.mrf.mxu0 }
 0x294   :  { %v1298_v23 = vsub.f32 %v1293_v21, %v1293_v21 }
 0x296   :  { %v1299_v24 = vmul.f32 316.22778, %v1298_v23 }
 0x298   :  { %v1300_v25 = vmax.f32 %v1299_v24, 0.0 }
 0x29a   :  { %v1301_v26 = vpack.c.bf16 %v1300_v25, %v1300_v25 }
 0x29c   :  { %1643 = vmatmul.mubr.msk.bf16.vlgmr.msra.gmra.mxu1 %vm308_vm1, %v1301_v26 }
 0x35c   :  { %v1378_v28 = vpop.f32.mrf.mxu1 }
 0x35d   :  { %v1379_v29 = vadd.f32 %v1495_v27, %v1378_v28 }
 0x35e   :  { %v1644_v30 = vpop.f32.mrf.mxu1 }
 0x35f   :  { %1384 = vst [vmem:[%s2190_s5] sm:$0x3] %v1379_v29 }
 0x360   :  { %v1381_v31 = vpop.f32.mrf.mxu1 }
 0x362   :  { %v1645_v32 = vpop.f32.mrf.mxu1 }

</bundles_post_ra>
